<compile_context>
chip_gen: v7x
topology: tpu7x:2x2x1
jax: 0.10.0
libtpu: 0.0.40
codegen_flags: <defaults>
</compile_context>

<pallas_src>
import jax
import jax.numpy as jnp
from jax.experimental import pallas as pl
from jax.experimental.pallas import tpu as pltpu


def _fused_conv3d_bias_relu_kernel(p0_ref, p1_ref, p2_ref, w_ref, b_ref, o_ref):
    # p{k}_ref: (1, 1, H+2, W+2, Cin) bf16  -- padded input plane at depth d+k
    # w_ref   : (27*Cin, CP)          bf16  -- (kd,kh,kw,ci)-major rows, Cout padded to CP
    # b_ref   : (Cout, 1)             f32
    # o_ref   : (1, 1, Cout, H*W)     f32   -- lane-dense (spatial on lanes)
    Hp, Wp, Cin = p0_ref.shape[2], p0_ref.shape[3], p0_ref.shape[4]
    H, W = Hp - 2, Wp - 2
    HW = H * W
    CP = w_ref.shape[1]
    Cout = o_ref.shape[2]

    planes = (p0_ref[0, 0], p1_ref[0, 0], p2_ref[0, 0])

    # Fused im2col: 27 shifted patches, each a small matmul accumulated in f32.
    acc = jnp.zeros((HW, CP), jnp.float32)
    k = 0
    for kd in range(3):
        pln = planes[kd]                                   # (H+2, W+2, Cin) bf16
        for kh in range(3):
            for kw in range(3):
                patch = pln[kh:kh + H, kw:kw + W, :].reshape(HW, Cin)
                wk = w_ref[k * Cin:(k + 1) * Cin, :]       # (Cin, CP)
                acc = acc + jnp.dot(patch, wk, preferred_element_type=jnp.float32)
                k += 1

    # Transpose so the wide spatial dim sits on lanes, then f32 bias + ReLU.
    acc_t = jnp.transpose(acc)                             # (CP, HW)
    y = jnp.maximum(acc_t[:Cout, :] + b_ref[...], 0.0)     # (Cout, HW)
    o_ref[0, 0] = y.astype(o_ref.dtype)


def _upsample_linear_1d(x, axis, scale):
    """1-D linear resample with PyTorch align_corners=False semantics."""
    in_size = x.shape[axis]
    out_size = in_size * scale
    o = jnp.arange(out_size, dtype=jnp.float32)
    src = (o + 0.5) / scale - 0.5
    src = jnp.maximum(src, 0.0)                            # PyTorch clamps negative src
    i0 = jnp.floor(src).astype(jnp.int32)
    i0 = jnp.minimum(i0, in_size - 1)
    i1 = jnp.minimum(i0 + 1, in_size - 1)
    w1 = src - i0.astype(jnp.float32)
    w0 = 1.0 - w1
    x0 = jnp.take(x, i0, axis=axis)
    x1 = jnp.take(x, i1, axis=axis)
    shape = [1] * x.ndim
    shape[axis] = out_size
    return x0 * w0.reshape(shape) + x1 * w1.reshape(shape)


def trilinear_upsample(x_ndhwc, scale=2):
    # TODO(synk): fuse the 2x trilinear lerp (fixed 0.25/0.75 weights) into the conv
    # kernel via halo DMA to avoid writing the 8x upsampled volume to HBM.
    x = _upsample_linear_1d(x_ndhwc, axis=1, scale=scale)
    x = _upsample_linear_1d(x, axis=2, scale=scale)
    x = _upsample_linear_1d(x, axis=3, scale=scale)
    return x


def conv3x3x3_bias_relu(x_ndhwc, w_dhwio, bias):
    """3x3x3 conv (pad=1) + bias + ReLU, fused im2col in Pallas. Returns NCDHW."""
    N, D, H, W, Cin = x_ndhwc.shape
    Cout = w_dhwio.shape[-1]
    K = 27 * Cin
    CP = max(128, ((Cout + 127) // 128) * 128)             # lane/MXU-friendly width
    HW = H * W

    # Halo pad (conv padding=1); bf16 halves HBM and feeds the MXU natively.
    xp = jnp.pad(x_ndhwc, ((0, 0), (1, 1), (1, 1), (1, 1), (0, 0))).astype(jnp.bfloat16)
    w_mat = jnp.pad(w_dhwio.reshape(K, Cout).astype(jnp.bfloat16),
                    ((0, 0), (0, CP - Cout)))              # (K, CP)
    b_col = bias.astype(jnp.float32).reshape(Cout, 1)

    def plane_spec(kd):
        # Same padded array passed 3x; depth block size 1 => block index == element index,
        # so d+kd gives the 1-voxel depth halo without any HBM duplication.
        return pl.BlockSpec((1, 1, H + 2, W + 2, Cin),
                            lambda n, d: (n, d + kd, 0, 0, 0))

    in_bytes = 3 * xp.size * 2 + w_mat.size * 2 + b_col.size * 4
    out_bytes = N * D * Cout * HW * 4

    out = pl.pallas_call(
        _fused_conv3d_bias_relu_kernel,
        out_shape=jax.ShapeDtypeStruct((N, D, Cout, HW), jnp.float32),
        grid=(N, D),
        in_specs=[
            plane_spec(0), plane_spec(1), plane_spec(2),
            pl.BlockSpec((K, CP), lambda n, d: (0, 0)),
            pl.BlockSpec((Cout, 1), lambda n, d: (0, 0)),
        ],
        out_specs=pl.BlockSpec((1, 1, Cout, HW), lambda n, d: (n, d, 0, 0)),
        compiler_params=pltpu.CompilerParams(
            dimension_semantics=("parallel", "parallel")),
        cost_estimate=pl.CostEstimate(
            flops=2 * N * D * HW * K * CP,
            transcendentals=0,
            bytes_accessed=in_bytes + out_bytes),
    )(xp, xp, xp, w_mat, b_col)

    # (N, D, Cout, H*W) -> (N, Cout, D, H, W)
    return jnp.transpose(out.reshape(N, D, Cout, H, W), (0, 2, 1, 3, 4))


def upsampling_forward(x_ncdhw, w_oidhw, bias, stride=2):
    """Forward pass of Upsampling(n_in, n_out, stride, normalization='none')."""
    x = jnp.transpose(x_ncdhw, (0, 2, 3, 4, 1))            # NCDHW -> NDHWC
    x = trilinear_upsample(x, scale=stride)                # f32 lerp glue
    w_dhwio = jnp.transpose(w_oidhw, (2, 3, 4, 1, 0))      # (Co,Ci,kd,kh,kw)->(kd,kh,kw,Ci,Co)
    return conv3x3x3_bias_relu(x, w_dhwio, bias)           # NCDHW out


if __name__ == "__main__":
    key = jax.random.PRNGKey(0)
    k_x, k_w, k_b = jax.random.split(key, 3)

    N, Cin, D, H, W = 2, 4, 8, 8, 8
    Cout, stride = 8, 2

    x = jax.random.normal(k_x, (N, Cin, D, H, W), jnp.float32)
    # Deterministic params, PyTorch Conv3d default init ranges (fan_in = Cin*27)
    fan_in = Cin * 27
    bound = 1.0 / (fan_in ** 0.5)
    w = jax.random.uniform(k_w, (Cout, Cin, 3, 3, 3), jnp.float32, -bound, bound)
    b = jax.random.uniform(k_b, (Cout,), jnp.float32, -bound, bound)

    y = jax.jit(upsampling_forward)(x, w, b)
    y = jax.block_until_ready(y)
    assert y.shape == (N, Cout, D * stride, H * stride, W * stride)

    # Pure-JAX f32 reference (same math via XLA conv) for a numerical sanity check.
    x_up = trilinear_upsample(jnp.transpose(x, (0, 2, 3, 4, 1)), scale=stride)
    w_dhwio = jnp.transpose(w, (2, 3, 4, 1, 0))
    ref = jax.lax.conv_general_dilated(
        x_up, w_dhwio, window_strides=(1, 1, 1),
        padding=((1, 1), (1, 1), (1, 1)),
        dimension_numbers=("NDHWC", "DHWIO", "NDHWC"))
    ref = jnp.maximum(ref + b.reshape(1, 1, 1, 1, Cout), 0.0)
    ref = jnp.transpose(ref, (0, 4, 1, 2, 3))

    if bool(jnp.allclose(y, ref, atol=2e-2, rtol=2e-2)):
        print("KERNEL_OK")
    else:
        print("max diff:", float(jnp.max(jnp.abs(y - ref))))
</pallas_src>

<mosaic_0001>
module attributes {stable_mosaic.version = 11 : i64} {
  func.func @_fused_conv3d_bias_relu_kernel(%arg0: i32, %arg1: i32, %arg2: memref<1x1x18x18x4xbf16, #tpu.memory_space<vmem>>, %arg3: memref<1x1x18x18x4xbf16, #tpu.memory_space<vmem>>, %arg4: memref<1x1x18x18x4xbf16, #tpu.memory_space<vmem>>, %arg5: memref<108x128xbf16, #tpu.memory_space<vmem>>, %arg6: memref<8x1xf32, #tpu.memory_space<vmem>>, %arg7: memref<1x1x8x256xf32, #tpu.memory_space<vmem>>) attributes {dimension_semantics = [#tpu.dimension_semantics<parallel>, #tpu.dimension_semantics<parallel>], iteration_bounds = array<i64: 2, 16>, scalar_prefetch = 0 : i64, scratch_operands = 0 : i64, tpu.core_type = #tpu.core_type<tc>, window_params = [{transform_indices = @transform_0, window_bounds = array<i64: 1, 1, 18, 18, 4>}, {transform_indices = @transform_1, window_bounds = array<i64: 1, 1, 18, 18, 4>}, {transform_indices = @transform_2, window_bounds = array<i64: 1, 1, 18, 18, 4>}, {pipeline_mode = #tpu.pipeline_mode<synchronous>, transform_indices = @transform_3, window_bounds = array<i64: 108, 128>}, {pipeline_mode = #tpu.pipeline_mode<synchronous>, transform_indices = @transform_4, window_bounds = array<i64: 8, 1>}, {transform_indices = @transform_5, window_bounds = array<i64: 1, 1, 8, 256>}]} {
    %c0 = arith.constant 0 : index
    %c0_0 = arith.constant 0 : index
    %c0_1 = arith.constant 0 : index
    %c0_2 = arith.constant 0 : index
    %c0_3 = arith.constant 0 : index
    %0 = vector.load %arg2[%c0, %c0_0, %c0_1, %c0_2, %c0_3] : memref<1x1x18x18x4xbf16, #tpu.memory_space<vmem>>, vector<1x1x18x18x4xbf16>
    %1 = vector.shape_cast %0 : vector<1x1x18x18x4xbf16> to vector<18x18x4xbf16>
    %c0_4 = arith.constant 0 : index
    %c0_5 = arith.constant 0 : index
    %c0_6 = arith.constant 0 : index
    %c0_7 = arith.constant 0 : index
    %c0_8 = arith.constant 0 : index
    %2 = vector.load %arg3[%c0_4, %c0_5, %c0_6, %c0_7, %c0_8] : memref<1x1x18x18x4xbf16, #tpu.memory_space<vmem>>, vector<1x1x18x18x4xbf16>
    %3 = vector.shape_cast %2 : vector<1x1x18x18x4xbf16> to vector<18x18x4xbf16>
    %c0_9 = arith.constant 0 : index
    %c0_10 = arith.constant 0 : index
    %c0_11 = arith.constant 0 : index
    %c0_12 = arith.constant 0 : index
    %c0_13 = arith.constant 0 : index
    %4 = vector.load %arg4[%c0_9, %c0_10, %c0_11, %c0_12, %c0_13] : memref<1x1x18x18x4xbf16, #tpu.memory_space<vmem>>, vector<1x1x18x18x4xbf16>
    %5 = vector.shape_cast %4 : vector<1x1x18x18x4xbf16> to vector<18x18x4xbf16>
    %cst = arith.constant 0.000000e+00 : f32
    %6 = vector.broadcast %cst : f32 to vector<256x128xf32>
    %7 = vector.extract_strided_slice %1 {offsets = [0, 0, 0], sizes = [16, 16, 4], strides = [1, 1, 1]} : vector<18x18x4xbf16> to vector<16x16x4xbf16>
    %8 = vector.shape_cast %7 : vector<16x16x4xbf16> to vector<256x4xbf16>
    %c0_14 = arith.constant 0 : index
    %c0_15 = arith.constant 0 : index
    %9 = vector.load %arg5[%c0_14, %c0_15] : memref<108x128xbf16, #tpu.memory_space<vmem>>, vector<4x128xbf16>
    %cst_16 = arith.constant dense<0.000000e+00> : vector<256x128xf32>
    %10 = tpu.matmul %8, %9, %cst_16 {dimension_numbers = #tpu.dot_dimension_numbers<[1], [0], [0], [1], [0, 0, 1, 1], [], []>} : vector<256x4xbf16>, vector<4x128xbf16>, vector<256x128xf32> -> vector<256x128xf32>
    %11 = arith.addf %6, %10 : vector<256x128xf32>
    %12 = vector.extract_strided_slice %1 {offsets = [0, 1, 0], sizes = [16, 16, 4], strides = [1, 1, 1]} : vector<18x18x4xbf16> to vector<16x16x4xbf16>
    %13 = vector.shape_cast %12 : vector<16x16x4xbf16> to vector<256x4xbf16>
    %c4 = arith.constant 4 : index
    %c0_17 = arith.constant 0 : index
    %14 = vector.load %arg5[%c4, %c0_17] : memref<108x128xbf16, #tpu.memory_space<vmem>>, vector<4x128xbf16>
    %cst_18 = arith.constant dense<0.000000e+00> : vector<256x128xf32>
    %15 = tpu.matmul %13, %14, %cst_18 {dimension_numbers = #tpu.dot_dimension_numbers<[1], [0], [0], [1], [0, 0, 1, 1], [], []>} : vector<256x4xbf16>, vector<4x128xbf16>, vector<256x128xf32> -> vector<256x128xf32>
    %16 = arith.addf %11, %15 : vector<256x128xf32>
    %17 = vector.extract_strided_slice %1 {offsets = [0, 2, 0], sizes = [16, 16, 4], strides = [1, 1, 1]} : vector<18x18x4xbf16> to vector<16x16x4xbf16>
    %18 = vector.shape_cast %17 : vector<16x16x4xbf16> to vector<256x4xbf16>
    %c8 = arith.constant 8 : index
    %c0_19 = arith.constant 0 : index
    %19 = vector.load %arg5[%c8, %c0_19] : memref<108x128xbf16, #tpu.memory_space<vmem>>, vector<4x128xbf16>
    %cst_20 = arith.constant dense<0.000000e+00> : vector<256x128xf32>
    %20 = tpu.matmul %18, %19, %cst_20 {dimension_numbers = #tpu.dot_dimension_numbers<[1], [0], [0], [1], [0, 0, 1, 1], [], []>} : vector<256x4xbf16>, vector<4x128xbf16>, vector<256x128xf32> -> vector<256x128xf32>
    %21 = arith.addf %16, %20 : vector<256x128xf32>
    %22 = vector.extract_strided_slice %1 {offsets = [1, 0, 0], sizes = [16, 16, 4], strides = [1, 1, 1]} : vector<18x18x4xbf16> to vector<16x16x4xbf16>
    %23 = vector.shape_cast %22 : vector<16x16x4xbf16> to vector<256x4xbf16>
    %c12 = arith.constant 12 : index
    %c0_21 = arith.constant 0 : index
    %24 = vector.load %arg5[%c12, %c0_21] : memref<108x128xbf16, #tpu.memory_space<vmem>>, vector<4x128xbf16>
    %cst_22 = arith.constant dense<0.000000e+00> : vector<256x128xf32>
    %25 = tpu.matmul %23, %24, %cst_22 {dimension_numbers = #tpu.dot_dimension_numbers<[1], [0], [0], [1], [0, 0, 1, 1], [], []>} : vector<256x4xbf16>, vector<4x128xbf16>, vector<256x128xf32> -> vector<256x128xf32>
    %26 = arith.addf %21, %25 : vector<256x128xf32>
    %27 = vector.extract_strided_slice %1 {offsets = [1, 1, 0], sizes = [16, 16, 4], strides = [1, 1, 1]} : vector<18x18x4xbf16> to vector<16x16x4xbf16>
    %28 = vector.shape_cast %27 : vector<16x16x4xbf16> to vector<256x4xbf16>
    %c16 = arith.constant 16 : index
    %c0_23 = arith.constant 0 : index
    %29 = vector.load %arg5[%c16, %c0_23] : memref<108x128xbf16, #tpu.memory_space<vmem>>, vector<4x128xbf16>
    %cst_24 = arith.constant dense<0.000000e+00> : vector<256x128xf32>
    %30 = tpu.matmul %28, %29, %cst_24 {dimension_numbers = #tpu.dot_dimension_numbers<[1], [0], [0], [1], [0, 0, 1, 1], [], []>} : vector<256x4xbf16>, vector<4x128xbf16>, vector<256x128xf32> -> vector<256x128xf32>
    %31 = arith.addf %26, %30 : vector<256x128xf32>
    %32 = vector.extract_strided_slice %1 {offsets = [1, 2, 0], sizes = [16, 16, 4], strides = [1, 1, 1]} : vector<18x18x4xbf16> to vector<16x16x4xbf16>
    %33 = vector.shape_cast %32 : vector<16x16x4xbf16> to vector<256x4xbf16>
    %c20 = arith.constant 20 : index
    %c0_25 = arith.constant 0 : index
    %34 = vector.load %arg5[%c20, %c0_25] : memref<108x128xbf16, #tpu.memory_space<vmem>>, vector<4x128xbf16>
    %cst_26 = arith.constant dense<0.000000e+00> : vector<256x128xf32>
    %35 = tpu.matmul %33, %34, %cst_26 {dimension_numbers = #tpu.dot_dimension_numbers<[1], [0], [0], [1], [0, 0, 1, 1], [], []>} : vector<256x4xbf16>, vector<4x128xbf16>, vector<256x128xf32> -> vector<256x128xf32>
    %36 = arith.addf %31, %35 : vector<256x128xf32>
    %37 = vector.extract_strided_slice %1 {offsets = [2, 0, 0], sizes = [16, 16, 4], strides = [1, 1, 1]} : vector<18x18x4xbf16> to vector<16x16x4xbf16>
    %38 = vector.shape_cast %37 : vector<16x16x4xbf16> to vector<256x4xbf16>
    %c24 = arith.constant 24 : index
    %c0_27 = arith.constant 0 : index
    %39 = vector.load %arg5[%c24, %c0_27] : memref<108x128xbf16, #tpu.memory_space<vmem>>, vector<4x128xbf16>
    %cst_28 = arith.constant dense<0.000000e+00> : vector<256x128xf32>
    %40 = tpu.matmul %38, %39, %cst_28 {dimension_numbers = #tpu.dot_dimension_numbers<[1], [0], [0], [1], [0, 0, 1, 1], [], []>} : vector<256x4xbf16>, vector<4x128xbf16>, vector<256x128xf32> -> vector<256x128xf32>
    %41 = arith.addf %36, %40 : vector<256x128xf32>
    %42 = vector.extract_strided_slice %1 {offsets = [2, 1, 0], sizes = [16, 16, 4], strides = [1, 1, 1]} : vector<18x18x4xbf16> to vector<16x16x4xbf16>
    %43 = vector.shape_cast %42 : vector<16x16x4xbf16> to vector<256x4xbf16>
    %c28 = arith.constant 28 : index
    %c0_29 = arith.constant 0 : index
    %44 = vector.load %arg5[%c28, %c0_29] : memref<108x128xbf16, #tpu.memory_space<vmem>>, vector<4x128xbf16>
    %cst_30 = arith.constant dense<0.000000e+00> : vector<256x128xf32>
    %45 = tpu.matmul %43, %44, %cst_30 {dimension_numbers = #tpu.dot_dimension_numbers<[1], [0], [0], [1], [0, 0, 1, 1], [], []>} : vector<256x4xbf16>, vector<4x128xbf16>, vector<256x128xf32> -> vector<256x128xf32>
    %46 = arith.addf %41, %45 : vector<256x128xf32>
    %47 = vector.extract_strided_slice %1 {offsets = [2, 2, 0], sizes = [16, 16, 4], strides = [1, 1, 1]} : vector<18x18x4xbf16> to vector<16x16x4xbf16>
    %48 = vector.shape_cast %47 : vector<16x16x4xbf16> to vector<256x4xbf16>
    %c32 = arith.constant 32 : index
    %c0_31 = arith.constant 0 : index
    %49 = vector.load %arg5[%c32, %c0_31] : memref<108x128xbf16, #tpu.memory_space<vmem>>, vector<4x128xbf16>
    %cst_32 = arith.constant dense<0.000000e+00> : vector<256x128xf32>
    %50 = tpu.matmul %48, %49, %cst_32 {dimension_numbers = #tpu.dot_dimension_numbers<[1], [0], [0], [1], [0, 0, 1, 1], [], []>} : vector<256x4xbf16>, vector<4x128xbf16>, vector<256x128xf32> -> vector<256x128xf32>
    %51 = arith.addf %46, %50 : vector<256x128xf32>
    %52 = vector.extract_strided_slice %3 {offsets = [0, 0, 0], sizes = [16, 16, 4], strides = [1, 1, 1]} : vector<18x18x4xbf16> to vector<16x16x4xbf16>
    %53 = vector.shape_cast %52 : vector<16x16x4xbf16> to vector<256x4xbf16>
    %c36 = arith.constant 36 : index
    %c0_33 = arith.constant 0 : index
    %54 = vector.load %arg5[%c36, %c0_33] : memref<108x128xbf16, #tpu.memory_space<vmem>>, vector<4x128xbf16>
    %cst_34 = arith.constant dense<0.000000e+00> : vector<256x128xf32>
    %55 = tpu.matmul %53, %54, %cst_34 {dimension_numbers = #tpu.dot_dimension_numbers<[1], [0], [0], [1], [0, 0, 1, 1], [], []>} : vector<256x4xbf16>, vector<4x128xbf16>, vector<256x128xf32> -> vector<256x128xf32>
    %56 = arith.addf %51, %55 : vector<256x128xf32>
    %57 = vector.extract_strided_slice %3 {offsets = [0, 1, 0], sizes = [16, 16, 4], strides = [1, 1, 1]} : vector<18x18x4xbf16> to vector<16x16x4xbf16>
    %58 = vector.shape_cast %57 : vector<16x16x4xbf16> to vector<256x4xbf16>
    %c40 = arith.constant 40 : index
    %c0_35 = arith.constant 0 : index
    %59 = vector.load %arg5[%c40, %c0_35] : memref<108x128xbf16, #tpu.memory_space<vmem>>, vector<4x128xbf16>
    %cst_36 = arith.constant dense<0.000000e+00> : vector<256x128xf32>
    %60 = tpu.matmul %58, %59, %cst_36 {dimension_numbers = #tpu.dot_dimension_numbers<[1], [0], [0], [1], [0, 0, 1, 1], [], []>} : vector<256x4xbf16>, vector<4x128xbf16>, vector<256x128xf32> -> vector<256x128xf32>
    %61 = arith.addf %56, %60 : vector<256x128xf32>
    %62 = vector.extract_strided_slice %3 {offsets = [0, 2, 0], sizes = [16, 16, 4], strides = [1, 1, 1]} : vector<18x18x4xbf16> to vector<16x16x4xbf16>
    %63 = vector.shape_cast %62 : vector<16x16x4xbf16> to vector<256x4xbf16>
    %c44 = arith.constant 44 : index
    %c0_37 = arith.constant 0 : index
    %64 = vector.load %arg5[%c44, %c0_37] : memref<108x128xbf16, #tpu.memory_space<vmem>>, vector<4x128xbf16>
    %cst_38 = arith.constant dense<0.000000e+00> : vector<256x128xf32>
    %65 = tpu.matmul %63, %64, %cst_38 {dimension_numbers = #tpu.dot_dimension_numbers<[1], [0], [0], [1], [0, 0, 1, 1], [], []>} : vector<256x4xbf16>, vector<4x128xbf16>, vector<256x128xf32> -> vector<256x128xf32>
    %66 = arith.addf %61, %65 : vector<256x128xf32>
    %67 = vector.extract_strided_slice %3 {offsets = [1, 0, 0], sizes = [16, 16, 4], strides = [1, 1, 1]} : vector<18x18x4xbf16> to vector<16x16x4xbf16>
    %68 = vector.shape_cast %67 : vector<16x16x4xbf16> to vector<256x4xbf16>
    %c48 = arith.constant 48 : index
    %c0_39 = arith.constant 0 : index
    %69 = vector.load %arg5[%c48, %c0_39] : memref<108x128xbf16, #tpu.memory_space<vmem>>, vector<4x128xbf16>
    %cst_40 = arith.constant dense<0.000000e+00> : vector<256x128xf32>
    %70 = tpu.matmul %68, %69, %cst_40 {dimension_numbers = #tpu.dot_dimension_numbers<[1], [0], [0], [1], [0, 0, 1, 1], [], []>} : vector<256x4xbf16>, vector<4x128xbf16>, vector<256x128xf32> -> vector<256x128xf32>
    %71 = arith.addf %66, %70 : vector<256x128xf32>
    %72 = vector.extract_strided_slice %3 {offsets = [1, 1, 0], sizes = [16, 16, 4], strides = [1, 1, 1]} : vector<18x18x4xbf16> to vector<16x16x4xbf16>
    %73 = vector.shape_cast %72 : vector<16x16x4xbf16> to vector<256x4xbf16>
    %c52 = arith.constant 52 : index
    %c0_41 = arith.constant 0 : index
    %74 = vector.load %arg5[%c52, %c0_41] : memref<108x128xbf16, #tpu.memory_space<vmem>>, vector<4x128xbf16>
    %cst_42 = arith.constant dense<0.000000e+00> : vector<256x128xf32>
    %75 = tpu.matmul %73, %74, %cst_42 {dimension_numbers = #tpu.dot_dimension_numbers<[1], [0], [0], [1], [0, 0, 1, 1], [], []>} : vector<256x4xbf16>, vector<4x128xbf16>, vector<256x128xf32> -> vector<256x128xf32>
    %76 = arith.addf %71, %75 : vector<256x128xf32>
    %77 = vector.extract_strided_slice %3 {offsets = [1, 2, 0], sizes = [16, 16, 4], strides = [1, 1, 1]} : vector<18x18x4xbf16> to vector<16x16x4xbf16>
    %78 = vector.shape_cast %77 : vector<16x16x4xbf16> to vector<256x4xbf16>
    %c56 = arith.constant 56 : index
    %c0_43 = arith.constant 0 : index
    %79 = vector.load %arg5[%c56, %c0_43] : memref<108x128xbf16, #tpu.memory_space<vmem>>, vector<4x128xbf16>
    %cst_44 = arith.constant dense<0.000000e+00> : vector<256x128xf32>
    %80 = tpu.matmul %78, %79, %cst_44 {dimension_numbers = #tpu.dot_dimension_numbers<[1], [0], [0], [1], [0, 0, 1, 1], [], []>} : vector<256x4xbf16>, vector<4x128xbf16>, vector<256x128xf32> -> vector<256x128xf32>
    %81 = arith.addf %76, %80 : vector<256x128xf32>
    %82 = vector.extract_strided_slice %3 {offsets = [2, 0, 0], sizes = [16, 16, 4], strides = [1, 1, 1]} : vector<18x18x4xbf16> to vector<16x16x4xbf16>
    %83 = vector.shape_cast %82 : vector<16x16x4xbf16> to vector<256x4xbf16>
    %c60 = arith.constant 60 : index
    %c0_45 = arith.constant 0 : index
    %84 = vector.load %arg5[%c60, %c0_45] : memref<108x128xbf16, #tpu.memory_space<vmem>>, vector<4x128xbf16>
    %cst_46 = arith.constant dense<0.000000e+00> : vector<256x128xf32>
    %85 = tpu.matmul %83, %84, %cst_46 {dimension_numbers = #tpu.dot_dimension_numbers<[1], [0], [0], [1], [0, 0, 1, 1], [], []>} : vector<256x4xbf16>, vector<4x128xbf16>, vector<256x128xf32> -> vector<256x128xf32>
    %86 = arith.addf %81, %85 : vector<256x128xf32>
    %87 = vector.extract_strided_slice %3 {offsets = [2, 1, 0], sizes = [16, 16, 4], strides = [1, 1, 1]} : vector<18x18x4xbf16> to vector<16x16x4xbf16>
    %88 = vector.shape_cast %87 : vector<16x16x4xbf16> to vector<256x4xbf16>
    %c64 = arith.constant 64 : index
    %c0_47 = arith.constant 0 : index
    %89 = vector.load %arg5[%c64, %c0_47] : memref<108x128xbf16, #tpu.memory_space<vmem>>, vector<4x128xbf16>
    %cst_48 = arith.constant dense<0.000000e+00> : vector<256x128xf32>
    %90 = tpu.matmul %88, %89, %cst_48 {dimension_numbers = #tpu.dot_dimension_numbers<[1], [0], [0], [1], [0, 0, 1, 1], [], []>} : vector<256x4xbf16>, vector<4x128xbf16>, vector<256x128xf32> -> vector<256x128xf32>
    %91 = arith.addf %86, %90 : vector<256x128xf32>
    %92 = vector.extract_strided_slice %3 {offsets = [2, 2, 0], sizes = [16, 16, 4], strides = [1, 1, 1]} : vector<18x18x4xbf16> to vector<16x16x4xbf16>
    %93 = vector.shape_cast %92 : vector<16x16x4xbf16> to vector<256x4xbf16>
    %c68 = arith.constant 68 : index
    %c0_49 = arith.constant 0 : index
    %94 = vector.load %arg5[%c68, %c0_49] : memref<108x128xbf16, #tpu.memory_space<vmem>>, vector<4x128xbf16>
    %cst_50 = arith.constant dense<0.000000e+00> : vector<256x128xf32>
    %95 = tpu.matmul %93, %94, %cst_50 {dimension_numbers = #tpu.dot_dimension_numbers<[1], [0], [0], [1], [0, 0, 1, 1], [], []>} : vector<256x4xbf16>, vector<4x128xbf16>, vector<256x128xf32> -> vector<256x128xf32>
    %96 = arith.addf %91, %95 : vector<256x128xf32>
    %97 = vector.extract_strided_slice %5 {offsets = [0, 0, 0], sizes = [16, 16, 4], strides = [1, 1, 1]} : vector<18x18x4xbf16> to vector<16x16x4xbf16>
    %98 = vector.shape_cast %97 : vector<16x16x4xbf16> to vector<256x4xbf16>
    %c72 = arith.constant 72 : index
    %c0_51 = arith.constant 0 : index
    %99 = vector.load %arg5[%c72, %c0_51] : memref<108x128xbf16, #tpu.memory_space<vmem>>, vector<4x128xbf16>
    %cst_52 = arith.constant dense<0.000000e+00> : vector<256x128xf32>
    %100 = tpu.matmul %98, %99, %cst_52 {dimension_numbers = #tpu.dot_dimension_numbers<[1], [0], [0], [1], [0, 0, 1, 1], [], []>} : vector<256x4xbf16>, vector<4x128xbf16>, vector<256x128xf32> -> vector<256x128xf32>
    %101 = arith.addf %96, %100 : vector<256x128xf32>
    %102 = vector.extract_strided_slice %5 {offsets = [0, 1, 0], sizes = [16, 16, 4], strides = [1, 1, 1]} : vector<18x18x4xbf16> to vector<16x16x4xbf16>
    %103 = vector.shape_cast %102 : vector<16x16x4xbf16> to vector<256x4xbf16>
    %c76 = arith.constant 76 : index
    %c0_53 = arith.constant 0 : index
    %104 = vector.load %arg5[%c76, %c0_53] : memref<108x128xbf16, #tpu.memory_space<vmem>>, vector<4x128xbf16>
    %cst_54 = arith.constant dense<0.000000e+00> : vector<256x128xf32>
    %105 = tpu.matmul %103, %104, %cst_54 {dimension_numbers = #tpu.dot_dimension_numbers<[1], [0], [0], [1], [0, 0, 1, 1], [], []>} : vector<256x4xbf16>, vector<4x128xbf16>, vector<256x128xf32> -> vector<256x128xf32>
    %106 = arith.addf %101, %105 : vector<256x128xf32>
    %107 = vector.extract_strided_slice %5 {offsets = [0, 2, 0], sizes = [16, 16, 4], strides = [1, 1, 1]} : vector<18x18x4xbf16> to vector<16x16x4xbf16>
    %108 = vector.shape_cast %107 : vector<16x16x4xbf16> to vector<256x4xbf16>
    %c80 = arith.constant 80 : index
    %c0_55 = arith.constant 0 : index
    %109 = vector.load %arg5[%c80, %c0_55] : memref<108x128xbf16, #tpu.memory_space<vmem>>, vector<4x128xbf16>
    %cst_56 = arith.constant dense<0.000000e+00> : vector<256x128xf32>
    %110 = tpu.matmul %108, %109, %cst_56 {dimension_numbers = #tpu.dot_dimension_numbers<[1], [0], [0], [1], [0, 0, 1, 1], [], []>} : vector<256x4xbf16>, vector<4x128xbf16>, vector<256x128xf32> -> vector<256x128xf32>
    %111 = arith.addf %106, %110 : vector<256x128xf32>
    %112 = vector.extract_strided_slice %5 {offsets = [1, 0, 0], sizes = [16, 16, 4], strides = [1, 1, 1]} : vector<18x18x4xbf16> to vector<16x16x4xbf16>
    %113 = vector.shape_cast %112 : vector<16x16x4xbf16> to vector<256x4xbf16>
    %c84 = arith.constant 84 : index
    %c0_57 = arith.constant 0 : index
    %114 = vector.load %arg5[%c84, %c0_57] : memref<108x128xbf16, #tpu.memory_space<vmem>>, vector<4x128xbf16>
    %cst_58 = arith.constant dense<0.000000e+00> : vector<256x128xf32>
    %115 = tpu.matmul %113, %114, %cst_58 {dimension_numbers = #tpu.dot_dimension_numbers<[1], [0], [0], [1], [0, 0, 1, 1], [], []>} : vector<256x4xbf16>, vector<4x128xbf16>, vector<256x128xf32> -> vector<256x128xf32>
    %116 = arith.addf %111, %115 : vector<256x128xf32>
    %117 = vector.extract_strided_slice %5 {offsets = [1, 1, 0], sizes = [16, 16, 4], strides = [1, 1, 1]} : vector<18x18x4xbf16> to vector<16x16x4xbf16>
    %118 = vector.shape_cast %117 : vector<16x16x4xbf16> to vector<256x4xbf16>
    %c88 = arith.constant 88 : index
    %c0_59 = arith.constant 0 : index
    %119 = vector.load %arg5[%c88, %c0_59] : memref<108x128xbf16, #tpu.memory_space<vmem>>, vector<4x128xbf16>
    %cst_60 = arith.constant dense<0.000000e+00> : vector<256x128xf32>
    %120 = tpu.matmul %118, %119, %cst_60 {dimension_numbers = #tpu.dot_dimension_numbers<[1], [0], [0], [1], [0, 0, 1, 1], [], []>} : vector<256x4xbf16>, vector<4x128xbf16>, vector<256x128xf32> -> vector<256x128xf32>
    %121 = arith.addf %116, %120 : vector<256x128xf32>
    %122 = vector.extract_strided_slice %5 {offsets = [1, 2, 0], sizes = [16, 16, 4], strides = [1, 1, 1]} : vector<18x18x4xbf16> to vector<16x16x4xbf16>
    %123 = vector.shape_cast %122 : vector<16x16x4xbf16> to vector<256x4xbf16>
    %c92 = arith.constant 92 : index
    %c0_61 = arith.constant 0 : index
    %124 = vector.load %arg5[%c92, %c0_61] : memref<108x128xbf16, #tpu.memory_space<vmem>>, vector<4x128xbf16>
    %cst_62 = arith.constant dense<0.000000e+00> : vector<256x128xf32>
    %125 = tpu.matmul %123, %124, %cst_62 {dimension_numbers = #tpu.dot_dimension_numbers<[1], [0], [0], [1], [0, 0, 1, 1], [], []>} : vector<256x4xbf16>, vector<4x128xbf16>, vector<256x128xf32> -> vector<256x128xf32>
    %126 = arith.addf %121, %125 : vector<256x128xf32>
    %127 = vector.extract_strided_slice %5 {offsets = [2, 0, 0], sizes = [16, 16, 4], strides = [1, 1, 1]} : vector<18x18x4xbf16> to vector<16x16x4xbf16>
    %128 = vector.shape_cast %127 : vector<16x16x4xbf16> to vector<256x4xbf16>
    %c96 = arith.constant 96 : index
    %c0_63 = arith.constant 0 : index
    %129 = vector.load %arg5[%c96, %c0_63] : memref<108x128xbf16, #tpu.memory_space<vmem>>, vector<4x128xbf16>
    %cst_64 = arith.constant dense<0.000000e+00> : vector<256x128xf32>
    %130 = tpu.matmul %128, %129, %cst_64 {dimension_numbers = #tpu.dot_dimension_numbers<[1], [0], [0], [1], [0, 0, 1, 1], [], []>} : vector<256x4xbf16>, vector<4x128xbf16>, vector<256x128xf32> -> vector<256x128xf32>
    %131 = arith.addf %126, %130 : vector<256x128xf32>
    %132 = vector.extract_strided_slice %5 {offsets = [2, 1, 0], sizes = [16, 16, 4], strides = [1, 1, 1]} : vector<18x18x4xbf16> to vector<16x16x4xbf16>
    %133 = vector.shape_cast %132 : vector<16x16x4xbf16> to vector<256x4xbf16>
    %c100 = arith.constant 100 : index
    %c0_65 = arith.constant 0 : index
    %134 = vector.load %arg5[%c100, %c0_65] : memref<108x128xbf16, #tpu.memory_space<vmem>>, vector<4x128xbf16>
    %cst_66 = arith.constant dense<0.000000e+00> : vector<256x128xf32>
    %135 = tpu.matmul %133, %134, %cst_66 {dimension_numbers = #tpu.dot_dimension_numbers<[1], [0], [0], [1], [0, 0, 1, 1], [], []>} : vector<256x4xbf16>, vector<4x128xbf16>, vector<256x128xf32> -> vector<256x128xf32>
    %136 = arith.addf %131, %135 : vector<256x128xf32>
    %137 = vector.extract_strided_slice %5 {offsets = [2, 2, 0], sizes = [16, 16, 4], strides = [1, 1, 1]} : vector<18x18x4xbf16> to vector<16x16x4xbf16>
    %138 = vector.shape_cast %137 : vector<16x16x4xbf16> to vector<256x4xbf16>
    %c104 = arith.constant 104 : index
    %c0_67 = arith.constant 0 : index
    %139 = vector.load %arg5[%c104, %c0_67] : memref<108x128xbf16, #tpu.memory_space<vmem>>, vector<4x128xbf16>
    %cst_68 = arith.constant dense<0.000000e+00> : vector<256x128xf32>
    %140 = tpu.matmul %138, %139, %cst_68 {dimension_numbers = #tpu.dot_dimension_numbers<[1], [0], [0], [1], [0, 0, 1, 1], [], []>} : vector<256x4xbf16>, vector<4x128xbf16>, vector<256x128xf32> -> vector<256x128xf32>
    %141 = arith.addf %136, %140 : vector<256x128xf32>
    %142 = tpu.transpose %141, [1, 0] : vector<256x128xf32> -> vector<128x256xf32>
    %143 = vector.extract_strided_slice %142 {offsets = [0, 0], sizes = [8, 256], strides = [1, 1]} : vector<128x256xf32> to vector<8x256xf32>
    %c0_69 = arith.constant 0 : index
    %c0_70 = arith.constant 0 : index
    %144 = vector.load %arg6[%c0_69, %c0_70] : memref<8x1xf32, #tpu.memory_space<vmem>>, vector<8x1xf32>
    %145 = vector.broadcast %144 : vector<8x1xf32> to vector<8x256xf32>
    %146 = arith.addf %143, %145 : vector<8x256xf32>
    %cst_71 = arith.constant 0.000000e+00 : f32
    %147 = vector.broadcast %cst_71 : f32 to vector<8x256xf32>
    %148 = arith.maximumf %146, %147 : vector<8x256xf32>
    %c0_72 = arith.constant 0 : index
    %c0_73 = arith.constant 0 : index
    %c0_74 = arith.constant 0 : index
    %c0_75 = arith.constant 0 : index
    %149 = vector.load %arg7[%c0_72, %c0_73, %c0_74, %c0_75] : memref<1x1x8x256xf32, #tpu.memory_space<vmem>>, vector<1x1x8x256xf32>
    %150 = vector.shape_cast %149 : vector<1x1x8x256xf32> to vector<8x256xf32>
    %151 = vector.shape_cast %148 : vector<8x256xf32> to vector<1x1x8x256xf32>
    tpu.vector_store %arg7[%c0_72, %c0_73, %c0_74, %c0_75], %151 {strides = array<i32>} : memref<1x1x8x256xf32, #tpu.memory_space<vmem>>, vector<1x1x8x256xf32>,
    return
  }
  func.func @transform_0(%arg0: i32, %arg1: i32) -> (i32, i32, i32, i32, i32) {
    %c0_i32 = arith.constant 0 : i32
    %0 = arith.addi %arg1, %c0_i32 : i32
    %c0_i32_0 = arith.constant 0 : i32
    %c0_i32_1 = arith.constant 0 : i32
    %c0_i32_2 = arith.constant 0 : i32
    %c0_i32_3 = arith.constant 0 : i32
    return %arg0, %0, %c0_i32_0, %c0_i32_1, %c0_i32_2 : i32, i32, i32, i32, i32
  }
  func.func @transform_1(%arg0: i32, %arg1: i32) -> (i32, i32, i32, i32, i32) {
    %c1_i32 = arith.constant 1 : i32
    %0 = arith.addi %arg1, %c1_i32 : i32
    %c0_i32 = arith.constant 0 : i32
    %c0_i32_0 = arith.constant 0 : i32
    %c0_i32_1 = arith.constant 0 : i32
    %c0_i32_2 = arith.constant 0 : i32
    return %arg0, %0, %c0_i32, %c0_i32_0, %c0_i32_1 : i32, i32, i32, i32, i32
  }
  func.func @transform_2(%arg0: i32, %arg1: i32) -> (i32, i32, i32, i32, i32) {
    %c2_i32 = arith.constant 2 : i32
    %0 = arith.addi %arg1, %c2_i32 : i32
    %c0_i32 = arith.constant 0 : i32
    %c0_i32_0 = arith.constant 0 : i32
    %c0_i32_1 = arith.constant 0 : i32
    %c0_i32_2 = arith.constant 0 : i32
    return %arg0, %0, %c0_i32, %c0_i32_0, %c0_i32_1 : i32, i32, i32, i32, i32
  }
  func.func @transform_3(%arg0: i32, %arg1: i32) -> (i32, i32) {
    %c0_i32 = arith.constant 0 : i32
    %c0_i32_0 = arith.constant 0 : i32
    %c0_i32_1 = arith.constant 0 : i32
    return %c0_i32, %c0_i32_0 : i32, i32
  }
  func.func @transform_4(%arg0: i32, %arg1: i32) -> (i32, i32) {
    %c0_i32 = arith.constant 0 : i32
    %c0_i32_0 = arith.constant 0 : i32
    %c0_i32_1 = arith.constant 0 : i32
    return %c0_i32, %c0_i32_0 : i32, i32
  }
  func.func @transform_5(%arg0: i32, %arg1: i32) -> (i32, i32, i32, i32) {
    %c0_i32 = arith.constant 0 : i32
    %c0_i32_0 = arith.constant 0 : i32
    %c0_i32_1 = arith.constant 0 : i32
    return %arg0, %arg1, %c0_i32, %c0_i32_0 : i32, i32, i32, i32
  }
}

</mosaic_0001>

<bundles_post_ra>
// kernel: upsampling_forward.1
= control target key start
LH: loop header
LB: loop body
LE: loop exit
PB: predicated region body
PF: predicated region fallthrough
CT: control target
= control target key end

     0   :  { %s11993_s18 = smov 0   ;;  %s11995_s19 = smov 0   ;;  %s15068_s0 = inlined_call_operand.vmem [shape: bf16[2,18,18,18,4], index: 0, kind: input, shape index: {}, may-alias: {0,1,2}]   ;;  %s15069_s1 = inlined_call_operand.vmem [shape: bf16[2,18,18,18,4], index: 1, kind: input, shape index: {}, may-alias: {0,1,2}]   ;;  %s15070_s2 = inlined_call_operand.vmem [shape: bf16[2,18,18,18,4], index: 2, kind: input, shape index: {}, may-alias: {0,1,2}]   ;;  %s15071_s3 = inlined_call_operand.vmem [shape: bf16[108,128], index: 3, kind: input, shape index: {}]   ;;  %s15072_s4 = inlined_call_operand.vmem [shape: f32[8,1], index: 4, kind: input, shape index: {}]   ;;  %s15073_s5 = inlined_call_operand.vmem [shape: f32[2,16,8,256], index: 5, kind: output, shape index: {}]  }
   0x1   :  { %s11997_s20 = smov 0   ;;  %s11999_s21 = smov 0  }
   0x2   :  { %s12001_s22 = smov 0  }
   0x3 LB: > { %s24_s23 = sadd.s32 1, %s11952_s20  ;;  %s27_s24 = sadd.s32 1, %s11956_s21  ;;  %s11960_s22 = sphi %s12001_s22, %s15_s22   ;;  %s11956_s21 = sphi %s11999_s21, %s15809_s21   ;;  %s11952_s20 = sphi %s11997_s20, %s15808_s20   ;;  %s11948_s19 = sphi %s11995_s19, %s15807_s19   ;;  %s11944_s18 = sphi %s11993_s18, %s15806_s18  }
   0x4   : > { %p25_p0 = scmp.ge.s32.totalorder %s24_s23, 16  ;;  %p8846_p1 = scmp.ge.s32.totalorder %s11960_s22, 1 }
   0x5   : > { %p247_p2 = scmp.lt.s32.totalorder %s11960_s22, 33 }
   0x6   : > { %s15811_s23 = smov (%p25_p0, %s24_s23), 0  ;;  %s15813_s24 = smov (!%p25_p0, %s27_s24), %s11956_s21 }
   0x7   : > { %p248_p3 = pnand %p8846_p1, %p247_p2  ;;  %p29_p4 = scmp.ge.s32.totalorder %s15813_s24, 2 }
   0x9   : > { %s15815_s24 = smov (%p29_p4, %s15813_s24), 0  ;;  %251 = sbr.rel (%p248_p3) target bundleno = 1272 (0x4f8), region = 40 }
  0x10   : > { %v11802_v0 = vld [vmem:[%s15071_s3] ss:$0 sps:$4 sm:$0xcc]   ;;  %vm996_vm0 = vcmask 1041408   ;;  %p303_p5 = scmp.lt.s32.totalorder %s11948_s19, 1  ;;  %p305_p6 = scmp.lt.s32.totalorder %s11944_s18, 17 }
  0x11   : > { %v11803_v1 = vld [vmem:[%s15071_s3 + $0x18] ss:$0 sps:$4 sm:$0xcc]   ;;  %v946_v2 = vrot.slane %v11802_v0, 2  ;;  %v506_v4 = vld [vmem:[%s15071_s3] sm:$0x3] }
  0x12   : > { %v12032_v3 = vrot.slane %v11803_v1, 2  ;;  %s15817_s19 = smov (!%p303_p5, %s11948_s19), 1  ;;  %v5050_v6 = vld [vmem:[%s15071_s3 + $0x1c] sm:$0x3]  ;;  %vm507_vm1 = vsmask.f32 3328 }
  0x13   : > { %11727 = vmatprep.subr.msk.bf16.mxu1 %vm996_vm0, %v946_v2  ;;  %v998_v5 = vsel %vm996_vm0, %v946_v2, 0  ;;  %s306_s6 = scalar_select %p305_p6, %s11944_s18, 17  ;;  %v12061_v8 = vld [vmem:[%s15071_s3 + $0x1c] ss:$0 sps:$4 sm:$0xcc]   ;;  %vm947_vm3 = vcmask 31744  }
  0x14   : > { %15355 = vst [vmem:[#allocation2_spill] sm:$0xff] %v12032_v3  ;;  %11740 = vmatprep.subr.msk.bf16.mxu0 %vm996_vm0, %v12032_v3  ;;  %9976 = vmatpush3.bf16.msra.mxu1 %v998_v5  ;;  %v12049_v7 = vsel %vm996_vm0, %v12032_v3, 0  ;;  %s12052_s9 = smul.u32 972, %s15817_s19  ;;  %s312_s11 = sadd.s32 1, %s11944_s18  ;;  %vm508_vm2 = vsmask.f32 7440 }
  0x15   : > { %15356 = vst [vmem:[#allocation3_spill] sm:$0xff] %v12049_v7  ;;  %10418 = vmatpush3.bf16.msra.mxu0 %v12049_v7  ;;  %s11755_s10 = smul.u32 54, %s306_s6  ;;  %11728 = vmatprep.subr.msk.bf16.mxu1 %vm996_vm0, %v506_v4  ;;  %p12069_p7 = scmp.lt.s32.totalorder %s312_s11, 17  ;;  %v5262_v20 = vrot.slane %v12061_v8, 2  ;;  %vm12087_vm4 = vmor %vm507_vm1, %vm508_vm2  ;;  %v15358_v34 = vmov 0  ;;  %v1290_v38 = vsel %vm996_vm0, %v506_v4, 0 }
  0x16   : > { %11742 = vmatprep.subr.msk.bf16.mxu0 %vm996_vm0, %v5050_v6  ;;  %v15359_v34 = vsel %vm12087_vm4, 4294967295, %v15358_v34  ;;  %v12094_v42 = vsel %vm996_vm0, %v5050_v6, 0  ;;  %vm1469_vm5 = vcmask 1042432   ;;  %vm1470_vm6 = vcmask 1046532   ;;  %p336_p9 = scmp.lt.s32.totalorder %s11944_s18, 15 }
  0x17   : > { %s309_s14 = sadd.s32 %s12052_s9, %s11755_s10  ;;  %s15819_s11 = smov (!%p12069_p7, %s312_s11), 17  ;;  %15360 = vst [vmem:[#allocation4_spill] sm:$0xff] %v15359_v34  ;;  %v12103_v47 = vsel %vm996_vm0, %v5262_v20, 0  ;;  %vm12434_vm7 = vmor %vm1469_vm5, %vm1470_vm6 }
  0x18   : > { %s8847_s15 = sshll.u32 %s309_s14, 2  ;;  %s11757_s27 = smul.u32 54, %s15819_s11 }
  0x19   : > { %s12067_s25 = scalar_lea.vmem %s15068_s0, %s8847_s15  ;;  %s323_s10 = sadd.s32 2, %s11944_s18 }
  0x1a   : > { %v344_v9 = vld [vmem:[%s12067_s25] sm:$0xf]  ;;  %v345_v10 = vld [vmem:[%s12067_s25 + $0x4] sm:$0xf]  ;;  %v346_v11 = vld [vmem:[%s12067_s25 + $0x8] sm:$0x1]  ;;  %s319_s28 = sadd.s32 %s11757_s27, %s12052_s9 }
  0x1b   : > { %v511_v12 = vshrl.u32 %v344_v9, 16  ;;  %v514_v13 = vshll.u32 %v344_v9, 16  ;;  %v520_v14 = vshll.u32 %v345_v10, 16  ;;  %v524_v15 = vshrl.u32 %v345_v10, 16  ;;  %v347_v16 = vld [vmem:[%s12067_s25 + $0xc] sm:$0xf] }
  0x1c   : > { %v530_v17 = vshll.u32 %v346_v11, 16  ;;  %v348_v18 = vld [vmem:[%s12067_s25 + $0x10] sm:$0xf]  ;;  %v349_v19 = vld [vmem:[%s12067_s25 + $0x14] sm:$0x1]  ;;  %v535_v26 = vshrl.u32 %v347_v16, 16 }
  0x1d   : > { %v513_v21 = vrot.slane %v511_v12, 4  ;;  %v516_v22 = vrot.slane %v514_v13, 5  ;;  %v522_v23 = vrot.slane %v520_v14, 5  ;;  %v526_v24 = vrot.slane %v524_v15, 4  ;;  %v12083_v33 = vld [vmem:[%s12067_s25 + $0x18] sm:$0xf] }
  0x1e   : > { %v532_v25 = vrot.slane %v530_v17, 5  ;;  %v538_v27 = vshll.u32 %v347_v16, 16  ;;  %v544_v28 = vshll.u32 %v348_v18, 16  ;;  %v548_v31 = vshrl.u32 %v348_v18, 16  ;;  %v12097_v43 = vld [vmem:[%s12067_s25 + $0x1c] sm:$0xf] }
  0x1f   : > { %v517_v29 = vor.u32 %v516_v22, %v513_v21  ;;  %v527_v30 = vor.u32 %v526_v24, %v522_v23  ;;  %v554_v32 = vshll.u32 %v349_v19, 16  ;;  %v537_v35 = vrot.slane %v535_v26, 4  ;;  %s8848_s29 = sshll.u32 %s319_s28, 2  ;;  %v12773_v34 = vld [vmem:[%s12067_s25 + $0x1c] sm:$0xf]  ;;  %p326_p8 = scmp.lt.s32.totalorder %s323_s10, 17 }
  0x20   : > { %v540_v36 = vrot.slane %v538_v27, 5  ;;  %v546_v37 = vrot.slane %v544_v28, 5  ;;  %v550_v41 = vrot.slane %v548_v31, 4  ;;  %v559_v46 = vshrl.u32 %v12083_v33, 16  ;;  %s12112_s7 = scalar_lea.vmem %s15069_s1, %s8848_s29  ;;  %s15823_s18 = smov (!%p336_p9, %s11944_s18), 15 }
  0x21   : > { %v518_v39 = vrot.slane %v517_v29, 4  ;;  %v528_v40 = vrot.slane %v527_v30, 4  ;;  %v556_v45 = vrot.slane %v554_v32, 5  ;;  %v562_v51 = vshll.u32 %v12083_v33, 16  ;;  %v12116_v54 = vld [vmem:[%s12112_s7 + $0xc] sm:$0xf] }
  0x22   : > { %v541_v44 = vor.u32 %v540_v36, %v537_v35  ;;  %v551_v50 = vor.u32 %v550_v41, %v546_v37  ;;  %v12119_v55 = vld [vmem:[%s12112_s7 + $0x10] sm:$0xf]  ;;  %v568_v56 = vshll.u32 %v12097_v43, 16  ;;  %v12123_v58 = vld [vmem:[%s12112_s7 + $0x14] sm:$0x1]  ;;  %v3529_v59 = vshrl.u32 %v12116_v54, 16 }
  0x23   : > { %v523_v48 = vsel %vm12087_vm4, %v518_v39, %v522_v23  ;;  %v533_v49 = vsel %vm12087_vm4, %v528_v40, %v532_v25  ;;  %v3532_v60 = vshll.u32 %v12116_v54, 16  ;;  %v561_v61 = vrot.slane %v559_v46, 4  ;;  %v12134_v2 = vld [vmem:[%s12112_s7 + $0x18] sm:$0xf]  ;;  %v12140_v10 = vld [vmem:[%s12112_s7 + $0x1c] sm:$0xf] }
  0x24   : > { %v8853_v52 = vcombine.low %v523_v48, %v533_v49  ;;  %v542_v53 = vrot.slane %v541_v44, 4  ;;  %v552_v57 = vrot.slane %v551_v50, 4  ;;  %v3538_v63 = vshll.u32 %v12119_v55, 16  ;;  %v12145_v15 = vld [vmem:[%s12112_s7 + $0x20] sm:$0x1]  ;;  %s15821_s10 = smov (!%p326_p8, %s323_s10), 17 }
  0x25   : > { %v3542_v0 = vshrl.u32 %v12119_v55, 16  ;;  %v3548_v1 = vshll.u32 %v12123_v58, 16  ;;  %v3531_v5 = vrot.slane %v3529_v59, 4  ;;  %v3534_v6 = vrot.slane %v3532_v60, 5  ;;  %v352_v29 = vld [vmem:[%s12067_s25 + $0x20] sm:$0x1] }
  0x26   : > { %9977 = vmatprep.mubr.msk.bf16.mxu1 %vm947_vm3, %v8853_v52  ;;  %v547_v62 = vsel %vm12087_vm4, %v542_v53, %v546_v37  ;;  %v557_v4 = vsel %vm12087_vm4, %v552_v57, %v556_v45  ;;  %v3540_v12 = vrot.slane %v3538_v63, 5  ;;  %v3553_v17 = vshrl.u32 %v12134_v2, 16  ;;  %v353_v35 = vld [vmem:[%s12067_s25 + $0x24] sm:$0xf]  ;;  %v354_v46 = vld [vmem:[%s12067_s25 + $0x28] sm:$0xf] }
  0x27   : > { %v12142_v11 = vcombine.low %v547_v62, %v557_v4  ;;  %v3544_v13 = vrot.slane %v3542_v0, 4  ;;  %v3550_v14 = vrot.slane %v3548_v1, 5  ;;  %v3535_v16 = vor.u32 %v3534_v6, %v3531_v5  ;;  %v12172_v0 = vld [vmem:[%s12112_s7 + $0x24] sm:$0xf]  ;;  %v12177_v6 = vld [vmem:[%s12112_s7 + $0x28] sm:$0xf] }
  0x28   : > { %v3556_v18 = vshll.u32 %v12134_v2, 16  ;;  %v3562_v19 = vshll.u32 %v12140_v10, 16  ;;  %v3566_v22 = vshrl.u32 %v12140_v10, 16  ;;  %v3572_v23 = vshll.u32 %v12145_v15, 16  ;;  %s11758_s13 = smul.u32 54, %s15821_s10 }
  0x29   : > { %15361 = vst [vmem:[#allocation5_spill] sm:$0xff] %v12142_v11  ;;  %9978 = vmatmul.mubr.msk.bf16.vlgmr.msra.gmra.mrb[0].mxu1 %vm947_vm3, %v12142_v11  ;;  %v3545_v21 = vor.u32 %v3544_v13, %v3540_v12  ;;  %v3536_v25 = vrot.slane %v3535_v16, 4  ;;  %v3555_v26 = vrot.slane %v3553_v17, 4  ;;  %v564_v39 = vrot.slane %v562_v51, 5  ;;  %v355_v51 = vld [vmem:[%s12067_s25 + $0x2c] sm:$0x1] }
  0x2a   : > { %10010 = vmatpush3.bf16.msra.mxu1 %v1290_v38  ;;  %v3558_v27 = vrot.slane %v3556_v18, 5  ;;  %v3564_v28 = vrot.slane %v3562_v19, 5  ;;  %v3568_v31 = vrot.slane %v3566_v22, 4  ;;  %v3574_v32 = vrot.slane %v3572_v23, 5  ;;  %s330_s14 = sadd.s32 %s11758_s13, %s12052_s9  ;;  %s8850_s13 = sshll.u32 %s15823_s18, 1 }
  0x2b   : > { %v3546_v30 = vrot.slane %v3545_v21, 4  ;;  %v3541_v36 = vsel %vm12087_vm4, %v3536_v25, %v3540_v12  ;;  %v570_v40 = vrot.slane %v568_v56, 5  ;;  %v572_v44 = vshrl.u32 %v12097_v43, 16  ;;  %v12184_v21 = vld [vmem:[%s12112_s7 + $0x2c] sm:$0x1]  ;;  %s8849_s15 = sshll.u32 %s330_s14, 2 }
  0x2c   : > { %v3559_v37 = vor.u32 %v3558_v27, %v3555_v26  ;;  %v3569_v41 = vor.u32 %v3568_v31, %v3564_v28  ;;  %v578_v45 = vshll.u32 %v352_v29, 16  ;;  %v565_v50 = vor.u32 %v564_v39, %v561_v61  ;;  %s13572_s26 = scalar_lea.vmem %s15070_s2, %s8849_s15  ;;  %s8851_s14 = sshll.u32 %s15817_s19, 5 }
  0x2d   : > { %v3551_v38 = vsel %vm12087_vm4, %v3546_v30, %v3550_v14  ;;  %v583_v52 = vshrl.u32 %v353_v35, 16  ;;  %v574_v57 = vrot.slane %v572_v44, 4  ;;  %v586_v56 = vshll.u32 %v353_v35, 16  ;;  %v12199_v35 = vld [vmem:[%s12112_s7 + $0x34] sm:$0xf]  ;;  %s340_s15 = sadd.s32 %s8851_s14, %s8850_s13 }
  0x2e   : > { %v12164_v48 = vcombine.low %v3541_v36, %v3551_v38  ;;  %v3560_v49 = vrot.slane %v3559_v37, 4  ;;  %v3570_v53 = vrot.slane %v3569_v41, 4  ;;  %v580_v59 = vrot.slane %v578_v45, 5  ;;  %s8852_s16 = sshll.u32 %s340_s15, 3 }
  0x2f   : > { %v566_v60 = vrot.slane %v565_v50, 4  ;;  %v585_v62 = vrot.slane %v583_v52, 4  ;;  %v592_v63 = vshll.u32 %v354_v46, 16  ;;  %v575_v1 = vor.u32 %v574_v57, %v570_v40  ;;  %v12218_v50 = vld [vmem:[%s12067_s25 + $0x30] sm:$0xf]  ;;  %s342_s9 = scalar_lea.vmem %s15073_s5, %s8852_s16 }
  0x30   : > { %15362 = vst [vmem:[#allocation6_spill] sm:$0xff] %v12164_v48  ;;  %10419 = vmatprep.mubr.msk.bf16.mxu0 %vm947_vm3, %v12164_v48  ;;  %v3565_v43 = vsel %vm12087_vm4, %v3560_v49, %v3564_v28  ;;  %v3575_v61 = vsel %vm12087_vm4, %v3570_v53, %v3574_v32  ;;  %v588_v4 = vrot.slane %v586_v56, 5  ;;  %v596_v5 = vshrl.u32 %v354_v46, 16  ;;  %v12193_v28 = vld [vmem:[%s12112_s7 + $0x30] sm:$0xf] }
  0x31   : > { %v12179_v12 = vcombine.low %v3565_v43, %v3575_v61  ;;  %v571_v13 = vsel %vm12087_vm4, %v566_v60, %v570_v40  ;;  %v594_v14 = vrot.slane %v592_v63, 5  ;;  %v602_v16 = vshll.u32 %v355_v51, 16  ;;  %v12213_v49 = vld [vmem:[%s12112_s7 + $0x38] sm:$0x1] }
  0x32   : > { %v576_v17 = vrot.slane %v575_v1, 4  ;;  %v589_v18 = vor.u32 %v588_v4, %v585_v62  ;;  %v598_v19 = vrot.slane %v596_v5, 4  ;;  %v3577_v22 = vshrl.u32 %v12172_v0, 16  ;;  %v12227_v1 = vld [vmem:[%s12067_s25 + $0x34] sm:$0xf] }
  0x33   : > { %15363 = vst [vmem:[#allocation7_spill] sm:$0xff] %v12179_v12  ;;  %10420 = vmatmul.mubr.msk.bf16.vlgmr.msra.gmra.mrb[0].mxu0 %vm947_vm3, %v12179_v12  ;;  %v604_v23 = vrot.slane %v602_v16, 5  ;;  %v3580_v25 = vshll.u32 %v12172_v0, 16  ;;  %v3586_v26 = vshll.u32 %v12177_v6, 16  ;;  %v3590_v27 = vshrl.u32 %v12177_v6, 16 }
  0x34   : > { %10452 = vmatpush3.bf16.msra.mxu0 %v12094_v42  ;;  %v581_v29 = vsel %vm12087_vm4, %v576_v17, %v580_v59  ;;  %v590_v30 = vrot.slane %v589_v18, 4  ;;  %v599_v31 = vor.u32 %v598_v19, %v594_v14  ;;  %v3579_v32 = vrot.slane %v3577_v22, 4  ;;  %v358_v16 = vld [vmem:[%s12067_s25 + $0x38] sm:$0x1]  ;;  %v12239_v18 = vld [vmem:[%s12067_s25 + $0x3c] sm:$0xf] }
  0x35   : > { %v12201_v36 = vcombine.low %v571_v13, %v581_v29  ;;  %v3582_v37 = vrot.slane %v3580_v25, 5  ;;  %v3588_v39 = vrot.slane %v3586_v26, 5  ;;  %v3592_v40 = vrot.slane %v3590_v27, 4  ;;  %11743 = vmatprep.subr.msk.bf16.mxu0 %vm996_vm0, %v5262_v20 }
  0x36   : > { %v595_v42 = vsel %vm12087_vm4, %v590_v30, %v594_v14  ;;  %v600_v38 = vrot.slane %v599_v31, 4  ;;  %v3596_v41 = vshll.u32 %v12184_v21, 16  ;;  %v3601_v44 = vshrl.u32 %v12193_v28, 16 }
  0x37   : > { %15364 = vst [vmem:[#allocation8_spill] sm:$0xff] %v12201_v36  ;;  %9981 = vmatprep.mubr.msk.bf16.mxu1 %vm947_vm3, %v12201_v36  ;;  %v3583_v45 = vor.u32 %v3582_v37, %v3579_v32  ;;  %v3593_v46 = vor.u32 %v3592_v40, %v3588_v39  ;;  %v3604_v8 = vshll.u32 %v12193_v28, 16  ;;  %v3610_v20 = vshll.u32 %v12199_v35, 16  ;;  %v12248_v37 = vld [vmem:[%s12067_s25 + $0x40] sm:$0xf] }
  0x38   : > { %v605_v52 = vsel %vm12087_vm4, %v600_v38, %v604_v23  ;;  %v3598_v53 = vrot.slane %v3596_v41, 5  ;;  %v3603_v57 = vrot.slane %v3601_v44, 4  ;;  %v3614_v59 = vshrl.u32 %v12199_v35, 16 }
  0x39   : > { %v12223_v51 = vcombine.low %v595_v42, %v605_v52  ;;  %v3584_v56 = vrot.slane %v3583_v45, 4  ;;  %v3594_v43 = vrot.slane %v3593_v46, 4  ;;  %v3606_v60 = vrot.slane %v3604_v8, 5  ;;  %v361_v45 = vld [vmem:[%s12067_s25 + $0x44] sm:$0x1] }
  0x3a   : > { %v3612_v62 = vrot.slane %v3610_v20, 5  ;;  %v3616_v63 = vrot.slane %v3614_v59, 4  ;;  %v3620_v61 = vshll.u32 %v12213_v49, 16  ;;  %v607_v4 = vshrl.u32 %v12218_v50, 16  ;;  %v12256_v46 = vld [vmem:[%s12112_s7 + $0x3c] sm:$0xf] }
  0x3b   : > { %15365 = vst [vmem:[#allocation9_spill] sm:$0xff] %v12223_v51  ;;  %9982 = vmatmul.mubr.msk.bf16.gmra.mrb[4].mxu1 %vm947_vm3, %v12223_v51  ;;  %v3589_v5 = vsel %vm12087_vm4, %v3584_v56, %v3588_v39  ;;  %v3599_v13 = vsel %vm12087_vm4, %v3594_v43, %v3598_v53  ;;  %v3607_v14 = vor.u32 %v3606_v60, %v3603_v57  ;;  %v610_v17 = vshll.u32 %v12218_v50, 16  ;;  %v370_v51 = vld [vmem:[%s12067_s25 + $0x68] sm:$0x1] }
  0x3c   : > { %v12241_v19 = vcombine.low %v3589_v5, %v3599_v13  ;;  %v3617_v22 = vor.u32 %v3616_v63, %v3612_v62  ;;  %v3622_v23 = vrot.slane %v3620_v61, 5  ;;  %v609_v25 = vrot.slane %v607_v4, 4  ;;  %v12265_v61 = vld [vmem:[%s12112_s7 + $0x40] sm:$0xf] }
  0x3d   : > { %v3608_v26 = vrot.slane %v3607_v14, 4  ;;  %v612_v27 = vrot.slane %v610_v17, 5  ;;  %v616_v29 = vshll.u32 %v12227_v1, 16  ;;  %v620_v30 = vshrl.u32 %v12227_v1, 16 }
  0x3e   : > { %15366 = vst [vmem:[#allocation10_spill] sm:$0xff] %v12241_v19  ;;  %10423 = vmatprep.mubr.msk.bf16.mxu0 %vm947_vm3, %v12241_v19  ;;  %v3618_v31 = vrot.slane %v3617_v22, 4  ;;  %v626_v32 = vshll.u32 %v358_v16, 16  ;;  %v631_v39 = vshrl.u32 %v12239_v18, 16  ;;  %v634_v40 = vshll.u32 %v12239_v18, 16 }
  0x3f   : > { %v3613_v42 = vsel %vm12087_vm4, %v3608_v26, %v3612_v62  ;;  %v613_v38 = vor.u32 %v612_v27, %v609_v25  ;;  %v618_v41 = vrot.slane %v616_v29, 5  ;;  %v622_v44 = vrot.slane %v620_v30, 4  ;;  %v12273_v16 = vld [vmem:[%s12112_s7 + $0x44] sm:$0x1]  ;;  %v12277_v27 = vld [vmem:[%s12112_s7 + $0x48] sm:$0xf] }
  0x40   : > { %v3623_v8 = vsel %vm12087_vm4, %v3618_v31, %v3622_v23  ;;  %v628_v20 = vrot.slane %v626_v32, 5  ;;  %v633_v52 = vrot.slane %v631_v39, 4  ;;  %v636_v53 = vrot.slane %v634_v40, 5  ;;  %v12284_v39 = vld [vmem:[%s12112_s7 + $0x4c] sm:$0xf] }
  0x41   : > { %v12260_v57 = vcombine.low %v3613_v42, %v3623_v8  ;;  %v614_v59 = vrot.slane %v613_v38, 4  ;;  %v623_v56 = vor.u32 %v622_v44, %v618_v41  ;;  %v640_v43 = vshll.u32 %v12248_v37, 16  ;;  %v373_v19 = vld [vmem:[%s12067_s25 + $0x74] sm:$0x1] }
  0x42   : > { %v637_v60 = vor.u32 %v636_v53, %v633_v52  ;;  %v644_v62 = vshrl.u32 %v12248_v37, 16  ;;  %v650_v63 = vshll.u32 %v361_v45, 16  ;;  %v3625_v4 = vshrl.u32 %v12256_v46, 16 }
  0x43   : > { %15367 = vst [vmem:[#allocation11_spill] sm:$0xff] %v12260_v57  ;;  %10424 = vmatmul.mubr.msk.bf16.gmra.mrb[4].mxu0 %vm947_vm3, %v12260_v57  ;;  %v619_v5 = vsel %vm12087_vm4, %v614_v59, %v618_v41  ;;  %v624_v13 = vrot.slane %v623_v56, 4  ;;  %v642_v14 = vrot.slane %v640_v43, 5  ;;  %v3628_v17 = vshll.u32 %v12256_v46, 16 }
  0x44   : > { %v638_v22 = vrot.slane %v637_v60, 4  ;;  %v646_v23 = vrot.slane %v644_v62, 4  ;;  %v652_v25 = vrot.slane %v650_v63, 5  ;;  %v3627_v26 = vrot.slane %v3625_v4, 4 }
  0x45   : > { %v629_v29 = vsel %vm12087_vm4, %v624_v13, %v628_v20  ;;  %v3630_v30 = vrot.slane %v3628_v17, 5  ;;  %v3634_v31 = vshll.u32 %v12265_v61, 16  ;;  %v3638_v32 = vshrl.u32 %v12265_v61, 16  ;;  %v12292_v20 = vld [vmem:[%s12112_s7 + $0x50] sm:$0x1] }
  0x46   : > { %v12286_v40 = vcombine.low %v619_v5, %v629_v29  ;;  %v643_v42 = vsel %vm12087_vm4, %v638_v22, %v642_v14  ;;  %v647_v38 = vor.u32 %v646_v23, %v642_v14  ;;  %v3644_v41 = vshll.u32 %v12273_v16, 16  ;;  %v12301_v5 = vld [vmem:[%s12067_s25 + $0x48] sm:$0xf]  ;;  %v12307_v23 = vld [vmem:[%s12067_s25 + $0x4c] sm:$0xf] }
  0x47   : > { %v3631_v44 = vor.u32 %v3630_v30, %v3627_v26  ;;  %v3636_v45 = vrot.slane %v3634_v31, 5  ;;  %v3640_v8 = vrot.slane %v3638_v32, 4  ;;  %v3649_v52 = vshrl.u32 %v12277_v27, 16 }
  0x48   : > { %15368 = vst [vmem:[#allocation12_spill] sm:$0xff] %v12286_v40  ;;  %9985 = vmatprep.mubr.msk.bf16.mxu1 %vm947_vm3, %v12286_v40  ;;  %v648_v53 = vrot.slane %v647_v38, 4  ;;  %v3646_v59 = vrot.slane %v3644_v41, 5  ;;  %v3652_v56 = vshll.u32 %v12277_v27, 16  ;;  %v3658_v43 = vshll.u32 %v12284_v39, 16 }
  0x49   : > { %v3632_v60 = vrot.slane %v3631_v44, 4  ;;  %v3641_v62 = vor.u32 %v3640_v8, %v3636_v45  ;;  %v3651_v63 = vrot.slane %v3649_v52, 4  ;;  %v3662_v4 = vshrl.u32 %v12284_v39, 16  ;;  %v364_v41 = vld [vmem:[%s12067_s25 + $0x50] sm:$0x1] }
  0x4a   : > { %v653_v13 = vsel %vm12087_vm4, %v648_v53, %v652_v25  ;;  %v3654_v14 = vrot.slane %v3652_v56, 5  ;;  %v3660_v17 = vrot.slane %v3658_v43, 5  ;;  %v3668_v22 = vshll.u32 %v12292_v20, 16  ;;  %v12323_v53 = vld [vmem:[%s12067_s25 + $0x54] sm:$0xf] }
  0x4b   : > { %v12309_v26 = vcombine.low %v643_v42, %v653_v13  ;;  %v3637_v29 = vsel %vm12087_vm4, %v3632_v60, %v3636_v45  ;;  %v3642_v30 = vrot.slane %v3641_v62, 4  ;;  %v3664_v31 = vrot.slane %v3662_v4, 4  ;;  %v12326_v56 = vld [vmem:[%s12067_s25 + $0x58] sm:$0xf]  ;;  %v12333_v4 = vld [vmem:[%s15071_s3 + $0x4] sm:$0x3] }
  0x4c   : > { %v3655_v32 = vor.u32 %v3654_v14, %v3651_v63  ;;  %v3670_v38 = vrot.slane %v3668_v22, 5  ;;  %v655_v25 = vshrl.u32 %v12301_v5, 16  ;;  %v658_v44 = vshll.u32 %v12301_v5, 16  ;;  %11729 = vmatprep.subr.msk.bf16.mxu1 %vm996_vm0, %v12333_v4 }
  0x4d   : > { %15369 = vst [vmem:[#allocation13_spill] sm:$0xff] %v12309_v26  ;;  %9986 = vmatmul.mubr.msk.bf16.gmra.mrb[8].mxu1 %vm947_vm3, %v12309_v26  ;;  %v3647_v8 = vsel %vm12087_vm4, %v3642_v30, %v3646_v59  ;;  %v3665_v42 = vor.u32 %v3664_v31, %v3660_v17  ;;  %v664_v52 = vshll.u32 %v12307_v23, 16  ;;  %v668_v45 = vshrl.u32 %v12307_v23, 16  ;;  %v367_v31 = vld [vmem:[%s12067_s25 + $0x5c] sm:$0x1] }
  0x4e   : > { %v12328_v43 = vcombine.low %v3637_v29, %v3647_v8  ;;  %v3656_v60 = vrot.slane %v3655_v32, 4  ;;  %v657_v62 = vrot.slane %v655_v25, 4  ;;  %v660_v63 = vrot.slane %v658_v44, 5 }
  0x4f   : > { %v3666_v59 = vrot.slane %v3665_v42, 4  ;;  %v666_v13 = vrot.slane %v664_v52, 5  ;;  %v670_v14 = vrot.slane %v668_v45, 4  ;;  %v674_v22 = vshll.u32 %v364_v41, 16  ;;  %v12348_v52 = vld [vmem:[%s12112_s7 + $0x54] sm:$0xf] }
  0x50   : > { %15370 = vst [vmem:[#allocation14_spill] sm:$0xff] %v12328_v43  ;;  %10427 = vmatprep.mubr.msk.bf16.mxu0 %vm947_vm3, %v12328_v43  ;;  %v3661_v29 = vsel %vm12087_vm4, %v3656_v60, %v3660_v17  ;;  %v661_v30 = vor.u32 %v660_v63, %v657_v62  ;;  %v679_v32 = vshrl.u32 %v12323_v53, 16  ;;  %v682_v25 = vshll.u32 %v12323_v53, 16  ;;  %v12353_v62 = vld [vmem:[%s12112_s7 + $0x58] sm:$0xf] }
  0x51   : > { %v3671_v44 = vsel %vm12087_vm4, %v3666_v59, %v3670_v38  ;;  %v671_v41 = vor.u32 %v670_v14, %v666_v13  ;;  %v676_v8 = vrot.slane %v674_v22, 5  ;;  %v688_v42 = vshll.u32 %v12326_v56, 16  ;;  %v12361_v22 = vld [vmem:[%s12112_s7 + $0x5c] sm:$0x1] }
  0x52   : > { %v12350_v45 = vcombine.low %v3661_v29, %v3671_v44  ;;  %v662_v33 = vrot.slane %v661_v30, 4  ;;  %v681_v17 = vrot.slane %v679_v32, 4  ;;  %v684_v60 = vrot.slane %v682_v25, 5 }
  0x53   : > { %v672_v63 = vrot.slane %v671_v41, 4  ;;  %v690_v9 = vrot.slane %v688_v42, 5  ;;  %v692_v24 = vshrl.u32 %v12326_v56, 16  ;;  %v698_v38 = vshll.u32 %v367_v31, 16  ;;  %v12369_v41 = vld [vmem:[%s12112_s7 + $0x60] sm:$0xf] }
  0x54   : > { %15371 = vst [vmem:[#allocation15_spill] sm:$0xff] %v12350_v45  ;;  %10428 = vmatmul.mubr.msk.bf16.gmra.mrb[8].mxu0 %vm947_vm3, %v12350_v45  ;;  %v667_v59 = vsel %vm12087_vm4, %v662_v33, %v666_v13  ;;  %v685_v14 = vor.u32 %v684_v60, %v681_v17  ;;  %v3673_v29 = vshrl.u32 %v12348_v52, 16  ;;  %v3676_v30 = vshll.u32 %v12348_v52, 16  ;;  %15372 = vst [vmem:[#allocation16_spill] sm:$0xff] %v12369_v41  ;;  %v12374_v60 = vld [vmem:[%s12112_s7 + $0x64] sm:$0xf] }
  0x55   : > { %v677_v32 = vsel %vm12087_vm4, %v672_v63, %v676_v8  ;;  %v694_v25 = vrot.slane %v692_v24, 4  ;;  %v700_v31 = vrot.slane %v698_v38, 5  ;;  %v3682_v44 = vshll.u32 %v12353_v62, 16  ;;  %15374 = vst [vmem:[#allocation18_spill] sm:$0xff] %v12374_v60  ;;  %v12383_v38 = vld [vmem:[%s12112_s7 + $0x68] sm:$0x1] }
  0x56   : > { %v12371_v42 = vcombine.low %v667_v59, %v677_v32  ;;  %v686_v33 = vrot.slane %v685_v14, 4  ;;  %v3675_v13 = vrot.slane %v3673_v29, 4  ;;  %v3678_v17 = vrot.slane %v3676_v30, 5 }
  0x57   : > { %v695_v7 = vor.u32 %v694_v25, %v690_v9  ;;  %v3684_v3 = vrot.slane %v3682_v44, 5  ;;  %v3686_v48 = vshrl.u32 %v12353_v62, 16  ;;  %v3692_v8 = vshll.u32 %v12361_v22, 16 }
  0x58   : > { %15373 = vst [vmem:[#allocation17_spill] sm:$0xff] %v12371_v42  ;;  %9989 = vmatprep.mubr.msk.bf16.mxu1 %vm947_vm3, %v12371_v42  ;;  %v691_v24 = vsel %vm12087_vm4, %v686_v33, %v690_v9  ;;  %v3679_v63 = vor.u32 %v3678_v17, %v3675_v13  ;;  %v3697_v59 = vshrl.u32 %v12369_v41, 16  ;;  %v3700_v14 = vshll.u32 %v12369_v41, 16  ;;  %v12390_v33 = vld [vmem:[%s12067_s25 + $0x60] sm:$0xf] }
  0x59   : > { %v696_v29 = vrot.slane %v695_v7, 4  ;;  %v3688_v30 = vrot.slane %v3686_v48, 4  ;;  %v3694_v32 = vrot.slane %v3692_v8, 5  ;;  %v3706_v25 = vshll.u32 %v12374_v60, 16  ;;  %v12396_v48 = vld [vmem:[%s12067_s25 + $0x64] sm:$0xf] }
  0x5a   : > { %v3680_v44 = vrot.slane %v3679_v63, 4  ;;  %v3699_v42 = vrot.slane %v3697_v59, 4  ;;  %v3702_v26 = vrot.slane %v3700_v14, 5  ;;  %v3710_v9 = vshrl.u32 %v12374_v60, 16 }
  0x5b   : > { %v701_v13 = vsel %vm12087_vm4, %v696_v29, %v700_v31  ;;  %v3689_v17 = vor.u32 %v3688_v30, %v3684_v3  ;;  %v3708_v40 = vrot.slane %v3706_v25, 5  ;;  %v3716_v7 = vshll.u32 %v12383_v38, 16 }
  0x5c   : > { %v12398_v8 = vcombine.low %v691_v24, %v701_v13  ;;  %v3685_v63 = vsel %vm12087_vm4, %v3680_v44, %v3684_v3  ;;  %v3703_v59 = vor.u32 %v3702_v26, %v3699_v42  ;;  %v3712_v14 = vrot.slane %v3710_v9, 4  ;;  %v12410_v26 = vld [vmem:[%s12067_s25 + $0x6c] sm:$0xf] }
  0x5d   : > { %v3690_v36 = vrot.slane %v3689_v17, 4  ;;  %v3718_v11 = vrot.slane %v3716_v7, 5  ;;  %v703_v31 = vshrl.u32 %v12390_v33, 16  ;;  %v706_v29 = vshll.u32 %v12390_v33, 16  ;;  %v12415_v17 = vld [vmem:[%s12067_s25 + $0x70] sm:$0xf] }
  0x5e   : > { %15375 = vst [vmem:[#allocation19_spill] sm:$0xff] %v12398_v8  ;;  %9990 = vmatmul.mubr.msk.bf16.gmra.mrb[12].mxu1 %vm947_vm3, %v12398_v8  ;;  %v3704_v30 = vrot.slane %v3703_v59, 4  ;;  %v3713_v25 = vor.u32 %v3712_v14, %v3708_v40  ;;  %v712_v24 = vshll.u32 %v12396_v48, 16  ;;  %v716_v3 = vshrl.u32 %v12396_v48, 16 }
  0x5f   : > { %v3695_v42 = vsel %vm12087_vm4, %v3690_v36, %v3694_v32  ;;  %v705_v44 = vrot.slane %v703_v31, 4  ;;  %v708_v9 = vrot.slane %v706_v29, 5  ;;  %v722_v13 = vshll.u32 %v370_v51, 16 }
  0x60   : > { %v12417_v7 = vcombine.low %v3685_v63, %v3695_v42  ;;  %v3709_v59 = vsel %vm12087_vm4, %v3704_v30, %v3708_v40  ;;  %v3714_v14 = vrot.slane %v3713_v25, 4  ;;  %v714_v8 = vrot.slane %v712_v24, 5 }
  0x61   : > { %v709_v45 = vor.u32 %v708_v9, %v705_v44  ;;  %v718_v43 = vrot.slane %v716_v3, 4  ;;  %v724_v57 = vrot.slane %v722_v13, 5  ;;  %v727_v12 = vshrl.u32 %v12410_v26, 16 }
  0x62   : > { %15376 = vst [vmem:[#allocation20_spill] sm:$0xff] %v12417_v7  ;;  %10431 = vmatprep.mubr.msk.bf16.mxu0 %vm947_vm3, %v12417_v7  ;;  %v3719_v36 = vsel %vm12087_vm4, %v3714_v14, %v3718_v11  ;;  %v730_v51 = vshll.u32 %v12410_v26, 16  ;;  %v736_v32 = vshll.u32 %v12415_v17, 16  ;;  %v740_v40 = vshrl.u32 %v12415_v17, 16  ;;  %v12446_v14 = vld [vmem:[%s12067_s25 + $0x78] sm:$0xf] }
  0x63   : > { %v12430_v63 = vcombine.low %v3709_v59, %v3719_v36  ;;  %v710_v31 = vrot.slane %v709_v45, 4  ;;  %v719_v29 = vor.u32 %v718_v43, %v714_v8  ;;  %v729_v30 = vrot.slane %v727_v12, 4  ;;  %v12742_v7 = vld [vmem:[%s12112_s7 + $0x90] sm:$0xf] }
  0x64   : > { %v732_v25 = vrot.slane %v730_v51, 5  ;;  %v738_v24 = vrot.slane %v736_v32, 5  ;;  %v742_v3 = vrot.slane %v740_v40, 4  ;;  %v746_v42 = vshll.u32 %v373_v19, 16  ;;  %15409 = vst [vmem:[#allocation47_spill] sm:$0xff] %v12742_v7 }
  0x65   : > { %15377 = vst [vmem:[#allocation21_spill] sm:$0xff] %v12430_v63  ;;  %10432 = vmatmul.mubr.msk.bf16.gmra.mrb[12].mxu0 %vm947_vm3, %v12430_v63  ;;  %v715_v44 = vsel %vm12087_vm4, %v710_v31, %v714_v8  ;;  %v720_v45 = vrot.slane %v719_v29, 4  ;;  %v9139_v12 = vrot.slane %v12116_v54, 9  ;;  %v4206_v43 = vrot.slane %v12119_v55, 5 }
  0x66   : > { %v733_v9 = vor.u32 %v732_v25, %v729_v30  ;;  %v743_v19 = vor.u32 %v742_v3, %v738_v24  ;;  %v748_v13 = vrot.slane %v746_v42, 5  ;;  %v9140_v59 = vrot.slane %v12134_v2, 9  ;;  %v12461_v30 = vld [vmem:[%s12067_s25 + $0x7c] sm:$0xf] }
  0x67   : > { %v725_v36 = vsel %vm12087_vm4, %v720_v45, %v724_v57  ;;  %v4207_v8 = vsel %vm12434_vm7, %v9139_v12, %v4206_v43  ;;  %v4208_v51 = vrot.slane %v4206_v43, 4  ;;  %v15380_v54 = vrot.slane %v12140_v10, 5  ;;  %v12475_v12 = vld [vmem:[%s12067_s25 + $0x84] sm:$0xf] }
  0x68   : > { %v12454_v55 = vcombine.low %v715_v44, %v725_v36  ;;  %v734_v40 = vrot.slane %v733_v9, 4  ;;  %v744_v31 = vrot.slane %v743_v19, 4  ;;  %v15383_v57 = vrot.slane %v12123_v58, 5  ;;  %v376_v44 = vld [vmem:[%s12067_s25 + $0x80] sm:$0x1] }
  0x69   : > { %v4215_v32 = vrot.slane %v15380_v54, 4  ;;  %v15382_v2 = vmov %v15380_v54  ;;  %v15384_v3 = vrot.slane %v12145_v15, 5  ;;  %v751_v45 = vshrl.u32 %v12446_v14, 16  ;;  %v12488_v19 = vld [vmem:[%s12067_s25 + $0x88] sm:$0xf] }
  0x6a   : > { %15381 = vst [vmem:[#allocation22_spill] sm:$0xff] %v12454_v55  ;;  %v4214_v29 = vsel %vm12434_vm7, %v9140_v59, %v15382_v2  ;;  %v4210_v25 = vsel %vm12434_vm7, %v4208_v51, %v15383_v57  ;;  %v754_v10 = vshll.u32 %v12446_v14, 16  ;;  %9993 = vmatprep.mubr.msk.bf16.mxu1 %vm947_vm3, %v12454_v55  ;;  %v739_v58 = vsel %vm12087_vm4, %v734_v40, %v738_v24 }
  0x6b   : > { %v4217_v42 = vsel %vm12434_vm7, %v4215_v32, %v15384_v3  ;;  %v749_v15 = vsel %vm12087_vm4, %v744_v31, %v748_v13  ;;  %v12483_v43 = vcombine.low %v4207_v8, %v4210_v25  ;;  %v753_v36 = vrot.slane %v751_v45, 4  ;;  %v379_v32 = vld [vmem:[%s12067_s25 + $0x8c] sm:$0x1]  ;;  %v12502_v31 = vld [vmem:[%s15071_s3 + $0x20] sm:$0x3] }
  0x6c   : > { %v12485_v9 = vcombine.low %v4214_v29, %v4217_v42  ;;  %v12490_v59 = vcombine.low %v739_v58, %v749_v15  ;;  %v756_v51 = vrot.slane %v754_v10, 5  ;;  %v760_v54 = vshll.u32 %v12461_v30, 16 }
  0x6d   : > { %15385 = vst [vmem:[#allocation23_spill] sm:$0xff] %v12483_v43  ;;  %10453 = vmatprep.mubr.msk.bf16.mxu0 %vm947_vm3, %v12483_v43  ;;  %v764_v24 = vshrl.u32 %v12461_v30, 16  ;;  %v770_v40 = vshll.u32 %v376_v44, 16  ;;  %v775_v13 = vshrl.u32 %v12475_v12, 16  ;;  %v778_v8 = vshll.u32 %v12475_v12, 16 }
  0x6e   : > { %15386 = vst [vmem:[#allocation24_spill] sm:$0xff] %v12485_v9  ;;  %15387 = vst [vmem:[#allocation25_spill] sm:$0xff] %v12490_v59  ;;  %9994 = vmatmul.mubr.msk.bf16.gmra.mrb[16].mxu1 %vm947_vm3, %v12490_v59  ;;  %10454 = vmatmul.mubr.msk.bf16.vlgmr.msra.gmra.mrb[0].mxu0 %vm947_vm3, %v12485_v9  ;;  %v757_v2 = vor.u32 %v756_v51, %v753_v36  ;;  %v762_v29 = vrot.slane %v760_v54, 5  ;;  %v784_v57 = vshll.u32 %v12488_v19, 16  ;;  %v788_v25 = vshrl.u32 %v12488_v19, 16 }
  0x6f   : > { %10486 = vmatpush3.bf16.msra.mxu0 %v12103_v47  ;;  %v766_v3 = vrot.slane %v764_v24, 4  ;;  %v772_v42 = vrot.slane %v770_v40, 5  ;;  %v777_v44 = vrot.slane %v775_v13, 4  ;;  %v780_v45 = vrot.slane %v778_v8, 5  ;;  %v12717_v9 = vld [vmem:[%s12112_s7 + $0x94] sm:$0xf] }
  0x70   : > { %v758_v10 = vrot.slane %v757_v2, 4  ;;  %v786_v58 = vrot.slane %v784_v57, 5  ;;  %v790_v15 = vrot.slane %v788_v25, 4  ;;  %v794_v43 = vshll.u32 %v379_v32, 16  ;;  %11744 = vmatprep.subr.msk.bf16.mxu0 %vm996_vm0, %v12502_v31  ;;  %v12519_v32 = vld [vmem:[%s12067_s25 + $0x90] sm:$0xf] }
  0x71   : > { %v767_v36 = vor.u32 %v766_v3, %v762_v29  ;;  %v781_v51 = vor.u32 %v780_v45, %v777_v44  ;;  %v9141_v54 = vrot.slane %v12172_v0, 9  ;;  %v4220_v59 = vrot.slane %v12177_v6, 5  ;;  %15407 = vst [vmem:[#allocation45_spill] sm:$0xff] %v12717_v9 }
  0x72   : > { %v763_v47 = vsel %vm12087_vm4, %v758_v10, %v762_v29  ;;  %v791_v24 = vor.u32 %v790_v15, %v786_v58  ;;  %v796_v40 = vrot.slane %v794_v43, 5  ;;  %v4223_v13 = vrot.slane %v12184_v21, 5  ;;  %v12527_v43 = vld [vmem:[%s12067_s25 + $0x94] sm:$0xf]  ;;  %v12538_v15 = vld [vmem:[%s12067_s25 + $0x9c] sm:$0xf] }
  0x73   : > { %v768_v8 = vrot.slane %v767_v36, 4  ;;  %v782_v2 = vrot.slane %v781_v51, 4  ;;  %v4221_v57 = vsel %vm12434_vm7, %v9141_v54, %v4220_v59  ;;  %v4222_v25 = vrot.slane %v4220_v59, 4  ;;  %v382_v59 = vld [vmem:[%s12067_s25 + $0x98] sm:$0x1] }
  0x74   : > { %v792_v0 = vrot.slane %v791_v24, 4  ;;  %v9142_v6 = vrot.slane %v12193_v28, 9  ;;  %v4227_v29 = vrot.slane %v12199_v35, 5  ;;  %v4230_v3 = vrot.slane %v12213_v49, 5 }
  0x75   : > { %v773_v21 = vsel %vm12087_vm4, %v768_v8, %v772_v42  ;;  %v787_v44 = vsel %vm12087_vm4, %v782_v2, %v786_v58  ;;  %v4224_v45 = vsel %vm12434_vm7, %v4222_v25, %v4223_v13  ;;  %v799_v10 = vshrl.u32 %v12519_v32, 16  ;;  %v12549_v58 = vld [vmem:[%s12067_s25 + $0xa0] sm:$0xf]  ;;  %v385_v25 = vld [vmem:[%s12067_s25 + $0xa4] sm:$0x1] }
  0x76   : > { %v12540_v28 = vcombine.low %v763_v47, %v773_v21  ;;  %v797_v35 = vsel %vm12087_vm4, %v792_v0, %v796_v40  ;;  %v12544_v49 = vcombine.low %v4221_v57, %v4224_v45  ;;  %v4228_v42 = vsel %vm12434_vm7, %v9142_v6, %v4227_v29 }
  0x77   : > { %v12551_v36 = vcombine.low %v787_v44, %v797_v35  ;;  %v4229_v51 = vrot.slane %v4227_v29, 4  ;;  %v801_v54 = vrot.slane %v799_v10, 4  ;;  %v802_v24 = vshll.u32 %v12519_v32, 16 }
  0x78   : > { %15388 = vst [vmem:[#allocation26_spill] sm:$0xff] %v12540_v28  ;;  %15389 = vst [vmem:[#allocation27_spill] sm:$0xff] %v12544_v49  ;;  %9997 = vmatprep.mubr.msk.bf16.mxu1 %vm947_vm3, %v12540_v28  ;;  %10457 = vmatprep.mubr.msk.bf16.mxu0 %vm947_vm3, %v12544_v49  ;;  %v808_v47 = vshll.u32 %v12527_v43, 16  ;;  %v812_v40 = vshrl.u32 %v12527_v43, 16  ;;  %v818_v13 = vshll.u32 %v382_v59, 16  ;;  %v823_v8 = vshrl.u32 %v12538_v15, 16 }
  0x79   : > { %15390 = vst [vmem:[#allocation28_spill] sm:$0xff] %v12551_v36  ;;  %9998 = vmatmul.mubr.msk.bf16.gmra.mrb[20].mxu1 %vm947_vm3, %v12551_v36  ;;  %v4231_v2 = vsel %vm12434_vm7, %v4229_v51, %v4230_v3  ;;  %v804_v57 = vrot.slane %v802_v24, 5  ;;  %v826_v0 = vshll.u32 %v12538_v15, 16  ;;  %v832_v6 = vshll.u32 %v12549_v58, 16 }
  0x7a   : > { %v12568_v29 = vcombine.low %v4228_v42, %v4231_v2  ;;  %v810_v21 = vrot.slane %v808_v47, 5  ;;  %v814_v44 = vrot.slane %v812_v40, 4  ;;  %v820_v45 = vrot.slane %v818_v13, 5 }
  0x7b   : > { %v805_v59 = vor.u32 %v804_v57, %v801_v54  ;;  %v825_v10 = vrot.slane %v823_v8, 4  ;;  %v828_v35 = vrot.slane %v826_v0, 5  ;;  %v834_v28 = vrot.slane %v832_v6, 5  ;;  %v12578_v57 = vld [vmem:[%s12067_s25 + $0xa8] sm:$0xf] }
  0x7c   : > { %15391 = vst [vmem:[#allocation29_spill] sm:$0xff] %v12568_v29  ;;  %10458 = vmatmul.mubr.msk.bf16.gmra.mrb[4].mxu0 %vm947_vm3, %v12568_v29  ;;  %v815_v3 = vor.u32 %v814_v44, %v810_v21  ;;  %v836_v51 = vshrl.u32 %v12549_v58, 16  ;;  %v842_v24 = vshll.u32 %v385_v25, 16  ;;  %v9143_v36 = vrot.slane %v12256_v46, 9  ;;  %v12709_v29 = vld [vmem:[%s12112_s7 + $0x8c] sm:$0x1] }
  0x7d   : > { %v806_v55 = vrot.slane %v805_v59, 4  ;;  %v829_v42 = vor.u32 %v828_v35, %v825_v10  ;;  %v4234_v47 = vrot.slane %v12265_v61, 5  ;;  %v4237_v54 = vrot.slane %v12273_v16, 5  ;;  %v12602_v35 = vld [vmem:[%s12067_s25 + $0xb4] sm:$0xf]  ;;  %15405 = vst [vmem:[#allocation43_spill] sm:$0xff] %v12709_v29 }
  0x7e   : > { %v816_v40 = vrot.slane %v815_v3, 4  ;;  %v838_v13 = vrot.slane %v836_v51, 4  ;;  %v844_v8 = vrot.slane %v842_v24, 5  ;;  %v9144_v2 = vrot.slane %v12277_v27, 9  ;;  %v12589_v27 = vld [vmem:[%s12067_s25 + $0xac] sm:$0xf] }
  0x7f   : > { %v811_v25 = vsel %vm12087_vm4, %v806_v55, %v810_v21  ;;  %v830_v46 = vrot.slane %v829_v42, 4  ;;  %v4235_v0 = vsel %vm12434_vm7, %v9143_v36, %v4234_v47  ;;  %v4236_v6 = vrot.slane %v4234_v47, 4  ;;  %v12598_v36 = vld [vmem:[%s12067_s25 + $0xb0] sm:$0x1] }
  0x80   : > { %v821_v61 = vsel %vm12087_vm4, %v816_v40, %v820_v45  ;;  %v839_v16 = vor.u32 %v838_v13, %v834_v28  ;;  %v4241_v44 = vrot.slane %v12284_v39, 5  ;;  %v4244_v59 = vrot.slane %v12292_v20, 5  ;;  %15393 = vst [vmem:[#allocation31_spill] sm:$0xff] %v12598_v36 }
  0x81   : > { %v12591_v10 = vcombine.low %v811_v25, %v821_v61  ;;  %v835_v55 = vsel %vm12087_vm4, %v830_v46, %v834_v28  ;;  %v4238_v21 = vsel %vm12434_vm7, %v4236_v6, %v4237_v54  ;;  %v847_v45 = vshrl.u32 %v12578_v57, 16  ;;  %v12621_v25 = vld [vmem:[%s12067_s25 + $0xb8] sm:$0xf]  ;;  %v12624_v46 = vld [vmem:[%s12067_s25 + $0xbc] sm:$0x1] }
  0x82   : > { %v840_v3 = vrot.slane %v839_v16, 4  ;;  %v12604_v20 = vcombine.low %v4235_v0, %v4238_v21  ;;  %v4242_v51 = vsel %vm12434_vm7, %v9144_v2, %v4241_v44  ;;  %v4243_v24 = vrot.slane %v4241_v44, 4  ;;  %15395 = vst [vmem:[#allocation33_spill] sm:$0xff] %v12624_v46 }
  0x83   : > { %15392 = vst [vmem:[#allocation30_spill] sm:$0xff] %v12591_v10  ;;  %10001 = vmatprep.mubr.msk.bf16.mxu1 %vm947_vm3, %v12591_v10  ;;  %v849_v28 = vrot.slane %v847_v45, 4  ;;  %v850_v42 = vshll.u32 %v12578_v57, 16  ;;  %v856_v47 = vshll.u32 %v12589_v27, 16  ;;  %v860_v54 = vshrl.u32 %v12589_v27, 16 }
  0x84   : > { %15394 = vst [vmem:[#allocation32_spill] sm:$0xff] %v12604_v20  ;;  %v845_v40 = vsel %vm12087_vm4, %v840_v3, %v844_v8  ;;  %10461 = vmatprep.mubr.msk.bf16.mxu0 %vm947_vm3, %v12604_v20  ;;  %v4245_v13 = vsel %vm12434_vm7, %v4243_v24, %v4244_v59  ;;  %v866_v2 = vshll.u32 %v12598_v36, 16  ;;  %v871_v0 = vshrl.u32 %v12602_v35, 16  ;;  %v12644_v20 = vld [vmem:[%s12112_s7 + $0x6c] sm:$0xf] }
  0x85   : > { %v12627_v6 = vcombine.low %v835_v55, %v845_v40  ;;  %v12629_v61 = vcombine.low %v4242_v51, %v4245_v13  ;;  %v852_v16 = vrot.slane %v850_v42, 5  ;;  %v858_v8 = vrot.slane %v856_v47, 5  ;;  %v12787_v36 = vld [vmem:[%s12112_s7 + $0xac] sm:$0xf] }
  0x86   : > { %v862_v44 = vrot.slane %v860_v54, 4  ;;  %v868_v21 = vrot.slane %v866_v2, 5  ;;  %v873_v45 = vrot.slane %v871_v0, 4  ;;  %v874_v3 = vshll.u32 %v12602_v35, 16  ;;  %15416 = vst [vmem:[#allocation54_spill] sm:$0xff] %v12787_v36 }
  0x87   : > { %15396 = vst [vmem:[#allocation34_spill] sm:$0xff] %v12627_v6  ;;  %15397 = vst [vmem:[#allocation35_spill] sm:$0xff] %v12629_v61  ;;  %10002 = vmatmul.mubr.msk.bf16.gmra.mrb[24].mxu1 %vm947_vm3, %v12627_v6  ;;  %10462 = vmatmul.mubr.msk.bf16.gmra.mrb[8].mxu0 %vm947_vm3, %v12629_v61  ;;  %v853_v59 = vor.u32 %v852_v16, %v849_v28  ;;  %v880_v55 = vshll.u32 %v12621_v25, 16  ;;  %v884_v51 = vshrl.u32 %v12621_v25, 16  ;;  %v890_v24 = vshll.u32 %v12624_v46, 16 }
  0x88   : > { %v863_v42 = vor.u32 %v862_v44, %v858_v8  ;;  %v876_v47 = vrot.slane %v874_v3, 5  ;;  %v9145_v54 = vrot.slane %v12348_v52, 9  ;;  %v4248_v40 = vrot.slane %v12353_v62, 5 }
  0x89   : > { %v854_v13 = vrot.slane %v853_v59, 4  ;;  %v882_v2 = vrot.slane %v880_v55, 5  ;;  %v886_v0 = vrot.slane %v884_v51, 4  ;;  %v892_v6 = vrot.slane %v890_v24, 5  ;;  %v12651_v51 = vld [vmem:[%s12112_s7 + $0x70] sm:$0xf] }
  0x8a   : > { %v864_v28 = vrot.slane %v863_v42, 4  ;;  %v877_v16 = vor.u32 %v876_v47, %v873_v45  ;;  %v4249_v10 = vsel %vm12434_vm7, %v9145_v54, %v4248_v40  ;;  %v4250_v61 = vrot.slane %v4248_v40, 4  ;;  %v12658_v54 = vld [vmem:[%s12112_s7 + $0x74] sm:$0x1] }
  0x8b   : > { %v859_v44 = vsel %vm12087_vm4, %v854_v13, %v858_v8  ;;  %v887_v3 = vor.u32 %v886_v0, %v882_v2  ;;  %v4251_v59 = vrot.slane %v12361_v22, 5  ;;  %v9146_v55 = vrot.slane %v12369_v41, 9  ;;  %15398 = vst [vmem:[#allocation36_spill] sm:$0xff] %v12658_v54  ;;  %v12666_v0 = vld [vmem:[%s12112_s7 + $0x78] sm:$0xf] }
  0x8c   : > { %v869_v45 = vsel %vm12087_vm4, %v864_v28, %v868_v21  ;;  %v878_v24 = vrot.slane %v877_v16, 4  ;;  %v4255_v42 = vrot.slane %v12374_v60, 5  ;;  %v4258_v47 = vrot.slane %v12383_v38, 5  ;;  %15400 = vst [vmem:[#allocation38_spill] sm:$0xff] %v12666_v0  ;;  %v12669_v21 = vld [vmem:[%s12112_s7 + $0x7c] sm:$0xf] }
  0x8d   : > { %v12660_v8 = vcombine.low %v859_v44, %v869_v45  ;;  %v888_v22 = vrot.slane %v887_v3, 4  ;;  %v4252_v40 = vsel %vm12434_vm7, %v4250_v61, %v4251_v59  ;;  %v9147_v13 = vrot.slane %v12644_v20, 9  ;;  %15401 = vst [vmem:[#allocation39_spill] sm:$0xff] %v12669_v21  ;;  %v12678_v3 = vld [vmem:[%s12112_s7 + $0x80] sm:$0x1] }
  0x8e   : > { %v883_v28 = vsel %vm12087_vm4, %v878_v24, %v882_v2  ;;  %v12673_v38 = vcombine.low %v4249_v10, %v4252_v40  ;;  %v4256_v16 = vsel %vm12434_vm7, %v9146_v55, %v4255_v42  ;;  %v4257_v44 = vrot.slane %v4255_v42, 4  ;;  %15403 = vst [vmem:[#allocation41_spill] sm:$0xff] %v12678_v3  ;;  %v12685_v59 = vld [vmem:[%s12067_s25] sm:$0xf]  ;;  %v12688_v45 = vld [vmem:[%s12067_s25 + $0x4] sm:$0xf] }
  0x8f   : > { %15399 = vst [vmem:[#allocation37_spill] sm:$0xff] %v12660_v8  ;;  %10005 = vmatprep.mubr.msk.bf16.mxu1 %vm947_vm3, %v12660_v8  ;;  %v893_v61 = vsel %vm12087_vm4, %v888_v22, %v892_v6  ;;  %v8886_v10 = vcombine.low %v12685_v59, %v12688_v45  ;;  %v4262_v2 = vrot.slane %v12651_v51, 5  ;;  %v4265_v55 = vrot.slane %v12658_v54, 5  ;;  %v12695_v24 = vld [vmem:[%s12112_s7 + $0x84] sm:$0xf] }
  0x90   : > { %15402 = vst [vmem:[#allocation40_spill] sm:$0xff] %v12673_v38  ;;  %v12697_v42 = vcombine.low %v883_v28, %v893_v61  ;;  %10465 = vmatprep.mubr.msk.bf16.mxu0 %vm947_vm3, %v12673_v38  ;;  %v4259_v6 = vsel %vm12434_vm7, %v4257_v44, %v4258_v47  ;;  %v9148_v22 = vrot.slane %v12666_v0, 9  ;;  %v4269_v40 = vrot.slane %v12669_v21, 5  ;;  %v12706_v8 = vld [vmem:[%s12112_s7 + $0x88] sm:$0xf] }
  0x91   : > { %v12711_v49 = vcombine.low %v4256_v16, %v4259_v6  ;;  %v4263_v28 = vsel %vm12434_vm7, %v9147_v13, %v4262_v2  ;;  %v4264_v61 = vrot.slane %v4262_v2, 4  ;;  %v4272_v38 = vrot.slane %v12678_v3, 5  ;;  %v12853_v60 = vld [vmem:[%s12112_s7 + $0xc4] sm:$0xf] }
  0x92   : > { %15404 = vst [vmem:[#allocation42_spill] sm:$0xff] %v12697_v42  ;;  %10006 = vmatmul.mubr.msk.bf16.gmra.mrb[28].mxu1 %vm947_vm3, %v12697_v42  ;;  %v4271_v47 = vrot.slane %v4269_v40, 4  ;;  %v9149_v16 = vrot.slane %v12695_v24, 9  ;;  %v4276_v44 = vrot.slane %v12706_v8, 5  ;;  %v4279_v2 = vrot.slane %v12709_v29, 5  ;;  %15424 = vst [vmem:[#allocation62_spill] sm:$0xff] %v12853_v60 }
  0x93   : > { %15406 = vst [vmem:[#allocation44_spill] sm:$0xff] %v12711_v49  ;;  %10466 = vmatmul.mubr.msk.bf16.gmra.mrb[12].mxu0 %vm947_vm3, %v12711_v49  ;;  %10011 = vmatprep.mubr.msk.bf16.mxu1 %vm947_vm3, %v8886_v10  ;;  %v4266_v13 = vsel %vm12434_vm7, %v4264_v61, %v4265_v55  ;;  %v4270_v42 = vsel %vm12434_vm7, %v9148_v22, %v4269_v40  ;;  %v4283_v55 = vrot.slane %v12717_v9, 5  ;;  %v12737_v61 = vld [vmem:[%s12112_s7 + $0xa0] sm:$0xf]  ;;  %v12751_v22 = vld [vmem:[%s12067_s25 + $0x10] sm:$0xf] }
  0x94   : > { %v12729_v6 = vcombine.low %v4263_v28, %v4266_v13  ;;  %v4273_v10 = vsel %vm12434_vm7, %v4271_v47, %v4272_v38  ;;  %v4277_v49 = vsel %vm12434_vm7, %v9149_v16, %v4276_v44  ;;  %v4278_v63 = vrot.slane %v4276_v44, 4  ;;  %v12745_v28 = vld [vmem:[%s12112_s7 + $0x98] sm:$0x1]  ;;  %v12748_v13 = vld [vmem:[%s12067_s25 + $0xc] sm:$0xf] }
  0x95   : > { %15410 = vst [vmem:[#allocation48_spill] sm:$0xff] %v12745_v28  ;;  %v12755_v38 = vcombine.low %v12748_v13, %v12751_v22  ;;  %v1682_v40 = vsel %vm996_vm0, %v12333_v4, 0  ;;  %v12762_v47 = vld [vmem:[%s12112_s7 + $0x9c] sm:$0xf]  ;;  %v12765_v16 = vld [vmem:[%s12112_s7 + $0xa4] sm:$0x1]  ;;  %v12767_v44 = vcombine.low %v4270_v42, %v4273_v10 }
  0x96   : > { %15408 = vst [vmem:[#allocation46_spill] sm:$0xff] %v12729_v6  ;;  %10469 = vmatprep.mubr.msk.bf16.mxu0 %vm947_vm3, %v12729_v6  ;;  %15412 = vst [vmem:[#allocation50_spill] sm:$0xff] %v12765_v16  ;;  %v12770_v29 = vld [vmem:[%s12067_s25 + $0x18] sm:$0xf]  ;;  %v4280_v6 = vsel %vm12434_vm7, %v4278_v63, %v4279_v2  ;;  %v4290_v4 = vrot.slane %v12737_v61, 5  ;;  %v9150_v46 = vrot.slane %v12742_v7, 9 }
  0x97   : > { %15411 = vst [vmem:[#allocation49_spill] sm:$0xff] %v12755_v38  ;;  %15413 = vst [vmem:[#allocation51_spill] sm:$0xff] %v12767_v44  ;;  %v12777_v3 = vcombine.low %v12770_v29, %v12773_v34  ;;  %v12782_v54 = vcombine.low %v4277_v49, %v4280_v6  ;;  %v4285_v42 = vrot.slane %v4283_v55, 4  ;;  %v4286_v10 = vrot.slane %v12745_v28, 5  ;;  %v12794_v63 = vld [vmem:[%s12112_s7 + $0xb8] sm:$0xf] }
  0x98   : > { %v9151_v9 = vrot.slane %v12762_v47, 9  ;;  %v4292_v0 = vrot.slane %v4290_v4, 4  ;;  %v4293_v21 = vrot.slane %v12765_v16, 5  ;;  %v12799_v49 = vld [vmem:[%s12112_s7 + $0xa8] sm:$0xf]  ;;  %v4297_v2 = vrot.slane %v12787_v36, 5 }
  0x99   : > { %15414 = vst [vmem:[#allocation52_spill] sm:$0xff] %v12777_v3  ;;  %15415 = vst [vmem:[#allocation53_spill] sm:$0xff] %v12782_v54  ;;  %v4284_v6 = vsel %vm12434_vm7, %v9150_v46, %v4283_v55  ;;  %v4304_v28 = vrot.slane %v12794_v63, 5  ;;  %v9152_v55 = vrot.slane %v12799_v49, 9  ;;  %v1481_v36 = vrot.slane %v12751_v22, 5 }
  0x9a   : > { %10012 = vmatmul.mubr.msk.bf16.vlgmr.msra.gmra.mrb[0].mxu1 %vm947_vm3, %v12755_v38  ;;  %15417 = vst [vmem:[#allocation55_spill] sm:$0xff] %v12799_v49  ;;  %v12811_v38 = vld [vmem:[%s12112_s7 + $0xb0] sm:$0x1]  ;;  %v4294_v16 = vsel %vm12434_vm7, %v4292_v0, %v4293_v21  ;;  %v12839_v0 = vcombine.low %v12218_v50, %v12227_v1  ;;  %v4299_v21 = vrot.slane %v4297_v2, 4  ;;  %v11877_v50 = vld [vmem:[%s12067_s25 + $0x14] sm:$0x1] }
  0x9b   : > { %10044 = vmatpush3.bf16.msra.mxu1 %v1682_v40  ;;  %10470 = vmatmul.mubr.msk.bf16.gmra.mrb[16].mxu0 %vm947_vm3, %v12767_v44  ;;  %v4287_v40 = vsel %vm12434_vm7, %v4285_v42, %v4286_v10  ;;  %15418 = vst [vmem:[#allocation56_spill] sm:$0xff] %v12811_v38  ;;  %v4291_v44 = vsel %vm12434_vm7, %v9151_v9, %v4290_v4  ;;  %v12830_v42 = vld [vmem:[%s12112_s7 + $0xb4] sm:$0xf]  ;;  %v12833_v9 = vld [vmem:[%s12112_s7 + $0xbc] sm:$0x1]  ;;  %v4300_v10 = vrot.slane %v12811_v38, 5 }
  0x9c   : > { %10015 = vmatprep.mubr.msk.bf16.mxu1 %vm947_vm3, %v12777_v3  ;;  %10473 = vmatprep.mubr.msk.bf16.mxu0 %vm947_vm3, %v12782_v54  ;;  %v12819_v3 = vld [vmem:[%s12067_s25 + $0x24] sm:$0xf]  ;;  %v12822_v54 = vld [vmem:[%s12067_s25 + $0x28] sm:$0xf]  ;;  %15420 = vst [vmem:[#allocation58_spill] sm:$0xff] %v12833_v9  ;;  %v12835_v4 = vcombine.low %v4284_v6, %v4287_v40  ;;  %15422 = vst [vmem:[#allocation60_spill] sm:$0xff] %v12839_v0  ;;  %v12843_v7 = vcombine.low %v4291_v44, %v4294_v16 }
  0x9d   : > { %v12826_v46 = vcombine.low %v12819_v3, %v12822_v54  ;;  %v12848_v49 = vld [vmem:[%s15071_s3 + $0x4] ss:$0 sps:$4 sm:$0xcc]   ;;  %v9153_v41 = vrot.slane %v12830_v42, 9  ;;  %v4306_v6 = vrot.slane %v4304_v28, 4  ;;  %v4307_v40 = vrot.slane %v12833_v9, 5 }
  0x9e   : > { %15421 = vst [vmem:[#allocation59_spill] sm:$0xff] %v12835_v4  ;;  %15423 = vst [vmem:[#allocation61_spill] sm:$0xff] %v12843_v7  ;;  %v1484_v1 = vrot.slane %v11877_v50, 5  ;;  %v4298_v22 = vsel %vm12434_vm7, %v9152_v55, %v4297_v2  ;;  %v12862_v16 = vcombine.low %v12578_v57, %v12589_v27  ;;  %v4301_v44 = vsel %vm12434_vm7, %v4299_v21, %v4300_v10  ;;  %v12888_v9 = vld [vmem:[%s12112_s7 + $0xc0] sm:$0xf] }
  0x9f   : > { %15419 = vst [vmem:[#allocation57_spill] sm:$0xff] %v12826_v46  ;;  %v12872_v50 = vcombine.low %v12602_v35, %v12621_v25  ;;  %v12876_v2 = vcombine.low %v12644_v20, %v12651_v51  ;;  %v5045_v55 = vrot.slane %v12853_v60, 5  ;;  %v4305_v21 = vsel %vm12434_vm7, %v9153_v41, %v4304_v28  ;;  %v12891_v38 = vld [vmem:[%s12112_s7 + $0xc8] sm:$0x1] }
  0xa0   : > { %15425 = vst [vmem:[#allocation63_spill] sm:$0xff] %v12862_v16  ;;  %v4308_v10 = vsel %vm12434_vm7, %v4306_v6, %v4307_v40  ;;  %15428 = vst [vmem:[#allocation66_spill] sm:$0xff] %v12891_v38  ;;  %v15431_v28 = vrot.slane %v12848_v49, 2  ;;  %v12908_v6 = vcombine.low %v4298_v22, %v4301_v44  ;;  %v12912_v40 = vcombine.low %v12301_v5, %v12307_v23 }
  0xa1   : > { %15426 = vst [vmem:[#allocation64_spill] sm:$0xff] %v12872_v50  ;;  %15427 = vst [vmem:[#allocation65_spill] sm:$0xff] %v12876_v2  ;;  %v12948_v44 = vcombine.low %v12390_v33, %v12396_v48  ;;  %v8918_v33 = vrot.slane %v12685_v59, 9  ;;  %v12968_v48 = vcombine.low %v12410_v26, %v12415_v17  ;;  %v11883_v59 = vld [vmem:[%s12112_s7 + $0x28] sm:$0xf]  ;;  %v5494_v26 = vsel %vm996_vm0, %v12502_v31, 0 }
  0xa2   : > { %10016 = vmatmul.mubr.msk.bf16.gmra.mrb[4].mxu1 %vm947_vm3, %v12826_v46  ;;  %v1483_v46 = vrot.slane %v1481_v36, 4  ;;  %11730 = vmatprep.subr.msk.bf16.mxu1 %vm996_vm0, %v15431_v28  ;;  %15432 = vst [vmem:[#allocation69_spill] sm:$0xff] %v12908_v6  ;;  %15433 = vst [vmem:[#allocation70_spill] sm:$0xff] %v12912_v40  ;;  %v1488_v28 = vrot.slane %v12773_v34, 5  ;;  %v12985_v17 = vcombine.low %v12446_v14, %v12461_v30 }
  0xa3   : > { %10474 = vmatmul.mubr.msk.bf16.gmra.mrb[20].mxu0 %vm947_vm3, %v12835_v4  ;;  %10019 = vmatprep.mubr.msk.bf16.mxu1 %vm947_vm3, %v12839_v0  ;;  %v8919_v4 = vrot.slane %v12748_v13, 9  ;;  %v12899_v13 = vcombine.low %v12239_v18, %v12248_v37  ;;  %v12916_v18 = vcombine.low %v4305_v21, %v4308_v10  ;;  %v9222_v37 = vrot.slane %v12888_v9, 9  ;;  %15439 = vst [vmem:[#allocation76_spill] sm:$0xff] %v12948_v44  ;;  %v11878_v21 = vld [vmem:[%s12112_s7 + $0x18] sm:$0xf] }
  0xa4   : > { %10477 = vmatprep.mubr.msk.bf16.mxu0 %vm947_vm3, %v12843_v7  ;;  %v12895_v7 = vcombine.low %v12695_v24, %v12706_v8  ;;  %v1485_v41 = vsel %vm12434_vm7, %v1483_v46, %v1484_v1  ;;  %v5048_v46 = vrot.slane %v12891_v38, 5  ;;  %v12942_v1 = vcombine.low %v12323_v53, %v12326_v56  ;;  %v11880_v53 = vld [vmem:[%s12067_s25 + $0x8] sm:$0x1]  ;;  %15441 = vst [vmem:[#allocation78_spill] sm:$0xff] %v12968_v48 }
  0xa5   : > { %15430 = vst [vmem:[#allocation68_spill] sm:$0xff] %v12899_v13  ;;  %v1482_v0 = vsel %vm12434_vm7, %v8919_v4, %v1481_v36  ;;  %15434 = vst [vmem:[#allocation71_spill] sm:$0xff] %v12916_v18  ;;  %v5047_v36 = vrot.slane %v5045_v55, 4  ;;  %v12922_v4 = vcombine.low %v12762_v47, %v12737_v61  ;;  %v5046_v5 = vsel %vm12434_vm7, %v9222_v37, %v5045_v55  ;;  %v11879_v55 = vld [vmem:[%s12112_s7 + $0x1c] sm:$0xf] }
  0xa6   : > { %15429 = vst [vmem:[#allocation67_spill] sm:$0xff] %v12895_v7  ;;  %v12914_v60 = vcombine.low %v1482_v0, %v1485_v41  ;;  %v12938_v0 = vcombine.low %v12830_v42, %v12794_v63  ;;  %15437 = vst [vmem:[#allocation74_spill] sm:$0xff] %v12942_v1  ;;  %v12952_v10 = vcombine.low %v11878_v21, %v11879_v55  ;;  %v1474_v41 = vrot.slane %v12688_v45, 5 }
  0xa7   : > { %15435 = vst [vmem:[#allocation72_spill] sm:$0xff] %v12922_v4  ;;  %v5049_v23 = vsel %vm12434_vm7, %v5047_v36, %v5048_v46  ;;  %v1477_v56 = vrot.slane %v11880_v53, 5  ;;  %v8920_v45 = vrot.slane %v12770_v29, 9  ;;  %v1490_v37 = vrot.slane %v1488_v28, 4  ;;  %v11881_v36 = vld [vmem:[%s12067_s25 + $0x20] sm:$0x1] }
  0xa8   : > { %15436 = vst [vmem:[#allocation73_spill] sm:$0xff] %v12938_v0  ;;  %v12944_v22 = vcombine.low %v5046_v5, %v5049_v23  ;;  %15440 = vst [vmem:[#allocation77_spill] sm:$0xff] %v12952_v10  ;;  %v1476_v34 = vrot.slane %v1474_v41, 4  ;;  %v1491_v46 = vrot.slane %v11881_v36, 5  ;;  %v11882_v23 = vld [vmem:[%s12112_s7 + $0x24] sm:$0xf]  ;;  %v12990_v55 = vcombine.low %v12475_v12, %v12488_v19 }
  0xa9   : > { %v12975_v5 = vld [vmem:[%s15071_s3 + $0x20] ss:$0 sps:$4 sm:$0xcc]   ;;  %v12979_v21 = vcombine.low %v11882_v23, %v11883_v59  ;;  %15444 = vst [vmem:[#allocation81_spill] sm:$0xff] %v12985_v17  ;;  %v1495_v29 = vrot.slane %v12822_v54, 5  ;;  %v13002_v31 = vcombine.low %v12519_v32, %v12527_v43  ;;  %v13006_v14 = vcombine.low %v12538_v15, %v12549_v58 }
  0xaa   : > { %10020 = vmatmul.mubr.msk.bf16.gmra.mrb[8].mxu1 %vm947_vm3, %v12899_v13  ;;  %15438 = vst [vmem:[#allocation75_spill] sm:$0xff] %v12944_v22  ;;  %15442 = vst [vmem:[#allocation79_spill] sm:$0xff] %v12975_v5  ;;  %v11884_v53 = vld [vmem:[%s12112_s7 + $0x30] sm:$0xf]  ;;  %v11885_v36 = vld [vmem:[%s12112_s7 + $0x34] sm:$0xf]  ;;  %v13010_v30 = vsel %vm12434_vm7, %v8918_v33, %v1474_v41  ;;  %v13014_v12 = vsel %vm12434_vm7, %v1476_v34, %v1477_v56  ;;  %v1489_v32 = vsel %vm12434_vm7, %v8920_v45, %v1488_v28 }
  0xab   : > { %10478 = vmatmul.mubr.msk.bf16.gmra.mrb[24].mxu0 %vm947_vm3, %v12908_v6  ;;  %10023 = vmatprep.mubr.msk.bf16.mxu1 %vm947_vm3, %v12912_v40  ;;  %15443 = vst [vmem:[#allocation80_spill] sm:$0xff] %v12979_v21  ;;  %15445 = vst [vmem:[#allocation82_spill] sm:$0xff] %v12990_v55  ;;  %v11886_v23 = vld [vmem:[%s12112_s7 + $0x3c] sm:$0xf]  ;;  %v11887_v59 = vld [vmem:[%s12112_s7 + $0x40] sm:$0xf]  ;;  %v1492_v43 = vsel %vm12434_vm7, %v1490_v37, %v1491_v46  ;;  %v13030_v58 = vcombine.low %v12348_v52, %v12353_v62 }
  0xac   : > { %10481 = vmatprep.mubr.msk.bf16.mxu0 %vm947_vm3, %v12916_v18  ;;  %15448 = vst [vmem:[#allocation85_spill] sm:$0xff] %v13002_v31  ;;  %15449 = vst [vmem:[#allocation86_spill] sm:$0xff] %v13006_v14  ;;  %v8921_v19 = vrot.slane %v12819_v3, 9  ;;  %v11888_v54 = vld [vmem:[%s12112_s7 + $0x48] sm:$0xf]  ;;  %v15452_v3 = vld [vmem:[#allocation18_spill] sm:$0xff] }
  0xad   : > { %15451 = vst [vmem:[#allocation88_spill] sm:$0xff] %v13030_v58  ;;  %v15453_v41 = vld [vmem:[#allocation16_spill] sm:$0xff]  ;;  %v11889_v33 = vld [vmem:[%s12067_s25 + $0x2c] sm:$0x1]  ;;  %v15456_v34 = vld [vmem:[#allocation38_spill] sm:$0xff]  ;;  %v15458_v37 = vrot.slane %v12848_v49, 2 }
  0xae   : > { %v13034_v56 = vcombine.low %v15453_v41, %v15452_v3  ;;  %v1498_v28 = vrot.slane %v11889_v33, 5  ;;  %v15455_v62 = vld [vmem:[#allocation39_spill] sm:$0xff]  ;;  %v15460_v3 = vld [vmem:[#allocation45_spill] sm:$0xff]  ;;  %v11891_v33 = vld [vmem:[%s12067_s25 + $0x34] sm:$0xf]  ;;  %v3721_v13 = vshrl.u32 %v12644_v20, 16 }
  0xaf   : > { %v13045_v45 = vcombine.low %v15456_v34, %v15455_v62  ;;  %v13050_v46 = vsel %vm996_vm0, %v15458_v37, 0  ;;  %v15461_v41 = vld [vmem:[#allocation47_spill] sm:$0xff]  ;;  %v1502_v37 = vrot.slane %v11891_v33, 5  ;;  %v11892_v52 = vld [vmem:[%s12067_s25 + $0x38] sm:$0x1] }
  0xb0   : > { %15454 = vst [vmem:[#allocation18_spill] sm:$0xff] %v13034_v56  ;;  %v13063_v49 = vcombine.low %v15461_v41, %v15460_v3  ;;  %v13068_v15 = vld [vmem:[%s12067_s25 + $0x3c] sm:$0xf]  ;;  %v13085_v33 = vld [vmem:[%s12067_s25 + $0x44] sm:$0x1]  ;;  %v15465_v18 = vld [vmem:[#allocation55_spill] sm:$0xff] }
  0xb1   : > { %15457 = vst [vmem:[#allocation16_spill] sm:$0xff] %v13045_v45 }
  0xb2   : > { %10024 = vmatmul.mubr.msk.bf16.gmra.mrb[12].mxu1 %vm947_vm3, %v12942_v1  ;;  %15462 = vst [vmem:[#allocation38_spill] sm:$0xff] %v13063_v49  ;;  %v13103_v1 = vld [vmem:[%s12067_s25 + $0x4c] sm:$0xf] }
  0xb3   : > { %10482 = vmatmul.mubr.msk.bf16.gmra.mrb[28].mxu0 %vm947_vm3, %v12944_v22  ;;  %10027 = vmatprep.mubr.msk.bf16.mxu1 %vm947_vm3, %v12948_v44  ;;  %v12998_v22 = vcombine.low %v11886_v23, %v11887_v59  ;;  %v13055_v59 = vcombine.low %v1489_v32, %v1492_v43  ;;  %v8932_v32 = vrot.slane %v12578_v57, 9  ;;  %v13081_v43 = vld [vmem:[%s12067_s25 + $0x40] sm:$0xf] }
  0xb4   : > { %10487 = vmatprep.mubr.msk.bf16.mxu0 %vm947_vm3, %v12952_v10  ;;  %v12994_v10 = vcombine.low %v11884_v53, %v11885_v36  ;;  %v13019_v53 = vcombine.low %v11888_v54, %v12284_v39  ;;  %v1497_v39 = vrot.slane %v1495_v29, 4  ;;  %v11890_v36 = vld [vmem:[%s12067_s25 + $0x30] sm:$0xf]  ;;  %v13059_v54 = vsel %vm12434_vm7, %v8921_v19, %v1495_v29 }
  0xb5   : > { %15447 = vst [vmem:[#allocation84_spill] sm:$0xff] %v12998_v22  ;;  %v8922_v23 = vrot.slane %v11890_v36, 9  ;;  %15459 = vst [vmem:[#allocation39_spill] sm:$0xff] %v13055_v59  ;;  %v1505_v36 = vrot.slane %v11892_v52, 5  ;;  %v1572_v29 = vrot.slane %v12589_v27, 5  ;;  %v8933_v52 = vrot.slane %v12602_v35, 9 }
  0xb6   : > { %15446 = vst [vmem:[#allocation83_spill] sm:$0xff] %v12994_v10  ;;  %15450 = vst [vmem:[#allocation87_spill] sm:$0xff] %v13019_v53  ;;  %v13078_v19 = vsel %vm12434_vm7, %v1497_v39, %v1498_v28  ;;  %v15467_v28 = vld [vmem:[#allocation31_spill] sm:$0xff] }
  0xb7   : > { %v13094_v57 = vsel %vm12434_vm7, %v8922_v23, %v1502_v37  ;;  %v1573_v27 = vsel %vm12434_vm7, %v8932_v32, %v1572_v29  ;;  %v1574_v39 = vrot.slane %v1572_v29, 4  ;;  %v1575_v6 = vrot.slane %v15467_v28, 5 }
  0xb8   : > { %v3724_v32 = vshll.u32 %v12644_v20, 16  ;;  %v3734_v20 = vshrl.u32 %v12651_v51, 16 }
  0xb9   : > { %v1576_v23 = vsel %vm12434_vm7, %v1574_v39, %v1575_v6  ;;  %v3723_v6 = vrot.slane %v3721_v13, 4  ;;  %v15470_v39 = vld [vmem:[#allocation36_spill] sm:$0xff] }
  0xba   : > { %10028 = vmatmul.mubr.msk.bf16.gmra.mrb[16].mxu1 %vm947_vm3, %v12968_v48  ;;  %v1579_v48 = vrot.slane %v12621_v25, 5  ;;  %v3726_v29 = vrot.slane %v3724_v32, 5  ;;  %v3740_v28 = vshll.u32 %v15470_v39, 16  ;;  %v3736_v32 = vrot.slane %v3734_v20, 4 }
  0xbb   : > { %10488 = vmatmul.mubr.msk.bf16.vlgmr.msra.gmra.mrb[0].mxu0 %vm947_vm3, %v12979_v21  ;;  %10031 = vmatprep.mubr.msk.bf16.mxu1 %vm947_vm3, %v12985_v17  ;;  %v15464_v21 = vld [vmem:[#allocation54_spill] sm:$0xff]  ;;  %v1504_v17 = vrot.slane %v1502_v37, 4  ;;  %v13112_v37 = vcombine.low %v1573_v27, %v1576_v23  ;;  %v3745_v27 = vshrl.u32 %v15456_v34, 16  ;;  %v3748_v23 = vshll.u32 %v15456_v34, 16 }
  0xbc   : > { %10520 = vmatpush3.bf16.msra.mxu0 %v5494_v26  ;;  %10491 = vmatprep.mubr.msk.bf16.mxu0 %vm947_vm3, %v12994_v10  ;;  %v15463_v10 = vrot.slane %v12975_v5, 2  ;;  %v15468_v26 = vld [vmem:[#allocation33_spill] sm:$0xff]  ;;  %v1580_v35 = vsel %vm12434_vm7, %v8933_v52, %v1579_v48  ;;  %v1581_v25 = vrot.slane %v1579_v48, 4  ;;  %v3772_v20 = vshll.u32 %v12695_v24, 16 }
  0xbd   : > { %v1582_v44 = vrot.slane %v15468_v26, 5  ;;  %15469 = vst [vmem:[#allocation47_spill] sm:$0xff] %v13112_v37  ;;  %v3730_v26 = vshll.u32 %v12651_v51, 16  ;;  %v13131_v40 = vsel %vm12434_vm7, %v1504_v17, %v1505_v36  ;;  %v3727_v51 = vor.u32 %v3726_v29, %v3723_v6 }
  0xbe   : > { %11745 = vmatprep.subr.msk.bf16.mxu0 %vm996_vm0, %v15463_v10  ;;  %v13090_v10 = vcombine.low %v15465_v18, %v15464_v21  ;;  %v3747_v39 = vrot.slane %v3745_v27, 4  ;;  %v3769_v17 = vshrl.u32 %v12695_v24, 16  ;;  %v3782_v24 = vshrl.u32 %v12706_v8, 16 }
  0xbf   : > { %v1583_v48 = vsel %vm12434_vm7, %v1581_v25, %v1582_v44  ;;  %v3732_v52 = vrot.slane %v3730_v26, 5  ;;  %v3728_v44 = vrot.slane %v3727_v51, 4  ;;  %v3742_v26 = vrot.slane %v3740_v28, 5 }
  0xc0   : > { %15466 = vst [vmem:[#allocation45_spill] sm:$0xff] %v13090_v10  ;;  %v13133_v13 = vcombine.low %v1580_v35, %v1583_v48  ;;  %v3771_v28 = vrot.slane %v3769_v17, 4 }
  0xc1   : > { %v3737_v25 = vor.u32 %v3736_v32, %v3732_v52  ;;  %v3733_v35 = vsel %vm12087_vm4, %v3728_v44, %v3732_v52  ;;  %v3784_v32 = vrot.slane %v3782_v24, 4  ;;  %v3793_v44 = vshrl.u32 %v15461_v41, 16 }
  0xc2   : > { %10032 = vmatmul.mubr.msk.bf16.gmra.mrb[20].mxu1 %vm947_vm3, %v12990_v55  ;;  %15471 = vst [vmem:[#allocation54_spill] sm:$0xff] %v13133_v13  ;;  %v15472_v55 = vld [vmem:[#allocation41_spill] sm:$0xff] }
  0xc3   : > { %10492 = vmatmul.mubr.msk.bf16.gmra.mrb[4].mxu0 %vm947_vm3, %v12998_v22  ;;  %10035 = vmatprep.mubr.msk.bf16.mxu1 %vm947_vm3, %v13002_v31  ;;  %v3750_v22 = vrot.slane %v3748_v23, 5  ;;  %v3758_v31 = vshrl.u32 %v15455_v62, 16  ;;  %v3764_v38 = vshll.u32 %v15472_v55, 16  ;;  %v3738_v6 = vrot.slane %v3737_v25, 4 }
  0xc4   : > { %10495 = vmatprep.mubr.msk.bf16.mxu0 %vm947_vm3, %v13019_v53  ;;  %v3754_v53 = vshll.u32 %v15455_v62, 16  ;;  %v3778_v55 = vshll.u32 %v12706_v8, 16  ;;  %v3796_v25 = vshll.u32 %v15461_v41, 16  ;;  %v3817_v41 = vshrl.u32 %v12762_v47, 16 }
  0xc5   : > { %v3751_v34 = vor.u32 %v3750_v22, %v3747_v39  ;;  %v3760_v5 = vrot.slane %v3758_v31, 4  ;;  %v3766_v29 = vrot.slane %v3764_v38, 5  ;;  %v3743_v22 = vsel %vm12087_vm4, %v3738_v6, %v3742_v26  ;;  %v15474_v31 = vld [vmem:[#allocation43_spill] sm:$0xff] }
  0xc6   : > { %v3756_v37 = vrot.slane %v3754_v53, 5  ;;  %v3774_v38 = vrot.slane %v3772_v20, 5  ;;  %v3788_v53 = vshll.u32 %v15474_v31, 16  ;;  %v3780_v23 = vrot.slane %v3778_v55, 5 }
  0xc7   : > { %v3752_v62 = vrot.slane %v3751_v34, 4  ;;  %v3802_v26 = vshll.u32 %v15460_v3, 16  ;;  %v3806_v34 = vshrl.u32 %v15460_v3, 16  ;;  %v3795_v6 = vrot.slane %v3793_v44, 4 }
  0xc8   : > { %v3761_v48 = vor.u32 %v3760_v5, %v3756_v37  ;;  %v13155_v5 = vcombine.low %v3733_v35, %v3743_v22  ;;  %v3775_v51 = vor.u32 %v3774_v38, %v3771_v28  ;;  %v3790_v39 = vrot.slane %v3788_v53, 5  ;;  %v15477_v28 = vld [vmem:[#allocation48_spill] sm:$0xff] }
  0xc9   : > { %v3757_v52 = vsel %vm12087_vm4, %v3752_v62, %v3756_v37  ;;  %v3785_v37 = vor.u32 %v3784_v32, %v3780_v23  ;;  %v3798_v20 = vrot.slane %v3796_v25, 5  ;;  %v3804_v62 = vrot.slane %v3802_v26, 5 }
  0xca   : > { %10036 = vmatmul.mubr.msk.bf16.gmra.mrb[24].mxu1 %vm947_vm3, %v13006_v14  ;;  %15475 = vst [vmem:[#allocation55_spill] sm:$0xff] %v13155_v5  ;;  %v3762_v27 = vrot.slane %v3761_v48, 4  ;;  %v3776_v35 = vrot.slane %v3775_v51, 4  ;;  %v3808_v48 = vrot.slane %v3806_v34, 4  ;;  %v3812_v55 = vshll.u32 %v15477_v28, 16 }
  0xcb   : > { %10496 = vmatmul.mubr.msk.bf16.gmra.mrb[8].mxu0 %vm947_vm3, %v13030_v58  ;;  %10039 = vmatprep.mubr.msk.bf16.mxu1 %vm947_vm3, %v12862_v16  ;;  %v3820_v38 = vshll.u32 %v12762_v47, 16  ;;  %v3799_v3 = vor.u32 %v3798_v20, %v3795_v6  ;;  %v3826_v53 = vshll.u32 %v12737_v61, 16  ;;  %v3819_v47 = vrot.slane %v3817_v41, 4 }
  0xcc   : > { %10499 = vmatprep.mubr.msk.bf16.mxu0 %vm947_vm3, %v13034_v56  ;;  %v3767_v8 = vsel %vm12087_vm4, %v3762_v27, %v3766_v29  ;;  %v3781_v22 = vsel %vm12087_vm4, %v3776_v35, %v3780_v23  ;;  %v3786_v29 = vrot.slane %v3785_v37, 4  ;;  %v3809_v24 = vor.u32 %v3808_v48, %v3804_v62  ;;  %v13645_v56 = vld [vmem:[%s13572_s26 + $0x34] sm:$0xf] }
  0xcd   : > { %v13165_v17 = vcombine.low %v3757_v52, %v3767_v8  ;;  %v3814_v31 = vrot.slane %v3812_v55, 5  ;;  %v15478_v52 = vcombine.low %v13010_v30, %v13014_v12  ;;  %v3822_v23 = vrot.slane %v3820_v38, 5  ;;  %v15480_v30 = vld [vmem:[#allocation50_spill] sm:$0xff]  ;;  %15570 = vst [vmem:[#allocation104_spill] sm:$0xff] %v13645_v56 }
  0xce   : > { %v3791_v27 = vsel %vm12087_vm4, %v3786_v29, %v3790_v39  ;;  %v3830_v51 = vshrl.u32 %v12737_v61, 16  ;;  %v3800_v44 = vrot.slane %v3799_v3, 4  ;;  %v3810_v8 = vrot.slane %v3809_v24, 4  ;;  %v15482_v24 = vld [vmem:[#allocation56_spill] sm:$0xff] }
  0xcf   : > { %15476 = vst [vmem:[#allocation31_spill] sm:$0xff] %v13165_v17  ;;  %v13186_v32 = vcombine.low %v3781_v22, %v3791_v27  ;;  %v3828_v25 = vrot.slane %v3826_v53, 5  ;;  %v3823_v26 = vor.u32 %v3822_v23, %v3819_v47  ;;  %v3836_v12 = vshll.u32 %v15480_v30, 16  ;;  %v13208_v53 = vld [vmem:[%s15071_s3 + $0x8] sm:$0x3] }
  0xd0   : > { %v3832_v34 = vrot.slane %v3830_v51, 4  ;;  %v3841_v35 = vshrl.u32 %v15465_v18, 16  ;;  %v3805_v39 = vsel %vm12087_vm4, %v3800_v44, %v3804_v62  ;;  %v3815_v61 = vsel %vm12087_vm4, %v3810_v8, %v3814_v31 }
  0xd1   : > { %15479 = vst [vmem:[#allocation33_spill] sm:$0xff] %v13186_v32  ;;  %v3844_v37 = vshll.u32 %v15465_v18, 16  ;;  %v3850_v6 = vshll.u32 %v15464_v21, 16  ;;  %v13196_v20 = vcombine.low %v3805_v39, %v3815_v61  ;;  %v3824_v48 = vrot.slane %v3823_v26, 4 }
  0xd2   : > { %10040 = vmatmul.mubr.msk.bf16.gmra.mrb[28].mxu1 %vm947_vm3, %v12872_v50  ;;  %v3833_v28 = vor.u32 %v3832_v34, %v3828_v25  ;;  %v3838_v55 = vrot.slane %v3836_v12, 5  ;;  %v3843_v22 = vrot.slane %v3841_v35, 4  ;;  %v3854_v38 = vshrl.u32 %v15464_v21, 16  ;;  %v15485_v12 = vld [vmem:[#allocation58_spill] sm:$0xff] }
  0xd3   : > { %10500 = vmatmul.mubr.msk.bf16.gmra.mrb[12].mxu0 %vm947_vm3, %v12876_v2  ;;  %10045 = vmatprep.mubr.msk.bf16.mxu1 %vm947_vm3, %v15478_v52  ;;  %15481 = vst [vmem:[#allocation36_spill] sm:$0xff] %v13196_v20  ;;  %v3846_v29 = vrot.slane %v3844_v37, 5  ;;  %v3852_v41 = vrot.slane %v3850_v6, 5  ;;  %v3829_v62 = vsel %vm12087_vm4, %v3824_v48, %v3828_v25  ;;  %v3860_v31 = vshll.u32 %v15482_v24, 16  ;;  %v13642_v2 = vld [vmem:[%s13572_s26 + $0x30] sm:$0xf] }
  0xd4   : > { %10503 = vmatprep.mubr.msk.bf16.mxu0 %vm947_vm3, %v13045_v45  ;;  %v3834_v3 = vrot.slane %v3833_v28, 4  ;;  %v3865_v18 = vshrl.u32 %v12830_v42, 16  ;;  %v3856_v27 = vrot.slane %v3854_v38, 4  ;;  %v3868_v21 = vshll.u32 %v12830_v42, 16  ;;  %15569 = vst [vmem:[#allocation103_spill] sm:$0xff] %v13642_v2 }
  0xd5   : > { %v3847_v52 = vor.u32 %v3846_v29, %v3843_v22  ;;  %v3874_v47 = vshll.u32 %v12794_v63, 16  ;;  %v3862_v51 = vrot.slane %v3860_v31, 5  ;;  %v3878_v8 = vshrl.u32 %v12794_v63, 16 }
  0xd6   : > { %v3839_v23 = vsel %vm12087_vm4, %v3834_v3, %v3838_v55  ;;  %v3867_v44 = vrot.slane %v3865_v18, 4  ;;  %v3857_v25 = vor.u32 %v3856_v27, %v3852_v41  ;;  %v3870_v26 = vrot.slane %v3868_v21, 5 }
  0xd7   : > { %v13222_v42 = vcombine.low %v3829_v62, %v3839_v23  ;;  %v13226_v34 = vcombine.low %v13059_v54, %v13078_v19  ;;  %v3876_v63 = vrot.slane %v3874_v47, 5  ;;  %v3880_v30 = vrot.slane %v3878_v8, 4  ;;  %v11897_v19 = vld [vmem:[%s12067_s25 + $0x48] sm:$0xf]  ;;  %v11898_v62 = vld [vmem:[%s12067_s25 + $0x50] sm:$0x1] }
  0xd8   : > { %v3884_v35 = vshll.u32 %v15485_v12, 16  ;;  %v15486_v39 = vrot.slane %v13081_v43, 5  ;;  %v3858_v6 = vrot.slane %v3857_v25, 4  ;;  %v3871_v48 = vor.u32 %v3870_v26, %v3867_v44 }
  0xd9   : > { %15483 = vst [vmem:[#allocation41_spill] sm:$0xff] %v13222_v42  ;;  %15484 = vst [vmem:[#allocation4_spill] sm:$0xff] %v13226_v34  ;;  %v13237_v54 = vcombine.low %v13094_v57, %v13131_v40  ;;  %v8924_v28 = vrot.slane %v11897_v19, 9  ;;  %v3881_v55 = vor.u32 %v3880_v30, %v3876_v63  ;;  %v15488_v29 = vrot.slane %v13103_v1, 5  ;;  %v11899_v40 = vld [vmem:[%s12067_s25 + $0x58] sm:$0xf] }
  0xda   : > { %10046 = vmatmul.mubr.msk.bf16.vlgmr.msra.gmra.mrb[0].mxu1 %vm947_vm3, %v12914_v60  ;;  %v1511_v61 = vrot.slane %v15486_v39, 4  ;;  %v3886_v22 = vrot.slane %v3884_v35, 5  ;;  %v1519_v3 = vrot.slane %v11898_v62, 5  ;;  %v3863_v24 = vsel %vm12087_vm4, %v3858_v6, %v3862_v51  ;;  %v11902_v35 = vld [vmem:[%s12067_s25 + $0x5c] sm:$0x1] }
  0xdb   : > { %10078 = vmatpush3.bf16.msra.mxu1 %v13050_v46  ;;  %10504 = vmatmul.mubr.msk.bf16.gmra.mrb[16].mxu0 %vm947_vm3, %v12895_v7  ;;  %v3848_v46 = vrot.slane %v3847_v52, 4  ;;  %15487 = vst [vmem:[#allocation43_spill] sm:$0xff] %v13237_v54  ;;  %v1518_v38 = vrot.slane %v15488_v29, 4  ;;  %v3882_v18 = vrot.slane %v3881_v55, 4  ;;  %v1523_v57 = vrot.slane %v11899_v40, 5 }
  0xdc   : > { %10049 = vmatprep.mubr.msk.bf16.mxu1 %vm947_vm3, %v13055_v59  ;;  %10507 = vmatprep.mubr.msk.bf16.mxu0 %vm947_vm3, %v13063_v49  ;;  %v15490_v27 = vmov %v15486_v39  ;;  %v15491_v21 = vrot.slane %v13068_v15, 9  ;;  %v15492_v23 = vrot.slane %v13085_v33, 5  ;;  %v15493_v8 = vmov %v15488_v29  ;;  %v11900_v33 = vld [vmem:[%s12067_s25 + $0x64] sm:$0xf]  ;;  %v11903_v6 = vld [vmem:[%s12067_s25 + $0x60] sm:$0xf] }
  0xdd   : > { %11731 = vmatprep.subr.msk.bf16.mxu1 %vm996_vm0, %v13208_v53  ;;  %v3853_v37 = vsel %vm12087_vm4, %v3848_v46, %v3852_v41  ;;  %v3872_v41 = vrot.slane %v3871_v48, 4  ;;  %v3887_v44 = vsel %vm12087_vm4, %v3882_v18, %v3886_v22  ;;  %v1517_v15 = vsel %vm12434_vm7, %v8924_v28, %v15493_v8  ;;  %v11904_v28 = vld [vmem:[%s12067_s25 + $0x68] sm:$0x1]  ;;  %v13301_v62 = vld [vmem:[%s12112_s7 + $0xd0] sm:$0xf] }
  0xde   : > { %v13245_v31 = vcombine.low %v3853_v37, %v3863_v24  ;;  %v1510_v47 = vsel %vm12434_vm7, %v15491_v21, %v15490_v27  ;;  %v1513_v51 = vsel %vm12434_vm7, %v1511_v61, %v15492_v23  ;;  %v1520_v43 = vsel %vm12434_vm7, %v1518_v38, %v1519_v3  ;;  %v15497_v61 = vld [vmem:[#allocation62_spill] sm:$0xff]  ;;  %v13298_v38 = vld [vmem:[%s12112_s7 + $0xcc] sm:$0xf]  ;;  %v11905_v3 = vld [vmem:[%s12067_s25 + $0x70] sm:$0xf] }
  0xdf   : > { %v3877_v52 = vsel %vm12087_vm4, %v3872_v41, %v3876_v63  ;;  %v1530_v46 = vrot.slane %v11900_v33, 5  ;;  %v13279_v26 = vcombine.low %v1510_v47, %v1513_v51  ;;  %v11901_v63 = vld [vmem:[%s12067_s25 + $0x54] sm:$0xf]  ;;  %v1525_v12 = vrot.slane %v1523_v57, 4  ;;  %v11906_v40 = vld [vmem:[%s12067_s25 + $0x7c] sm:$0xf] }
  0xe0   : > { %15489 = vst [vmem:[#allocation48_spill] sm:$0xff] %v13245_v31  ;;  %v13277_v25 = vcombine.low %v3877_v52, %v3887_v44  ;;  %v8925_v30 = vrot.slane %v11901_v63, 9  ;;  %v1526_v1 = vrot.slane %v11902_v35, 5  ;;  %v13283_v39 = vcombine.low %v1517_v15, %v1520_v43  ;;  %v13321_v47 = vld [vmem:[%s12112_s7 + $0xd4] sm:$0x1] }
  0xe1   : > { %15495 = vst [vmem:[#allocation56_spill] sm:$0xff] %v13279_v26  ;;  %v13287_v37 = vcombine.low %v12888_v9, %v15497_v61  ;;  %v8926_v48 = vrot.slane %v11903_v6, 9  ;;  %v1532_v19 = vrot.slane %v1530_v46, 4  ;;  %v1533_v55 = vrot.slane %v11904_v28, 5  ;;  %v11907_v23 = vld [vmem:[%s12067_s25 + $0x6c] sm:$0xf] }
  0xe2   : > { %10050 = vmatmul.mubr.msk.bf16.gmra.mrb[4].mxu1 %vm947_vm3, %v13226_v34  ;;  %15494 = vst [vmem:[#allocation50_spill] sm:$0xff] %v13277_v25  ;;  %15496 = vst [vmem:[#allocation58_spill] sm:$0xff] %v13283_v39  ;;  %v1524_v22 = vsel %vm12434_vm7, %v8925_v30, %v1523_v57  ;;  %v1527_v29 = vsel %vm12434_vm7, %v1525_v12, %v1526_v1  ;;  %v1537_v24 = vrot.slane %v11905_v3, 5  ;;  %v1544_v57 = vrot.slane %v11906_v40, 5  ;;  %v11909_v30 = vld [vmem:[%s12067_s25 + $0x78] sm:$0xf] }
  0xe3   : > { %10508 = vmatmul.mubr.msk.bf16.gmra.mrb[20].mxu0 %vm947_vm3, %v12922_v4  ;;  %10053 = vmatprep.mubr.msk.bf16.mxu1 %vm947_vm3, %v13237_v54  ;;  %15498 = vst [vmem:[#allocation62_spill] sm:$0xff] %v13287_v37  ;;  %v1531_v41 = vsel %vm12434_vm7, %v8926_v48, %v1530_v46  ;;  %v1534_v18 = vsel %vm12434_vm7, %v1532_v19, %v1533_v55  ;;  %v5692_v52 = vrot.slane %v13301_v62, 5  ;;  %v8927_v51 = vrot.slane %v11907_v23, 9  ;;  %v11908_v46 = vld [vmem:[%s12067_s25 + $0x74] sm:$0x1] }
  0xe4   : > { %10511 = vmatprep.mubr.msk.bf16.mxu0 %vm947_vm3, %v13090_v10  ;;  %v13316_v27 = vcombine.low %v1524_v22, %v1527_v29  ;;  %v9240_v21 = vcombine.low %v13298_v38, %v13301_v62  ;;  %v9275_v44 = vrot.slane %v13298_v38, 9  ;;  %v5695_v15 = vrot.slane %v13321_v47, 5  ;;  %v11910_v1 = vld [vmem:[%s12067_s25 + $0x80] sm:$0x1]  ;;  %v11911_v29 = vld [vmem:[%s12067_s25 + $0x88] sm:$0xf] }
  0xe5   : > { %v5694_v8 = vrot.slane %v5692_v52, 4  ;;  %v13326_v43 = vcombine.low %v1531_v41, %v1534_v18  ;;  %v1539_v33 = vrot.slane %v1537_v24, 4  ;;  %v1540_v63 = vrot.slane %v11908_v46, 5  ;;  %v15501_v41 = vld [vmem:[#allocation7_spill] sm:$0xff]  ;;  %v11915_v46 = vld [vmem:[%s12067_s25 + $0x90] sm:$0xf] }
  0xe6   : > { %15499 = vst [vmem:[#allocation89_spill] sm:$0xff] %v13316_v27  ;;  %v8928_v12 = vrot.slane %v11909_v30, 9  ;;  %v1546_v35 = vrot.slane %v1544_v57, 4  ;;  %v1547_v6 = vrot.slane %v11910_v1, 5  ;;  %v13333_v48 = vsel %vm12434_vm7, %v9275_v44, %v5692_v52  ;;  %v11912_v52 = vld [vmem:[%s12067_s25 + $0x94] sm:$0xf] }
  0xe7   : > { %15500 = vst [vmem:[#allocation90_spill] sm:$0xff] %v13326_v43  ;;  %v13337_v19 = vsel %vm12434_vm7, %v5694_v8, %v5695_v15  ;;  %v1538_v55 = vsel %vm12434_vm7, %v8927_v51, %v1537_v24  ;;  %v1541_v22 = vsel %vm12434_vm7, %v1539_v33, %v1540_v63  ;;  %v1551_v3 = vrot.slane %v11911_v29, 5  ;;  %v11913_v51 = vld [vmem:[%s12067_s25 + $0x84] sm:$0xf]  ;;  %v11914_v15 = vld [vmem:[%s12067_s25 + $0x8c] sm:$0x1] }
  0xe8   : > { %v1545_v18 = vsel %vm12434_vm7, %v8928_v12, %v1544_v57  ;;  %v1548_v40 = vsel %vm12434_vm7, %v1546_v35, %v1547_v6  ;;  %v13358_v23 = vcombine.low %v1538_v55, %v1541_v22  ;;  %v8929_v44 = vrot.slane %v11913_v51, 9  ;;  %v11916_v1 = vld [vmem:[%s12067_s25 + $0x98] sm:$0x1]  ;;  %v15504_v12 = vld [vmem:[#allocation79_spill] sm:$0xff]  ;;  %v13374_v6 = vld [vmem:[%s15071_s3 + $0x24] sm:$0x3] }
  0xe9   : > { %v13360_v24 = vcombine.low %v1545_v18, %v1548_v40  ;;  %v1553_v8 = vrot.slane %v1551_v3, 4  ;;  %v1554_v33 = vrot.slane %v11914_v15, 5  ;;  %v8930_v63 = vrot.slane %v11915_v46, 9  ;;  %v15506_v55 = vld [vmem:[#allocation10_spill] sm:$0xff]  ;;  %v15507_v51 = vld [vmem:[#allocation11_spill] sm:$0xff]  ;;  %v15566_v49 = vld [vmem:[#allocation28_spill] sm:$0xff] }
  0xea   : > { %10054 = vmatmul.mubr.msk.bf16.gmra.mrb[8].mxu1 %vm947_vm3, %v13279_v26  ;;  %15502 = vst [vmem:[#allocation91_spill] sm:$0xff] %v13358_v23  ;;  %v1561_v57 = vrot.slane %v11916_v1, 5  ;;  %v15505_v29 = vrot.slane %v15504_v12, 2  ;;  %v1552_v22 = vsel %vm12434_vm7, %v8929_v44, %v1551_v3  ;;  %v11917_v40 = vld [vmem:[%s12067_s25 + $0xa0] sm:$0xf] }
  0xeb   : > { %10512 = vmatmul.mubr.msk.bf16.gmra.mrb[24].mxu0 %vm947_vm3, %v12938_v0  ;;  %10057 = vmatprep.mubr.msk.bf16.mxu1 %vm947_vm3, %v13283_v39  ;;  %15503 = vst [vmem:[#allocation92_spill] sm:$0xff] %v13360_v24  ;;  %v1555_v18 = vsel %vm12434_vm7, %v1553_v8, %v1554_v33  ;;  %v11918_v44 = vld [vmem:[%s12067_s25 + $0x9c] sm:$0xf]  ;;  %v11919_v12 = vld [vmem:[%s12067_s25 + $0xa4] sm:$0x1] }
  0xec   : > { %10515 = vmatprep.mubr.msk.bf16.mxu0 %vm947_vm3, %v13287_v37  ;;  %v5709_v35 = vsel %vm996_vm0, %v15505_v29, 0  ;;  %v13393_v1 = vcombine.low %v1552_v22, %v1555_v18  ;;  %v8931_v8 = vrot.slane %v11918_v44, 9  ;;  %v1568_v29 = vrot.slane %v11919_v12, 5  ;;  %v15513_v22 = vld [vmem:[#allocation20_spill] sm:$0xff]  ;;  %v15514_v18 = vld [vmem:[#allocation47_spill] sm:$0xff]  ;;  %v15565_v0 = vld [vmem:[#allocation26_spill] sm:$0xff] }
  0xed   : > { %v4821_v44 = vshll.u32 %v15497_v61, 16  ;;  %v2118_v12 = vsel %vm996_vm0, %v13208_v53, 0  ;;  %v15517_v37 = vld [vmem:[#allocation52_spill] sm:$0xff]  ;;  %v15518_v53 = vld [vmem:[#allocation57_spill] sm:$0xff]  ;;  %v13625_v10 = vld [vmem:[%s15071_s3 + $0x28] sm:$0x3] }
  0xee   : > { %15508 = vst [vmem:[#allocation79_spill] sm:$0xff] %v13393_v1  ;;  %v13636_v7 = vld [vmem:[%s13572_s26 + $0x28] sm:$0xf] }
  0xef   : > { %15568 = vst [vmem:[#allocation102_spill] sm:$0xff] %v13636_v7 }
  0xf2   : > { %10058 = vmatmul.mubr.msk.bf16.gmra.mrb[12].mxu1 %vm947_vm3, %v13316_v27 }
  0xf3   : > { %10516 = vmatmul.mubr.msk.bf16.gmra.mrb[28].mxu0 %vm947_vm3, %v9240_v21  ;;  %10061 = vmatprep.mubr.msk.bf16.mxu1 %vm947_vm3, %v13326_v43  ;;  %v1558_v21 = vrot.slane %v11912_v52, 5  ;;  %v1565_v52 = vrot.slane %v11917_v40, 5  ;;  %v15515_v40 = vld [vmem:[#allocation21_spill] sm:$0xff] }
  0xf4   : > { %10521 = vmatprep.mubr.msk.bf16.mxu0 %vm947_vm3, %v15501_v41 }
  0xf5   : > { %v1560_v30 = vrot.slane %v1558_v21, 4  ;;  %v1559_v15 = vsel %vm12434_vm7, %v8930_v63, %v1558_v21  ;;  %v1567_v33 = vrot.slane %v1565_v52, 4  ;;  %v1566_v21 = vsel %vm12434_vm7, %v8931_v8, %v1565_v52  ;;  %v15516_v52 = vld [vmem:[#allocation49_spill] sm:$0xff] }
  0xf6   : > { %v4825_v8 = vshrl.u32 %v15497_v61, 16  ;;  %v5466_v61 = vshll.u32 %v13298_v38, 16 }
  0xf7   : > { %v1562_v46 = vsel %vm12434_vm7, %v1560_v30, %v1561_v57  ;;  %v1569_v63 = vsel %vm12434_vm7, %v1567_v33, %v1568_v29  ;;  %v15511_v30 = vld [vmem:[#allocation15_spill] sm:$0xff] }
  0xf8   : > { %v13395_v3 = vcombine.low %v1559_v15, %v1562_v46  ;;  %v13411_v57 = vcombine.low %v1566_v21, %v1569_v63  ;;  %v4812_v15 = vshrl.u32 %v12888_v9, 16  ;;  %v4815_v46 = vshll.u32 %v12888_v9, 16  ;;  %v13436_v33 = vld [vmem:[%s15071_s3 + $0x8] ss:$0 sps:$4 sm:$0xcc]  }
  0xf9   : > { %v4823_v63 = vrot.slane %v4821_v44, 5  ;;  %v15220_v28 = vrot.slane %v13436_v33, 2  ;;  %v5463_v9 = vshrl.u32 %v13298_v38, 16  ;;  %v5468_v38 = vrot.slane %v5466_v61, 5 }
  0xfa   : > { %10062 = vmatmul.mubr.msk.bf16.gmra.mrb[16].mxu1 %vm947_vm3, %v13358_v23  ;;  %15509 = vst [vmem:[#allocation93_spill] sm:$0xff] %v13395_v3  ;;  %15512 = vst [vmem:[#allocation94_spill] sm:$0xff] %v13411_v57  ;;  %v4814_v29 = vrot.slane %v4812_v15, 4  ;;  %v4817_v21 = vrot.slane %v4815_v46, 5  ;;  %v5472_v15 = vshll.u32 %v13301_v62, 16 }
  0xfb   : > { %10522 = vmatmul.mubr.msk.bf16.vlgmr.msra.gmra.mrb[0].mxu0 %vm947_vm3, %v15506_v55  ;;  %10065 = vmatprep.mubr.msk.bf16.mxu1 %vm947_vm3, %v13360_v24  ;;  %v13607_v55 = vld [vmem:[%s13572_s26 + $0x1c] sm:$0xf] }
  0xfc   : > { %10554 = vmatpush3.bf16.msra.mxu0 %v5709_v35  ;;  %10525 = vmatprep.mubr.msk.bf16.mxu0 %vm947_vm3, %v15507_v51  ;;  %v15510_v35 = vld [vmem:[#allocation14_spill] sm:$0xff]  ;;  %v4818_v46 = vor.u32 %v4817_v21, %v4814_v29  ;;  %v15520_v51 = vld [vmem:[#allocation60_spill] sm:$0xff]  ;;  %15562 = vst [vmem:[#allocation98_spill] sm:$0xff] %v13607_v55 }
  0xfd   : > { %11746 = vmatprep.subr.msk.bf16.mxu0 %vm996_vm0, %v13374_v6 }
 0x102   : > { %10066 = vmatmul.mubr.msk.bf16.gmra.mrb[20].mxu1 %vm947_vm3, %v13393_v1 }
 0x103   : > { %10526 = vmatmul.mubr.msk.bf16.gmra.mrb[4].mxu0 %vm947_vm3, %v15510_v35  ;;  %10069 = vmatprep.mubr.msk.bf16.mxu1 %vm947_vm3, %v13395_v3 }
 0x104   : > { %10529 = vmatprep.mubr.msk.bf16.mxu0 %vm947_vm3, %v15511_v30 }
 0x10a   : > { %10070 = vmatmul.mubr.msk.bf16.gmra.mrb[24].mxu1 %vm947_vm3, %v13411_v57 }
 0x10b   : > { %10530 = vmatmul.mubr.msk.bf16.gmra.mrb[8].mxu0 %vm947_vm3, %v15513_v22  ;;  %10073 = vmatprep.mubr.msk.bf16.mxu1 %vm947_vm3, %v15514_v18  ;;  %v4819_v22 = vrot.slane %v4818_v46, 4 }
 0x10c   : > { %10533 = vmatprep.mubr.msk.bf16.mxu0 %vm947_vm3, %v15515_v40 }
 0x112   : > { %10074 = vmatmul.mubr.msk.bf16.gmra.mrb[28].mxu1 %vm947_vm3, %v13133_v13 }
 0x113   : > { %10534 = vmatmul.mubr.msk.bf16.gmra.mrb[12].mxu0 %vm947_vm3, %v13155_v5  ;;  %10079 = vmatprep.mubr.msk.bf16.mxu1 %vm947_vm3, %v15516_v52  ;;  %v4827_v52 = vrot.slane %v4825_v8, 4  ;;  %v15519_v8 = vld [vmem:[#allocation66_spill] sm:$0xff]  ;;  %v5474_v5 = vrot.slane %v5472_v15, 5 }
 0x114   : > { %10537 = vmatprep.mubr.msk.bf16.mxu0 %vm947_vm3, %v13165_v17  ;;  %v5476_v17 = vshrl.u32 %v13301_v62, 16  ;;  %v15521_v62 = vld [vmem:[#allocation68_spill] sm:$0xff] }
 0x115   : > { %v4828_v44 = vor.u32 %v4827_v52, %v4823_v63  ;;  %v5482_v52 = vshll.u32 %v13321_v47, 16 }
 0x116   : > { %v5478_v40 = vrot.slane %v5476_v17, 4  ;;  %v4824_v17 = vsel %vm12087_vm4, %v4819_v22, %v4823_v63  ;;  %v15525_v22 = vld [vmem:[#allocation76_spill] sm:$0xff] }
 0x117   : > { %v4829_v30 = vrot.slane %v4828_v44, 4  ;;  %v5484_v44 = vrot.slane %v5482_v52, 5  ;;  %v15527_v63 = vld [vmem:[#allocation24_spill] sm:$0xff]  ;;  %v15530_v52 = vld [vmem:[#allocation82_spill] sm:$0xff] }
 0x118   : > { %v5479_v21 = vor.u32 %v5478_v40, %v5474_v5  ;;  %v15526_v40 = vld [vmem:[#allocation78_spill] sm:$0xff] }
 0x11a   : > { %10080 = vmatmul.mubr.msk.bf16.vlgmr.msra.gmra.mrb[0].mxu1 %vm947_vm3, %v15517_v37  ;;  %v5480_v46 = vrot.slane %v5479_v21, 4  ;;  %v15529_v21 = vld [vmem:[#allocation27_spill] sm:$0xff] }
 0x11b   : > { %10112 = vmatpush3.bf16.msra.mxu1 %v2118_v12  ;;  %10538 = vmatmul.mubr.msk.bf16.gmra.mrb[16].mxu0 %vm947_vm3, %v13186_v32  ;;  %v4831_v12 = vshll.u32 %v15519_v8, 16  ;;  %v5465_v32 = vrot.slane %v5463_v9, 4  ;;  %v15523_v8 = vld [vmem:[#allocation70_spill] sm:$0xff] }
 0x11c   : > { %10083 = vmatprep.mubr.msk.bf16.mxu1 %vm947_vm3, %v15518_v53  ;;  %10541 = vmatprep.mubr.msk.bf16.mxu0 %vm947_vm3, %v13196_v20  ;;  %v13604_v20 = vld [vmem:[%s13572_s26 + $0x18] sm:$0xf] }
 0x11d   : > { %11732 = vmatprep.subr.msk.bf16.mxu1 %vm996_vm0, %v15220_v28  ;;  %v4833_v35 = vrot.slane %v4831_v12, 5  ;;  %v5469_v29 = vor.u32 %v5468_v38, %v5465_v32  ;;  %v15524_v32 = vld [vmem:[#allocation74_spill] sm:$0xff]  ;;  %v15540_v28 = vld [vmem:[#allocation51_spill] sm:$0xff]  ;;  %15561 = vst [vmem:[#allocation97_spill] sm:$0xff] %v13604_v20 }
 0x11e   : > { %v11843_v12 = vld [vmem:[%s15071_s3 + $0x24] ss:$0 sps:$4 sm:$0xcc]  }
 0x11f   : > { %v4834_v9 = vsel %vm12087_vm4, %v4829_v30, %v4833_v35  ;;  %v5470_v15 = vrot.slane %v5469_v29, 4  ;;  %v5485_v35 = vsel %vm12087_vm4, %v5480_v46, %v5484_v44  ;;  %v6665_v38 = vrot.slane %v11843_v12, 2  ;;  %v15528_v29 = vld [vmem:[#allocation81_spill] sm:$0xff]  ;;  %v15535_v46 = vld [vmem:[#allocation40_spill] sm:$0xff]  ;;  %v13520_v44 = vld [vmem:[%s12067_s25 + $0xc0] sm:$0xf] }
 0x120   : > { %v13470_v61 = vcombine.low %v4824_v17, %v4834_v9  ;;  %v15531_v17 = vld [vmem:[#allocation29_spill] sm:$0xff]  ;;  %v15538_v12 = vld [vmem:[#allocation46_spill] sm:$0xff]  ;;  %v2090_v41 = vshll.u32 %v13520_v44, 16 }
 0x121   : > { %v5475_v47 = vsel %vm12087_vm4, %v5470_v15, %v5474_v5  ;;  %v6034_v5 = vsel %vm996_vm0, %v13374_v6, 0  ;;  %v15532_v9 = vld [vmem:[#allocation85_spill] sm:$0xff]  ;;  %v15533_v6 = vld [vmem:[#allocation32_spill] sm:$0xff]  ;;  %v15534_v15 = vld [vmem:[#allocation35_spill] sm:$0xff] }
 0x122   : > { %10084 = vmatmul.mubr.msk.bf16.gmra.mrb[4].mxu1 %vm947_vm3, %v15520_v51  ;;  %15522 = vst [vmem:[#allocation49_spill] sm:$0xff] %v13470_v61  ;;  %v9258_v30 = vcombine.low %v5475_v47, %v5485_v35  ;;  %v13523_v47 = vld [vmem:[%s12067_s25 + $0xc4] sm:$0xf]  ;;  %v15536_v35 = vld [vmem:[#allocation44_spill] sm:$0xff] }
 0x123   : > { %10542 = vmatmul.mubr.msk.bf16.gmra.mrb[20].mxu0 %vm947_vm3, %v13222_v42  ;;  %10087 = vmatprep.mubr.msk.bf16.mxu1 %vm947_vm3, %v15521_v62  ;;  %v13601_v42 = vld [vmem:[%s13572_s26 + $0x10] sm:$0xf]  ;;  %v2100_v4 = vshrl.u32 %v13523_v47, 16  ;;  %v2096_v45 = vshll.u32 %v13523_v47, 16 }
 0x124   : > { %10545 = vmatprep.mubr.msk.bf16.mxu0 %vm947_vm3, %v13245_v31  ;;  %v15557_v31 = vcombine.low %v13333_v48, %v13337_v19  ;;  %15560 = vst [vmem:[#allocation96_spill] sm:$0xff] %v13601_v42  ;;  %v6715_v19 = vsel %vm996_vm0, %v6665_v38, 0 }
 0x12a   : > { %10088 = vmatmul.mubr.msk.bf16.gmra.mrb[8].mxu1 %vm947_vm3, %v15523_v8 }
 0x12b   : > { %10546 = vmatmul.mubr.msk.bf16.gmra.mrb[24].mxu0 %vm947_vm3, %v13277_v25  ;;  %10091 = vmatprep.mubr.msk.bf16.mxu1 %vm947_vm3, %v15524_v32  ;;  %v15556_v25 = vld [vmem:[#allocation22_spill] sm:$0xff] }
 0x12c   : > { %10549 = vmatprep.mubr.msk.bf16.mxu0 %vm947_vm3, %v13470_v61  ;;  %v15541_v61 = vrot.slane %v13436_v33, 2  ;;  %v15545_v33 = vld [vmem:[#allocation59_spill] sm:$0xff] }
 0x132   : > { %10092 = vmatmul.mubr.msk.bf16.gmra.mrb[12].mxu1 %vm947_vm3, %v15525_v22  ;;  %v6263_v22 = vshll.u32 %v13601_v42, 16 }
 0x133   : > { %10550 = vmatmul.mubr.msk.bf16.gmra.mrb[28].mxu0 %vm947_vm3, %v9258_v30  ;;  %10095 = vmatprep.mubr.msk.bf16.mxu1 %vm947_vm3, %v15526_v40  ;;  %v13529_v30 = vcombine.low %v13520_v44, %v13523_v47 }
 0x134   : > { %10555 = vmatprep.mubr.msk.bf16.mxu0 %vm947_vm3, %v15527_v63 }
 0x135   : > { %15537 = vst [vmem:[#allocation66_spill] sm:$0xff] %v13529_v30 }
 0x13a   : > { %10096 = vmatmul.mubr.msk.bf16.gmra.mrb[16].mxu1 %vm947_vm3, %v15528_v29 }
 0x13b   : > { %10556 = vmatmul.mubr.msk.bf16.vlgmr.msra.gmra.mrb[0].mxu0 %vm947_vm3, %v15529_v21  ;;  %10099 = vmatprep.mubr.msk.bf16.mxu1 %vm947_vm3, %v15530_v52  ;;  %v13584_v21 = vld [vmem:[%s13572_s26 + $0x4] sm:$0xf]  ;;  %v13785_v52 = vld [vmem:[%s13572_s26 + $0x94] sm:$0xf] }
 0x13c   : > { %10588 = vmatpush3.bf16.msra.mxu0 %v6034_v5  ;;  %10559 = vmatprep.mubr.msk.bf16.mxu0 %vm947_vm3, %v15531_v17  ;;  %v15539_v5 = vld [vmem:[#allocation5_spill] sm:$0xff]  ;;  %v13581_v17 = vld [vmem:[%s13572_s26] sm:$0xf] }
 0x13d   : > { %11747 = vmatprep.subr.msk.bf16.mxu0 %vm996_vm0, %v6665_v38  ;;  %15554 = vst [vmem:[#allocation5_spill] sm:$0xff] %v13581_v17  ;;  %v9294_v63 = vcombine.low %v13581_v17, %v13584_v21  ;;  %v13633_v38 = vld [vmem:[%s13572_s26 + $0x24] sm:$0xf] }
 0x13e   : > { %15567 = vst [vmem:[#allocation101_spill] sm:$0xff] %v13633_v38  ;;  %v13651_v58 = vcombine.low %v13633_v38, %v13636_v7  ;;  %v15600_v37 = vshll.u32 %v13633_v38, 16 }
 0x140   : > { %15571 = vst [vmem:[#allocation105_spill] sm:$0xff] %v13651_v58 }
 0x142   : > { %10100 = vmatmul.mubr.msk.bf16.gmra.mrb[20].mxu1 %vm947_vm3, %v15532_v9  ;;  %v13782_v9 = vld [vmem:[%s13572_s26 + $0x90] sm:$0xf] }
 0x143   : > { %10560 = vmatmul.mubr.msk.bf16.gmra.mrb[4].mxu0 %vm947_vm3, %v15533_v6  ;;  %10103 = vmatprep.mubr.msk.bf16.mxu1 %vm947_vm3, %v13006_v14  ;;  %v15551_v6 = vld [vmem:[#allocation71_spill] sm:$0xff]  ;;  %v13774_v14 = vld [vmem:[%s13572_s26 + $0x84] sm:$0xf]  ;;  %15586 = vst [vmem:[#allocation116_spill] sm:$0xff] %v13782_v9 }
 0x144   : > { %10563 = vmatprep.mubr.msk.bf16.mxu0 %vm947_vm3, %v15534_v15  ;;  %v15547_v15 = vld [vmem:[#allocation61_spill] sm:$0xff]  ;;  %15585 = vst [vmem:[#allocation115_spill] sm:$0xff] %v13774_v14 }
 0x14a   : > { %10104 = vmatmul.mubr.msk.bf16.gmra.mrb[24].mxu1 %vm947_vm3, %v12862_v16 }
 0x14b   : > { %10564 = vmatmul.mubr.msk.bf16.gmra.mrb[8].mxu0 %vm947_vm3, %v15535_v46  ;;  %10107 = vmatprep.mubr.msk.bf16.mxu1 %vm947_vm3, %v12872_v50  ;;  %v15542_v46 = vld [vmem:[#allocation8_spill] sm:$0xff]  ;;  %v6243_v50 = vshrl.u32 %v13584_v21, 16 }
 0x14c   : > { %10567 = vmatprep.mubr.msk.bf16.mxu0 %vm947_vm3, %v15536_v35  ;;  %v2333_v35 = vsel %vm996_vm0, %v15541_v61, 0  ;;  %v15546_v61 = vld [vmem:[#allocation12_spill] sm:$0xff] }
 0x152   : > { %10108 = vmatmul.mubr.msk.bf16.gmra.mrb[28].mxu1 %vm947_vm3, %v13529_v30  ;;  %v6233_v30 = vshll.u32 %v13581_v17, 16 }
 0x153   : > { %10568 = vmatmul.mubr.msk.bf16.gmra.mrb[12].mxu0 %vm947_vm3, %v15538_v12  ;;  %10113 = vmatprep.mubr.msk.bf16.mxu1 %vm947_vm3, %v15539_v5  ;;  %v13548_v12 = vld [vmem:[%s15071_s3 + $0xc] sm:$0x3]  ;;  %v15543_v5 = vld [vmem:[#allocation53_spill] sm:$0xff] }
 0x154   : > { %10571 = vmatprep.mubr.msk.bf16.mxu0 %vm947_vm3, %v15540_v28  ;;  %v15544_v28 = vld [vmem:[#allocation9_spill] sm:$0xff] }
 0x15a   : > { %10114 = vmatmul.mubr.msk.bf16.vlgmr.msra.gmra.mrb[0].mxu1 %vm947_vm3, %v15542_v46  ;;  %v6230_v46 = vshrl.u32 %v13581_v17, 16 }
 0x15b   : > { %10146 = vmatpush3.bf16.msra.mxu1 %v2333_v35  ;;  %10572 = vmatmul.mubr.msk.bf16.gmra.mrb[16].mxu0 %vm947_vm3, %v15543_v5  ;;  %v15548_v35 = vld [vmem:[#allocation13_spill] sm:$0xff] }
 0x15c   : > { %10117 = vmatprep.mubr.msk.bf16.mxu1 %vm947_vm3, %v15544_v28  ;;  %10575 = vmatprep.mubr.msk.bf16.mxu0 %vm947_vm3, %v15545_v33  ;;  %v15549_v5 = vld [vmem:[#allocation69_spill] sm:$0xff]  ;;  %v13711_v28 = vld [vmem:[%s13572_s26 + $0x64] sm:$0xf]  ;;  %v6232_v40 = vrot.slane %v6230_v46, 4  ;;  %v13804_v46 = vcombine.low %v13782_v9, %v13785_v52 }
 0x15d   : > { %11733 = vmatprep.subr.msk.bf16.mxu1 %vm996_vm0, %v13548_v12  ;;  %v15550_v33 = vld [vmem:[#allocation17_spill] sm:$0xff] }
 0x15e   : > { %15589 = vst [vmem:[#allocation118_spill] sm:$0xff] %v13804_v46 }
 0x162   : > { %10118 = vmatmul.mubr.msk.bf16.gmra.mrb[4].mxu1 %vm947_vm3, %v15546_v61  ;;  %v15578_v61 = vld [vmem:[#allocation42_spill] sm:$0xff] }
 0x163   : > { %10576 = vmatmul.mubr.msk.bf16.gmra.mrb[20].mxu0 %vm947_vm3, %v15547_v15  ;;  %10121 = vmatprep.mubr.msk.bf16.mxu1 %vm947_vm3, %v15548_v35  ;;  %v15553_v15 = vld [vmem:[#allocation75_spill] sm:$0xff]  ;;  %v15577_v35 = vld [vmem:[#allocation37_spill] sm:$0xff] }
 0x164   : > { %10579 = vmatprep.mubr.msk.bf16.mxu0 %vm947_vm3, %v15549_v5  ;;  %v15552_v5 = vld [vmem:[#allocation19_spill] sm:$0xff]  ;;  %15555 = vst [vmem:[#allocation75_spill] sm:$0xff] %v13584_v21 }
 0x16a   : > { %10122 = vmatmul.mubr.msk.bf16.gmra.mrb[8].mxu1 %vm947_vm3, %v15550_v33 }
 0x16b   : > { %10580 = vmatmul.mubr.msk.bf16.gmra.mrb[24].mxu0 %vm947_vm3, %v15551_v6  ;;  %10125 = vmatprep.mubr.msk.bf16.mxu1 %vm947_vm3, %v15552_v5  ;;  %v15558_v6 = vld [vmem:[#allocation25_spill] sm:$0xff]  ;;  %v15574_v5 = vld [vmem:[#allocation34_spill] sm:$0xff] }
 0x16c   : > { %10583 = vmatprep.mubr.msk.bf16.mxu0 %vm947_vm3, %v15553_v15  ;;  %v13598_v15 = vld [vmem:[%s13572_s26 + $0xc] sm:$0xf] }
 0x16d   : > { %15559 = vst [vmem:[#allocation95_spill] sm:$0xff] %v13598_v15  ;;  %v13611_v48 = vcombine.low %v13598_v15, %v13601_v42  ;;  %v6254_v16 = vshrl.u32 %v13598_v15, 16 }
 0x16f   : > { %15563 = vst [vmem:[#allocation99_spill] sm:$0xff] %v13611_v48 }
 0x172   : > { %10126 = vmatmul.mubr.msk.bf16.gmra.mrb[12].mxu1 %vm947_vm3, %v15556_v25  ;;  %v15573_v25 = vld [vmem:[#allocation30_spill] sm:$0xff] }
 0x173   : > { %10584 = vmatmul.mubr.msk.bf16.gmra.mrb[28].mxu0 %vm947_vm3, %v15557_v31  ;;  %10129 = vmatprep.mubr.msk.bf16.mxu1 %vm947_vm3, %v15558_v6  ;;  %v13615_v31 = vcombine.low %v13604_v20, %v13607_v55  ;;  %v13658_v6 = vld [vmem:[%s12067_s25 + $0xc8] sm:$0x1] }
 0x174   : > { %10589 = vmatprep.mubr.msk.bf16.mxu0 %vm947_vm3, %v9294_v63  ;;  %v2087_v63 = vshrl.u32 %v13520_v44, 16 }
 0x175   : > { %15564 = vst [vmem:[#allocation100_spill] sm:$0xff] %v13615_v31 }
 0x17a   : > { %10130 = vmatmul.mubr.msk.bf16.gmra.mrb[16].mxu1 %vm947_vm3, %v15565_v0  ;;  %v2102_v0 = vrot.slane %v2100_v4, 4  ;;  %v13670_v4 = vld [vmem:[%s13572_s26 + $0x3c] sm:$0xf] }
 0x17b   : > { %10590 = vmatmul.mubr.msk.bf16.vlgmr.msra.gmra.mrb[0].mxu0 %vm947_vm3, %v13611_v48  ;;  %10133 = vmatprep.mubr.msk.bf16.mxu1 %vm947_vm3, %v15566_v49  ;;  %v2089_v49 = vrot.slane %v2087_v63, 4  ;;  %v2098_v48 = vrot.slane %v2096_v45, 5  ;;  %v2106_v45 = vshll.u32 %v13658_v6, 16 }
 0x17c   : > { %10622 = vmatpush3.bf16.msra.mxu0 %v6715_v19  ;;  %10593 = vmatprep.mubr.msk.bf16.mxu0 %vm947_vm3, %v13615_v31  ;;  %v2092_v19 = vrot.slane %v2090_v41, 5  ;;  %v13655_v31 = vcombine.low %v13642_v2, %v13645_v56  ;;  %v13673_v41 = vld [vmem:[%s13572_s26 + $0x40] sm:$0xf] }
 0x17d   : > { %11748 = vmatprep.subr.msk.bf16.mxu0 %vm996_vm0, %v13625_v10  ;;  %v2103_v33 = vor.u32 %v2102_v0, %v2098_v48  ;;  %v13683_v0 = vcombine.low %v13670_v4, %v13673_v41 }
 0x17e   : > { %15572 = vst [vmem:[#allocation106_spill] sm:$0xff] %v13655_v31  ;;  %v2093_v63 = vor.u32 %v2092_v19, %v2089_v49 }
 0x17f   : > { %15575 = vst [vmem:[#allocation107_spill] sm:$0xff] %v13683_v0  ;;  %v2104_v19 = vrot.slane %v2103_v33, 4 }
 0x180   : > { %v2094_v49 = vrot.slane %v2093_v63, 4 }
 0x182   : > { %10134 = vmatmul.mubr.msk.bf16.gmra.mrb[20].mxu1 %vm947_vm3, %v15573_v25  ;;  %v13676_v25 = vld [vmem:[%s13572_s26 + $0x48] sm:$0xf]  ;;  %v2099_v63 = vsel %vm12087_vm4, %v2094_v49, %v2098_v48  ;;  %v13732_v49 = vld [vmem:[%s13572_s26 + $0x6c] sm:$0xf] }
 0x183   : > { %10594 = vmatmul.mubr.msk.bf16.gmra.mrb[4].mxu0 %vm947_vm3, %v13651_v58  ;;  %10137 = vmatprep.mubr.msk.bf16.mxu1 %vm947_vm3, %v15574_v5  ;;  %v13679_v58 = vld [vmem:[%s13572_s26 + $0x4c] sm:$0xf]  ;;  %v2108_v5 = vrot.slane %v2106_v45, 5  ;;  %v13702_v45 = vld [vmem:[%s13572_s26 + $0x54] sm:$0xf] }
 0x184   : > { %10597 = vmatprep.mubr.msk.bf16.mxu0 %vm947_vm3, %v13655_v31  ;;  %v13687_v31 = vcombine.low %v13676_v25, %v13679_v58 }
 0x185   : > { %v2109_v33 = vsel %vm12087_vm4, %v2104_v19, %v2108_v5  ;;  %v13735_v19 = vld [vmem:[%s13572_s26 + $0x70] sm:$0xf] }
 0x186   : > { %15576 = vst [vmem:[#allocation108_spill] sm:$0xff] %v13687_v31 }
 0x18a   : > { %10138 = vmatmul.mubr.msk.bf16.gmra.mrb[24].mxu1 %vm947_vm3, %v15577_v35  ;;  %v13705_v35 = vld [vmem:[%s13572_s26 + $0x58] sm:$0xf] }
 0x18b   : > { %10598 = vmatmul.mubr.msk.bf16.gmra.mrb[8].mxu0 %vm947_vm3, %v13683_v0  ;;  %10141 = vmatprep.mubr.msk.bf16.mxu1 %vm947_vm3, %v15578_v61  ;;  %v13708_v0 = vld [vmem:[%s13572_s26 + $0x60] sm:$0xf]  ;;  %v13713_v61 = vcombine.low %v2099_v63, %v2109_v33  ;;  %v13717_v48 = vcombine.low %v13702_v45, %v13705_v35  ;;  %v13738_v63 = vld [vmem:[%s13572_s26 + $0x78] sm:$0xf]  ;;  %v13741_v33 = vld [vmem:[%s13572_s26 + $0x7c] sm:$0xf] }
 0x18c   : > { %10601 = vmatprep.mubr.msk.bf16.mxu0 %vm947_vm3, %v13687_v31  ;;  %v13721_v5 = vcombine.low %v13708_v0, %v13711_v28  ;;  %v6257_v31 = vshll.u32 %v13598_v15, 16  ;;  %v6235_v15 = vrot.slane %v6233_v30, 5  ;;  %v13807_v30 = vld [vmem:[%s13572_s26 + $0x8] sm:$0x1] }
 0x18d   : > { %15579 = vst [vmem:[#allocation109_spill] sm:$0xff] %v13713_v61  ;;  %15580 = vst [vmem:[#allocation110_spill] sm:$0xff] %v13717_v48 }
 0x18e   : > { %15581 = vst [vmem:[#allocation111_spill] sm:$0xff] %v13721_v5  ;;  %15590 = vst [vmem:[#allocation119_spill] sm:$0xff] %v13807_v30  ;;  %v6236_v51 = vor.u32 %v6235_v15, %v6232_v40  ;;  %v13848_v15 = vrot.slane %v6263_v22, 5  ;;  %v6335_v22 = vshll.u32 %v13645_v56, 16 }
 0x190   : > { %v6237_v40 = vrot.slane %v6236_v51, 4  ;;  %v6311_v51 = vshll.u32 %v13636_v7, 16 }
 0x192   : > { %10142 = vmatmul.mubr.msk.bf16.gmra.mrb[28].mxu1 %vm947_vm3, %v13713_v61  ;;  %v13746_v61 = vld [vmem:[%s15071_s3 + $0xc] ss:$0 sps:$4 sm:$0xcc]  }
 0x193   : > { %10602 = vmatmul.mubr.msk.bf16.gmra.mrb[12].mxu0 %vm947_vm3, %v13717_v48  ;;  %10147 = vmatprep.mubr.msk.bf16.mxu1 %vm947_vm3, %v12914_v60  ;;  %15582 = vst [vmem:[#allocation112_spill] sm:$0xff] %v13746_v61  ;;  %v13750_v60 = vcombine.low %v13732_v49, %v13735_v19  ;;  %v13756_v48 = vcombine.low %v13738_v63, %v13741_v33  ;;  %v15587_v29 = vrot.slane %v13746_v61, 2 }
 0x194   : > { %10605 = vmatprep.mubr.msk.bf16.mxu0 %vm947_vm3, %v13721_v5  ;;  %v2538_v5 = vsel %vm996_vm0, %v13548_v12, 0  ;;  %v6239_v12 = vshll.u32 %v13584_v21, 16  ;;  %v6245_v21 = vrot.slane %v6243_v50, 4  ;;  %v6249_v50 = vshll.u32 %v13807_v30, 16 }
 0x195   : > { %15583 = vst [vmem:[#allocation113_spill] sm:$0xff] %v13750_v60  ;;  %15584 = vst [vmem:[#allocation114_spill] sm:$0xff] %v13756_v48 }
 0x196   : > { %v13797_v17 = vrot.slane %v6239_v12, 5  ;;  %v6251_v53 = vrot.slane %v6249_v50, 5 }
 0x198   : > { %v6246_v8 = vor.u32 %v6245_v21, %v13797_v17  ;;  %v13845_v21 = vld [vmem:[%s13572_s26 + $0xac] sm:$0xf] }
 0x199   : > { %15595 = vst [vmem:[#allocation124_spill] sm:$0xff] %v13845_v21 }
 0x19a   : > { %10148 = vmatmul.mubr.msk.bf16.vlgmr.msra.gmra.mrb[0].mxu1 %vm947_vm3, %v13055_v59  ;;  %v13777_v59 = vld [vmem:[%s13572_s26 + $0x88] sm:$0xf]  ;;  %v6247_v30 = vrot.slane %v6246_v8, 4 }
 0x19b   : > { %10180 = vmatpush3.bf16.msra.mxu1 %v2538_v5  ;;  %10606 = vmatmul.mubr.msk.bf16.gmra.mrb[16].mxu0 %vm947_vm3, %v13750_v60  ;;  %v6267_v5 = vshrl.u32 %v13601_v42, 16  ;;  %v6278_v60 = vshrl.u32 %v13604_v20, 16  ;;  %v13795_v32 = vcombine.low %v13774_v14, %v13777_v59  ;;  %v6259_v42 = vrot.slane %v6257_v31, 5 }
 0x19c   : > { %10151 = vmatprep.mubr.msk.bf16.mxu1 %vm947_vm3, %v13226_v34  ;;  %10609 = vmatprep.mubr.msk.bf16.mxu0 %vm947_vm3, %v13756_v48  ;;  %v6281_v34 = vshll.u32 %v13604_v20, 16  ;;  %v6291_v48 = vshrl.u32 %v13607_v55, 16  ;;  %v13817_v20 = vld [vmem:[%s13572_s26 + $0x9c] sm:$0xf] }
 0x19d   : > { %11734 = vmatprep.subr.msk.bf16.mxu1 %vm996_vm0, %v15587_v29  ;;  %15588 = vst [vmem:[#allocation117_spill] sm:$0xff] %v13795_v32  ;;  %15591 = vst [vmem:[#allocation120_spill] sm:$0xff] %v13817_v20  ;;  %v13820_v29 = vld [vmem:[%s13572_s26 + $0xa0] sm:$0xf]  ;;  %v6269_v62 = vrot.slane %v6267_v5, 4  ;;  %v6242_v5 = vsel %vm12087_vm4, %v6237_v40, %v13797_v17  ;;  %v15599_v40 = vshrl.u32 %v13633_v38, 16 }
 0x19e   : > { %15592 = vst [vmem:[#allocation121_spill] sm:$0xff] %v13820_v29  ;;  %v13839_v12 = vcombine.low %v13817_v20, %v13820_v29  ;;  %v6283_v61 = vrot.slane %v6281_v34, 5  ;;  %v6293_v34 = vrot.slane %v6291_v48, 4  ;;  %v13871_v29 = vld [vmem:[%s13572_s26 + $0x20] sm:$0x1]  ;;  %v6252_v48 = vsel %vm12087_vm4, %v6247_v30, %v6251_v53 }
 0x19f   : > { %15598 = vst [vmem:[#allocation127_spill] sm:$0xff] %v13871_v29  ;;  %v13888_v17 = vld [vmem:[%s13572_s26 + $0xb8] sm:$0xf]  ;;  %v6304_v8 = vrot.slane %v15599_v40, 4  ;;  %v15601_v53 = vshrl.u32 %v13636_v7, 16  ;;  %v15603_v40 = vshll.u32 %v13642_v2, 16 }
 0x1a0   : > { %15593 = vst [vmem:[#allocation122_spill] sm:$0xff] %v13839_v12  ;;  %v15604_v7 = vshrl.u32 %v13645_v56, 16  ;;  %v13917_v20 = vld [vmem:[%s13572_s26 + $0x38] sm:$0x1] }
 0x1a2   : > { %10152 = vmatmul.mubr.msk.bf16.gmra.mrb[4].mxu1 %vm947_vm3, %v13237_v54  ;;  %v6287_v54 = vshll.u32 %v13607_v55, 16  ;;  %v13857_v55 = vld [vmem:[%s13572_s26 + $0x14] sm:$0x1] }
 0x1a3   : > { %10610 = vmatmul.mubr.msk.bf16.gmra.mrb[20].mxu0 %vm947_vm3, %v13795_v32  ;;  %10155 = vmatprep.mubr.msk.bf16.mxu1 %vm947_vm3, %v13279_v26  ;;  %v13842_v26 = vld [vmem:[%s13572_s26 + $0xa8] sm:$0xf]  ;;  %v6256_v32 = vrot.slane %v6254_v16, 4  ;;  %15597 = vst [vmem:[#allocation126_spill] sm:$0xff] %v13857_v55 }
 0x1a4   : > { %10613 = vmatprep.mubr.msk.bf16.mxu0 %vm947_vm3, %v13804_v46  ;;  %15594 = vst [vmem:[#allocation123_spill] sm:$0xff] %v13842_v26  ;;  %v6280_v46 = vrot.slane %v6278_v60, 4  ;;  %v13854_v16 = vcombine.low %v13842_v26, %v13845_v21  ;;  %v13862_v31 = vrot.slane %v6287_v54, 5  ;;  %v13879_v54 = vld [vmem:[%s13572_s26 + $0xb4] sm:$0xf]  ;;  %v6270_v60 = vor.u32 %v6269_v62, %v13848_v15 }
 0x1a5   : > { %v6260_v50 = vor.u32 %v6259_v42, %v6256_v32  ;;  %v6273_v42 = vshll.u32 %v13857_v55, 16  ;;  %v6317_v62 = vrot.slane %v15601_v53, 4  ;;  %v6331_v55 = vrot.slane %v15603_v40, 5 }
 0x1a6   : > { %15596 = vst [vmem:[#allocation125_spill] sm:$0xff] %v13854_v16  ;;  %v6284_v32 = vor.u32 %v6283_v61, %v6280_v46  ;;  %v6294_v30 = vor.u32 %v6293_v34, %v13862_v31  ;;  %v6297_v61 = vshll.u32 %v13871_v29, 16  ;;  %v13901_v46 = vld [vmem:[%s13572_s26 + $0x2c] sm:$0x1]  ;;  %v6341_v53 = vrot.slane %v15604_v7, 4 }
 0x1a7   : > { %v6261_v38 = vrot.slane %v6260_v50, 4  ;;  %v13914_v34 = vcombine.low %v13879_v54, %v13888_v17  ;;  %v9326_v29 = vcombine.low %v6242_v5, %v6252_v48  ;;  %v6271_v21 = vrot.slane %v6270_v60, 4 }
 0x1a8   : > { %v6275_v26 = vrot.slane %v6273_v42, 5  ;;  %v6321_v50 = vshll.u32 %v13901_v46, 16  ;;  %v6359_v7 = vshll.u32 %v13673_v41, 16  ;;  %v15607_v48 = vshll.u32 %v13670_v4, 16 }
 0x1a9   : > { %15605 = vst [vmem:[#allocation128_spill] sm:$0xff] %v13914_v34  ;;  %v6266_v60 = vsel %vm12087_vm4, %v6261_v38, %v13848_v15  ;;  %v6383_v38 = vshll.u32 %v13679_v58, 16 }
 0x1aa   : > { %10156 = vmatmul.mubr.msk.bf16.gmra.mrb[8].mxu1 %vm947_vm3, %v13283_v39  ;;  %v6355_v42 = vrot.slane %v15607_v48, 5 }
 0x1ab   : > { %10614 = vmatmul.mubr.msk.bf16.gmra.mrb[24].mxu0 %vm947_vm3, %v13839_v12  ;;  %10159 = vmatprep.mubr.msk.bf16.mxu1 %vm947_vm3, %v13316_v27  ;;  %v6307_v27 = vrot.slane %v15600_v37, 5  ;;  %v13894_v12 = vrot.slane %v6311_v51, 5  ;;  %v13908_v51 = vrot.slane %v6335_v22, 5  ;;  %v6295_v22 = vrot.slane %v6294_v30, 4 }
 0x1ac   : > { %10617 = vmatprep.mubr.msk.bf16.mxu0 %vm947_vm3, %v13854_v16  ;;  %v15602_v16 = vshrl.u32 %v13642_v2, 16  ;;  %v6299_v37 = vrot.slane %v6297_v61, 5  ;;  %v6323_v30 = vrot.slane %v6321_v50, 5  ;;  %v13946_v61 = vld [vmem:[%s13572_s26 + $0x44] sm:$0x1]  ;;  %v15610_v50 = vshll.u32 %v13676_v25, 16 }
 0x1ad   : > { %v6308_v2 = vor.u32 %v6307_v27, %v6304_v8  ;;  %v6318_v40 = vor.u32 %v6317_v62, %v13894_v12  ;;  %v6342_v27 = vor.u32 %v6341_v53, %v13908_v51  ;;  %v6345_v8 = vshll.u32 %v13917_v20, 16 }
 0x1ae   : > { %v6328_v39 = vrot.slane %v15602_v16, 4  ;;  %v6285_v16 = vrot.slane %v6284_v32, 4  ;;  %v13950_v53 = vrot.slane %v6359_v7, 5  ;;  %v13965_v7 = vrot.slane %v6383_v38, 5 }
 0x1af   : > { %v6309_v32 = vrot.slane %v6308_v2, 4  ;;  %v6319_v62 = vrot.slane %v6318_v40, 4  ;;  %v6343_v2 = vrot.slane %v6342_v27, 4  ;;  %v7136_v27 = vsel %vm996_vm0, %v13625_v10, 0 }
 0x1b0   : > { %v6332_v13 = vor.u32 %v6331_v55, %v6328_v39  ;;  %v6276_v39 = vsel %vm12087_vm4, %v6271_v21, %v6275_v26  ;;  %v15606_v55 = vshrl.u32 %v13670_v4, 16  ;;  %v6290_v15 = vsel %vm12087_vm4, %v6285_v16, %v13862_v31 }
 0x1b1   : > { %v6300_v26 = vsel %vm12087_vm4, %v6295_v22, %v6299_v37  ;;  %v6347_v31 = vrot.slane %v6345_v8, 5  ;;  %v15609_v16 = vshrl.u32 %v13676_v25, 16  ;;  %v6379_v37 = vrot.slane %v15610_v50, 5 }
 0x1b2   : > { %10160 = vmatmul.mubr.msk.bf16.gmra.mrb[12].mxu1 %vm947_vm3, %v13326_v43  ;;  %v6352_v5 = vrot.slane %v15606_v55, 4  ;;  %v6333_v21 = vrot.slane %v6332_v13, 4  ;;  %v15608_v55 = vshrl.u32 %v13673_v41, 16  ;;  %v13963_v13 = vcombine.low %v6266_v60, %v6276_v39 }
 0x1b3   : > { %10618 = vmatmul.mubr.msk.bf16.gmra.mrb[28].mxu0 %vm947_vm3, %v13914_v34  ;;  %10163 = vmatprep.mubr.msk.bf16.mxu1 %vm947_vm3, %v13358_v23  ;;  %v6376_v40 = vrot.slane %v15609_v16, 4  ;;  %v13972_v8 = vcombine.low %v6290_v15, %v6300_v26  ;;  %v6369_v16 = vshll.u32 %v13946_v61, 16  ;;  %v13976_v34 = vld [vmem:[%s13572_s26 + $0x50] sm:$0x1]  ;;  %v6314_v60 = vsel %vm12087_vm4, %v6309_v32, %v13894_v12 }
 0x1b4   : > { %10623 = vmatprep.mubr.msk.bf16.mxu0 %vm947_vm3, %v9326_v29  ;;  %v6365_v48 = vrot.slane %v15608_v55, 4  ;;  %v13957_v29 = vld [vmem:[%s15071_s3 + $0x28] ss:$0 sps:$4 sm:$0xcc]   ;;  %15611 = vst [vmem:[#allocation129_spill] sm:$0xff] %v13963_v13  ;;  %v6356_v22 = vor.u32 %v6355_v42, %v6352_v5  ;;  %v15612_v55 = vshrl.u32 %v13679_v58, 16  ;;  %v6324_v39 = vsel %vm12087_vm4, %v6319_v62, %v6323_v30 }
 0x1b5   : > { %15613 = vst [vmem:[#allocation130_spill] sm:$0xff] %v13972_v8  ;;  %v15313_v42 = vrot.slane %v13957_v29, 2  ;;  %v6338_v10 = vsel %vm12087_vm4, %v6333_v21, %v13908_v51  ;;  %v6348_v38 = vsel %vm12087_vm4, %v6343_v2, %v6347_v31  ;;  %v6380_v15 = vor.u32 %v6379_v37, %v6376_v40 }
 0x1b6   : > { %v6389_v56 = vrot.slane %v15612_v55, 4  ;;  %v6366_v5 = vor.u32 %v6365_v48, %v13950_v53  ;;  %v6407_v12 = vshll.u32 %v13705_v35, 16  ;;  %v6357_v62 = vrot.slane %v6356_v22, 4 }
 0x1b7   : > { %v6393_v26 = vshll.u32 %v13976_v34, 16  ;;  %v14003_v21 = vcombine.low %v6314_v60, %v6324_v39  ;;  %v6371_v48 = vrot.slane %v6369_v16, 5  ;;  %v6431_v2 = vshll.u32 %v13711_v28, 16 }
 0x1b8   : > { %v6390_v30 = vor.u32 %v6389_v56, %v13965_v7  ;;  %v14006_v31 = vcombine.low %v6338_v10, %v6348_v38  ;;  %v6367_v40 = vrot.slane %v6366_v5, 4  ;;  %v2316_v56 = vrot.slane %v13523_v47, 5  ;;  %v14024_v38 = vld [vmem:[%s13572_s26 + $0x5c] sm:$0x1] }
 0x1b9   : > { %15614 = vst [vmem:[#allocation131_spill] sm:$0xff] %v14003_v21  ;;  %v15616_v50 = vshrl.u32 %v13702_v45, 16  ;;  %v6381_v22 = vrot.slane %v6380_v15, 4  ;;  %v15617_v55 = vshll.u32 %v13702_v45, 16  ;;  %v14016_v16 = vrot.slane %v6407_v12, 5 }
 0x1ba   : > { %10164 = vmatmul.mubr.msk.bf16.gmra.mrb[16].mxu1 %vm947_vm3, %v13360_v24  ;;  %15615 = vst [vmem:[#allocation132_spill] sm:$0xff] %v14006_v31  ;;  %v15618_v60 = vshrl.u32 %v13705_v35, 16  ;;  %v6362_v47 = vsel %vm12087_vm4, %v6357_v62, %v13950_v53  ;;  %v6391_v5 = vrot.slane %v6390_v30, 4  ;;  %v6395_v10 = vrot.slane %v6393_v26, 5  ;;  %v14029_v15 = vld [vmem:[%s13572_s26 + $0x68] sm:$0x1] }
 0x1bb   : > { %10624 = vmatmul.mubr.msk.bf16.vlgmr.msra.gmra.mrb[0].mxu0 %vm947_vm3, %v13963_v13  ;;  %10167 = vmatprep.mubr.msk.bf16.mxu1 %vm947_vm3, %v13393_v1  ;;  %v6400_v37 = vrot.slane %v15616_v50, 4  ;;  %v15619_v50 = vshrl.u32 %v13708_v0, 16  ;;  %v14033_v51 = vrot.slane %v6431_v2, 5  ;;  %v6455_v23 = vshll.u32 %v13735_v19, 16 }
 0x1bc   : > { %10656 = vmatpush3.bf16.msra.mxu0 %v7136_v27  ;;  %10627 = vmatprep.mubr.msk.bf16.mxu0 %vm947_vm3, %v13972_v8  ;;  %v6403_v27 = vrot.slane %v15617_v55, 5  ;;  %v6413_v39 = vrot.slane %v15618_v60, 4  ;;  %v15620_v55 = vshll.u32 %v13708_v0, 16  ;;  %v15621_v60 = vshrl.u32 %v13711_v28, 16 }
 0x1bd   : > { %11749 = vmatprep.subr.msk.bf16.mxu0 %vm996_vm0, %v15313_v42  ;;  %v6424_v42 = vrot.slane %v15619_v50, 4  ;;  %v6372_v53 = vsel %vm12087_vm4, %v6367_v40, %v6371_v48  ;;  %v9001_v62 = vrot.slane %v13520_v44, 9  ;;  %v2318_v30 = vrot.slane %v2316_v56, 4 }
 0x1be   : > { %v6427_v12 = vrot.slane %v15620_v55, 5  ;;  %v6437_v32 = vrot.slane %v15621_v60, 4  ;;  %v2319_v26 = vrot.slane %v13658_v6, 5  ;;  %v6386_v2 = vsel %vm12087_vm4, %v6381_v22, %v13965_v7 }
 0x1bf   : > { %v6404_v50 = vor.u32 %v6403_v27, %v6400_v37  ;;  %v6414_v55 = vor.u32 %v6413_v39, %v14016_v16  ;;  %v6417_v60 = vshll.u32 %v14024_v38, 16  ;;  %v6396_v6 = vsel %vm12087_vm4, %v6391_v5, %v6395_v10 }
 0x1c0   : > { %v6441_v44 = vshll.u32 %v14029_v15, 16  ;;  %v15622_v48 = vshrl.u32 %v13732_v49, 16  ;;  %v15623_v40 = vshll.u32 %v13732_v49, 16  ;;  %v6428_v22 = vor.u32 %v6427_v12, %v6424_v42 }
 0x1c1   : > { %v6438_v27 = vor.u32 %v6437_v32, %v14033_v51  ;;  %v14063_v39 = vrot.slane %v6455_v23, 5  ;;  %v6497_v5 = vshll.u32 %v13774_v14, 16  ;;  %v6507_v10 = vshrl.u32 %v13777_v59, 16 }
 0x1c2   : > { %10168 = vmatmul.mubr.msk.bf16.gmra.mrb[20].mxu1 %vm947_vm3, %v13395_v3  ;;  %v6448_v7 = vrot.slane %v15622_v48, 4  ;;  %v6451_v37 = vrot.slane %v15623_v40, 5  ;;  %v14069_v3 = vcombine.low %v6362_v47, %v6372_v53  ;;  %v14072_v48 = vld [vmem:[%s13572_s26 + $0x74] sm:$0x1]  ;;  %v6479_v40 = vshll.u32 %v13741_v33, 16 }
 0x1c3   : > { %10628 = vmatmul.mubr.msk.bf16.gmra.mrb[4].mxu0 %vm947_vm3, %v14003_v21  ;;  %10171 = vmatprep.mubr.msk.bf16.mxu1 %vm947_vm3, %v13411_v57  ;;  %v15624_v57 = vshrl.u32 %v13735_v19, 16  ;;  %v2317_v42 = vsel %vm12434_vm7, %v9001_v62, %v2316_v56  ;;  %v2320_v23 = vsel %vm12434_vm7, %v2318_v30, %v2319_v26  ;;  %v14079_v32 = vcombine.low %v6386_v2, %v6396_v6 }
 0x1c4   : > { %10631 = vmatprep.mubr.msk.bf16.mxu0 %vm947_vm3, %v14006_v31  ;;  %15625 = vst [vmem:[#allocation133_spill] sm:$0xff] %v14069_v3  ;;  %v6405_v12 = vrot.slane %v6404_v50, 4  ;;  %v6419_v31 = vrot.slane %v6417_v60, 5  ;;  %v6443_v8 = vrot.slane %v6441_v44, 5  ;;  %v6452_v1 = vor.u32 %v6451_v37, %v6448_v7  ;;  %v15630_v44 = vld [vmem:[#allocation54_spill] sm:$0xff] }
 0x1c5   : > { %v6461_v21 = vrot.slane %v15624_v57, 4  ;;  %15626 = vst [vmem:[#allocation134_spill] sm:$0xff] %v14079_v32  ;;  %v6415_v57 = vrot.slane %v6414_v55, 4  ;;  %v6429_v47 = vrot.slane %v6428_v22, 4  ;;  %v6439_v53 = vrot.slane %v6438_v27, 4 }
 0x1c6   : > { %v6465_v24 = vshll.u32 %v14072_v48, 16  ;;  %v15627_v43 = vshrl.u32 %v13738_v63, 16  ;;  %v15628_v62 = vshll.u32 %v13738_v63, 16  ;;  %v14087_v26 = vrot.slane %v6479_v40, 5 }
 0x1c7   : > { %v6462_v13 = vor.u32 %v6461_v21, %v14063_v39  ;;  %v15629_v2 = vshrl.u32 %v13741_v33, 16  ;;  %v6518_v55 = vshrl.u32 %v13782_v9, 16  ;;  %v6521_v60 = vshll.u32 %v13782_v9, 16  ;;  %v14097_v21 = vld [vmem:[%s13572_s26 + $0x80] sm:$0x1] }
 0x1c8   : > { %v6472_v56 = vrot.slane %v15627_v43, 4  ;;  %v6475_v30 = vrot.slane %v15628_v62, 5  ;;  %v6531_v6 = vshrl.u32 %v13785_v52, 16  ;;  %v6503_v43 = vshll.u32 %v13777_v59, 16  ;;  %v14140_v9 = vld [vmem:[%s13572_s26 + $0x98] sm:$0x1] }
 0x1c9   : > { %v6485_v50 = vrot.slane %v15629_v2, 4  ;;  %v14104_v7 = vcombine.low %v2317_v42, %v2320_v23  ;;  %v6410_v37 = vsel %vm12087_vm4, %v6405_v12, %v14016_v16  ;;  %v6420_v22 = vsel %vm12087_vm4, %v6415_v57, %v6419_v31  ;;  %15637 = vst [vmem:[#allocation139_spill] sm:$0xff] %v14140_v9 }
 0x1ca   : > { %10172 = vmatmul.mubr.msk.bf16.gmra.mrb[24].mxu1 %vm947_vm3, %v15514_v18  ;;  %v6453_v27 = vrot.slane %v6452_v1, 4  ;;  %v6434_v40 = vsel %vm12087_vm4, %v6429_v47, %v14033_v51  ;;  %v6444_v42 = vsel %vm12087_vm4, %v6439_v53, %v6443_v8  ;;  %v6467_v23 = vrot.slane %v6465_v24, 5  ;;  %v15633_v47 = vld [vmem:[#allocation120_spill] sm:$0xff]  ;;  %v14132_v53 = vld [vmem:[%s13572_s26 + $0x8c] sm:$0x1] }
 0x1cb   : > { %10632 = vmatmul.mubr.msk.bf16.gmra.mrb[8].mxu0 %vm947_vm3, %v14069_v3  ;;  %10175 = vmatprep.mubr.msk.bf16.mxu1 %vm947_vm3, %v15630_v44  ;;  %15631 = vst [vmem:[#allocation135_spill] sm:$0xff] %v14104_v7  ;;  %v6527_v62 = vshll.u32 %v13785_v52, 16  ;;  %v6463_v2 = vrot.slane %v6462_v13, 4  ;;  %v6476_v16 = vor.u32 %v6475_v30, %v6472_v56  ;;  %v6486_v12 = vor.u32 %v6485_v50, %v14087_v26 }
 0x1cc   : > { %10635 = vmatprep.mubr.msk.bf16.mxu0 %vm947_vm3, %v14079_v32  ;;  %v6489_v1 = vshll.u32 %v14097_v21, 16  ;;  %v15632_v31 = vshrl.u32 %v13774_v14, 16  ;;  %v6499_v32 = vrot.slane %v6497_v5, 5  ;;  %v14123_v44 = vrot.slane %v6503_v43, 5  ;;  %15636 = vst [vmem:[#allocation138_spill] sm:$0xff] %v14132_v53 }
 0x1cd   : > { %v6509_v51 = vrot.slane %v6507_v10, 4  ;;  %v6542_v3 = vshrl.u32 %v15633_v47, 16  ;;  %v6545_v24 = vshll.u32 %v15633_v47, 16  ;;  %v14127_v8 = vcombine.low %v6410_v37, %v6420_v22  ;;  %v15638_v22 = vld [vmem:[#allocation121_spill] sm:$0xff] }
 0x1ce   : > { %v6496_v57 = vrot.slane %v15632_v31, 4  ;;  %v14129_v13 = vcombine.low %v6434_v40, %v6444_v42  ;;  %v6520_v56 = vrot.slane %v6518_v55, 4  ;;  %v6523_v30 = vrot.slane %v6521_v60, 5  ;;  %v15639_v42 = vld [vmem:[#allocation123_spill] sm:$0xff] }
 0x1cf   : > { %15634 = vst [vmem:[#allocation136_spill] sm:$0xff] %v14127_v8  ;;  %v14134_v50 = vrot.slane %v6527_v62, 5  ;;  %v6533_v31 = vrot.slane %v6531_v6, 4  ;;  %v6458_v5 = vsel %vm12087_vm4, %v6453_v27, %v14063_v39  ;;  %v6477_v10 = vrot.slane %v6476_v16, 4  ;;  %v15640_v62 = vld [vmem:[#allocation52_spill] sm:$0xff] }
 0x1d0   : > { %15635 = vst [vmem:[#allocation137_spill] sm:$0xff] %v14129_v13  ;;  %v6487_v43 = vrot.slane %v6486_v12, 4  ;;  %v6491_v18 = vrot.slane %v6489_v1, 5  ;;  %v6468_v37 = vsel %vm12087_vm4, %v6463_v2, %v6467_v23  ;;  %v6500_v55 = vor.u32 %v6499_v32, %v6496_v57  ;;  %v15641_v23 = vld [vmem:[#allocation124_spill] sm:$0xff] }
 0x1d1   : > { %v6510_v60 = vor.u32 %v6509_v51, %v14123_v44  ;;  %v6513_v6 = vshll.u32 %v14132_v53, 16  ;;  %v6555_v40 = vshrl.u32 %v15638_v22, 16  ;;  %v6566_v39 = vshrl.u32 %v15639_v42, 16 }
 0x1d2   : > { %10176 = vmatmul.mubr.msk.bf16.gmra.mrb[28].mxu1 %vm947_vm3, %v14104_v7  ;;  %v6569_v27 = vshll.u32 %v15639_v42, 16  ;;  %v6551_v16 = vshll.u32 %v15638_v22, 16  ;;  %v6579_v32 = vshrl.u32 %v15641_v23, 16  ;;  %v6524_v2 = vor.u32 %v6523_v30, %v6520_v56  ;;  %v15642_v7 = vld [vmem:[#allocation112_spill] sm:$0xff] }
 0x1d3   : > { %10636 = vmatmul.mubr.msk.bf16.gmra.mrb[12].mxu0 %vm947_vm3, %v14127_v8  ;;  %10181 = vmatprep.mubr.msk.bf16.mxu1 %vm947_vm3, %v15640_v62  ;;  %v6534_v12 = vor.u32 %v6533_v31, %v14134_v50  ;;  %v6537_v1 = vshll.u32 %v14140_v9, 16  ;;  %v14161_v57 = vcombine.low %v6458_v5, %v6468_v37  ;;  %v6482_v51 = vsel %vm12087_vm4, %v6477_v10, %v14087_v26 }
 0x1d4   : > { %10639 = vmatprep.mubr.msk.bf16.mxu0 %vm947_vm3, %v14129_v13  ;;  %v6492_v62 = vsel %vm12087_vm4, %v6487_v43, %v6491_v18  ;;  %v6575_v8 = vshll.u32 %v15641_v23, 16  ;;  %v15643_v42 = vrot.slane %v15642_v7, 2  ;;  %v6501_v30 = vrot.slane %v6500_v55, 4  ;;  %v14175_v18 = vld [vmem:[%s13572_s26 + $0xa4] sm:$0x1] }
 0x1d5   : > { %v6511_v31 = vrot.slane %v6510_v60, 4  ;;  %v6515_v13 = vrot.slane %v6513_v6, 5  ;;  %v6544_v47 = vrot.slane %v6542_v3, 4  ;;  %v6547_v5 = vrot.slane %v6545_v24, 5  ;;  %v15645_v3 = vld [vmem:[#allocation57_spill] sm:$0xff] }
 0x1d6   : > { %v2769_v56 = vsel %vm996_vm0, %v15643_v42, 0  ;;  %v6553_v37 = vrot.slane %v6551_v16, 5  ;;  %v6557_v22 = vrot.slane %v6555_v40, 4  ;;  %v14172_v9 = vcombine.low %v6482_v51, %v6492_v62  ;;  %v14185_v6 = vld [vmem:[%s13572_s26 + $0xb0] sm:$0x1] }
 0x1d7   : > { %v6525_v26 = vrot.slane %v6524_v2, 4  ;;  %v6535_v10 = vrot.slane %v6534_v12, 4  ;;  %v6539_v53 = vrot.slane %v6537_v1, 5  ;;  %v6568_v43 = vrot.slane %v6566_v39, 4  ;;  %v14190_v40 = vld [vmem:[%s15071_s3 + $0x10] sm:$0x3] }
 0x1d8   : > { %15644 = vst [vmem:[#allocation52_spill] sm:$0xff] %v14172_v9  ;;  %v6571_v23 = vrot.slane %v6569_v27, 5  ;;  %v6577_v7 = vrot.slane %v6575_v8, 5  ;;  %v6581_v14 = vrot.slane %v6579_v32, 4  ;;  %v6590_v55 = vshrl.u32 %v13879_v54, 16  ;;  %v15646_v16 = vld [vmem:[#allocation60_spill] sm:$0xff] }
 0x1d9   : > { %v6593_v60 = vshll.u32 %v13879_v54, 16  ;;  %v6506_v24 = vsel %vm12087_vm4, %v6501_v30, %v14123_v44  ;;  %v6516_v8 = vsel %vm12087_vm4, %v6511_v31, %v6515_v13  ;;  %v6548_v42 = vor.u32 %v6547_v5, %v6544_v47 }
 0x1da   : > { %10182 = vmatmul.mubr.msk.bf16.vlgmr.msra.gmra.mrb[0].mxu1 %vm947_vm3, %v15645_v3  ;;  %v6558_v39 = vor.u32 %v6557_v22, %v6553_v37  ;;  %v6561_v27 = vshll.u32 %v14175_v18, 16  ;;  %v6603_v44 = vshrl.u32 %v13888_v17, 16  ;;  %v6530_v32 = vsel %vm12087_vm4, %v6525_v26, %v14134_v50  ;;  %v15650_v3 = vld [vmem:[#allocation70_spill] sm:$0xff] }
 0x1db   : > { %10214 = vmatpush3.bf16.msra.mxu1 %v2769_v56  ;;  %10640 = vmatmul.mubr.msk.bf16.gmra.mrb[16].mxu0 %vm947_vm3, %v14161_v57  ;;  %v6540_v2 = vsel %vm12087_vm4, %v6535_v10, %v6539_v53  ;;  %v6599_v47 = vshll.u32 %v13888_v17, 16  ;;  %v6572_v13 = vor.u32 %v6571_v23, %v6568_v43  ;;  %v6582_v22 = vor.u32 %v6581_v14, %v6577_v7  ;;  %v14216_v14 = vld [vmem:[%s13572_s26 + $0xbc] sm:$0x1]  ;;  %v15649_v43 = vld [vmem:[#allocation68_spill] sm:$0xff] }
 0x1dc   : > { %10185 = vmatprep.mubr.msk.bf16.mxu1 %vm947_vm3, %v15646_v16  ;;  %10643 = vmatprep.mubr.msk.bf16.mxu0 %vm947_vm3, %v14172_v9  ;;  %v6585_v12 = vshll.u32 %v14185_v6, 16  ;;  %v14211_v1 = vcombine.low %v6506_v24, %v6516_v8  ;;  %v14213_v51 = vcombine.low %v6530_v32, %v6540_v2  ;;  %v6549_v62 = vrot.slane %v6548_v42, 4 }
 0x1dd   : > { %11735 = vmatprep.subr.msk.bf16.mxu1 %vm996_vm0, %v14190_v40  ;;  %v6559_v56 = vrot.slane %v6558_v39, 4  ;;  %v6563_v50 = vrot.slane %v6561_v27, 5  ;;  %v6592_v30 = vrot.slane %v6590_v55, 4  ;;  %v6595_v31 = vrot.slane %v6593_v60, 5 }
 0x1de   : > { %15647 = vst [vmem:[#allocation112_spill] sm:$0xff] %v14211_v1  ;;  %15648 = vst [vmem:[#allocation57_spill] sm:$0xff] %v14213_v51  ;;  %v6601_v53 = vrot.slane %v6599_v47, 5  ;;  %v6605_v5 = vrot.slane %v6603_v44, 4  ;;  %v6573_v26 = vrot.slane %v6572_v13, 4  ;;  %v6583_v23 = vrot.slane %v6582_v22, 4 }
 0x1df   : > { %v6587_v10 = vrot.slane %v6585_v12, 5  ;;  %v6554_v55 = vsel %vm12087_vm4, %v6549_v62, %v6553_v37  ;;  %v6564_v60 = vsel %vm12087_vm4, %v6559_v56, %v6563_v50  ;;  %v6596_v24 = vor.u32 %v6595_v31, %v6592_v30  ;;  %v15651_v44 = vld [vmem:[#allocation75_spill] sm:$0xff]  ;;  %v15652_v22 = vld [vmem:[#allocation5_spill] sm:$0xff]  ;;  %v15654_v30 = vld [vmem:[#allocation74_spill] sm:$0xff] }
 0x1e0   : > { %v6606_v8 = vor.u32 %v6605_v5, %v6601_v53  ;;  %v6609_v42 = vshll.u32 %v14216_v14, 16  ;;  %v6578_v39 = vsel %vm12087_vm4, %v6573_v26, %v6577_v7  ;;  %v6928_v16 = vrot.slane %v15651_v44, 5  ;;  %v15653_v56 = vld [vmem:[#allocation119_spill] sm:$0xff]  ;;  %v15655_v7 = vld [vmem:[#allocation76_spill] sm:$0xff]  ;;  %v15661_v44 = vld [vmem:[#allocation97_spill] sm:$0xff] }
 0x1e1   : > { %v6588_v27 = vsel %vm12087_vm4, %v6583_v23, %v6587_v10  ;;  %v14236_v32 = vcombine.low %v6554_v55, %v6564_v60  ;;  %v6597_v2 = vrot.slane %v6596_v24, 4  ;;  %v9359_v12 = vrot.slane %v15652_v22, 9  ;;  %v15656_v26 = vld [vmem:[#allocation96_spill] sm:$0xff] }
 0x1e2   : > { %10186 = vmatmul.mubr.msk.bf16.gmra.mrb[4].mxu1 %vm947_vm3, %v15649_v43  ;;  %v14238_v37 = vcombine.low %v6578_v39, %v6588_v27  ;;  %v6607_v47 = vrot.slane %v6606_v8, 4  ;;  %v6611_v13 = vrot.slane %v6609_v42, 5  ;;  %v6930_v62 = vrot.slane %v6928_v16, 4  ;;  %v15659_v8 = vld [vmem:[#allocation95_spill] sm:$0xff] }
 0x1e3   : > { %10644 = vmatmul.mubr.msk.bf16.gmra.mrb[20].mxu0 %vm947_vm3, %v14211_v1  ;;  %10189 = vmatprep.mubr.msk.bf16.mxu1 %vm947_vm3, %v15650_v3  ;;  %v6931_v50 = vrot.slane %v15653_v56, 5  ;;  %v6602_v31 = vsel %vm12087_vm4, %v6597_v2, %v6601_v53  ;;  %v6935_v23 = vrot.slane %v15656_v26, 5  ;;  %v6929_v10 = vsel %vm12434_vm7, %v9359_v12, %v6928_v16  ;;  %v15657_v3 = vld [vmem:[#allocation98_spill] sm:$0xff]  ;;  %v15664_v16 = vld [vmem:[#allocation81_spill] sm:$0xff] }
 0x1e4   : > { %10647 = vmatprep.mubr.msk.bf16.mxu0 %vm947_vm3, %v14213_v51  ;;  %v6612_v5 = vsel %vm12087_vm4, %v6607_v47, %v6611_v13  ;;  %v6942_v55 = vrot.slane %v15657_v3, 5  ;;  %v9360_v42 = vrot.slane %v15659_v8, 9  ;;  %v15660_v53 = vld [vmem:[#allocation126_spill] sm:$0xff]  ;;  %v9361_v2 = vrot.slane %v15661_v44, 9  ;;  %v15662_v13 = vld [vmem:[#allocation127_spill] sm:$0xff]  ;;  %v15668_v3 = vld [vmem:[#allocation101_spill] sm:$0xff] }
 0x1e5   : > { %v6932_v43 = vsel %vm12434_vm7, %v6930_v62, %v6931_v50  ;;  %v14260_v60 = vcombine.low %v6602_v31, %v6612_v5  ;;  %v6937_v39 = vrot.slane %v6935_v23, 4  ;;  %v6938_v27 = vrot.slane %v15660_v53, 5  ;;  %v15663_v56 = vld [vmem:[#allocation78_spill] sm:$0xff]  ;;  %v15666_v5 = vld [vmem:[#allocation104_spill] sm:$0xff]  ;;  %v15670_v53 = vld [vmem:[#allocation103_spill] sm:$0xff] }
 0x1e6   : > { %v9375_v24 = vcombine.low %v6929_v10, %v6932_v43  ;;  %v6944_v47 = vrot.slane %v6942_v55, 4  ;;  %v6945_v22 = vrot.slane %v15662_v13, 5  ;;  %v6936_v12 = vsel %vm12434_vm7, %v9360_v42, %v6935_v23  ;;  %v15665_v50 = vld [vmem:[#allocation102_spill] sm:$0xff] }
 0x1e7   : > { %15658 = vst [vmem:[#allocation60_spill] sm:$0xff] %v14260_v60  ;;  %v6939_v62 = vsel %vm12434_vm7, %v6937_v39, %v6938_v27  ;;  %v6956_v26 = vrot.slane %v15666_v5, 5  ;;  %v6952_v8 = vrot.slane %v13901_v46, 5  ;;  %v15669_v42 = vrot.slane %v13957_v29, 2  ;;  %v15672_v46 = vld [vmem:[#allocation85_spill] sm:$0xff] }
 0x1e8   : > { %v6946_v31 = vsel %vm12434_vm7, %v6944_v47, %v6945_v22  ;;  %v14283_v10 = vcombine.low %v6936_v12, %v6939_v62  ;;  %v6959_v44 = vrot.slane %v13917_v20, 5  ;;  %v14299_v47 = vld [vmem:[%s15071_s3 + $0x2c] sm:$0x3]  ;;  %v6963_v13 = vrot.slane %v13673_v41, 5 }
 0x1e9   : > { %v7345_v39 = vsel %vm996_vm0, %v15669_v42, 0  ;;  %v6958_v27 = vrot.slane %v6956_v26, 4  ;;  %v6966_v41 = vrot.slane %v13946_v61, 5  ;;  %v6973_v5 = vrot.slane %v13976_v34, 5 }
 0x1ea   : > { %10190 = vmatmul.mubr.msk.bf16.gmra.mrb[8].mxu1 %vm947_vm3, %v15654_v30  ;;  %v6949_v30 = vrot.slane %v15665_v50, 5  ;;  %v9364_v50 = vrot.slane %v13670_v4, 9  ;;  %v6977_v34 = vrot.slane %v13705_v35, 5  ;;  %v9366_v42 = vrot.slane %v13702_v45, 9  ;;  %v14363_v45 = vld [vmem:[%s12067_s25 + $0xd0] sm:$0xf] }
 0x1eb   : > { %10648 = vmatmul.mubr.msk.bf16.gmra.mrb[24].mxu0 %vm947_vm3, %v14236_v32  ;;  %10193 = vmatprep.mubr.msk.bf16.mxu1 %vm947_vm3, %v15655_v7  ;;  %v6943_v7 = vsel %vm12434_vm7, %v9361_v2, %v6942_v55  ;;  %v9363_v55 = vrot.slane %v15670_v53, 9  ;;  %v15671_v2 = vld [vmem:[#allocation82_spill] sm:$0xff]  ;;  %v6980_v53 = vrot.slane %v14024_v38, 5  ;;  %v9367_v35 = vrot.slane %v13708_v0, 9 }
 0x1ec   : > { %10651 = vmatprep.mubr.msk.bf16.mxu0 %vm947_vm3, %v14238_v37  ;;  %v14285_v43 = vcombine.low %v6943_v7, %v6946_v31  ;;  %v6951_v23 = vrot.slane %v6949_v30, 4  ;;  %v9365_v7 = vrot.slane %v13676_v25, 9  ;;  %v6964_v4 = vsel %vm12434_vm7, %v9364_v50, %v6963_v13 }
 0x1ed   : > { %v6957_v22 = vsel %vm12434_vm7, %v9363_v55, %v6956_v26  ;;  %v15675_v26 = vld [vmem:[#allocation86_spill] sm:$0xff]  ;;  %v6978_v0 = vsel %vm12434_vm7, %v9366_v42, %v6977_v34  ;;  %v15682_v42 = vld [vmem:[#allocation116_spill] sm:$0xff] }
 0x1ee   : > { %15667 = vst [vmem:[#allocation68_spill] sm:$0xff] %v14285_v43  ;;  %v6953_v29 = vsel %vm12434_vm7, %v6951_v23, %v6952_v8 }
 0x1f2   : > { %10194 = vmatmul.mubr.msk.bf16.gmra.mrb[12].mxu1 %vm947_vm3, %v15663_v56  ;;  %v6960_v56 = vsel %vm12434_vm7, %v6958_v27, %v6959_v44  ;;  %v6987_v27 = vrot.slane %v14029_v15, 5  ;;  %v15677_v44 = vld [vmem:[#allocation64_spill] sm:$0xff]  ;;  %v6991_v15 = vrot.slane %v13735_v19, 5  ;;  %v6994_v19 = vrot.slane %v14072_v48, 5 }
 0x1f3   : > { %10652 = vmatmul.mubr.msk.bf16.gmra.mrb[28].mxu0 %vm947_vm3, %v14260_v60  ;;  %10197 = vmatprep.mubr.msk.bf16.mxu1 %vm947_vm3, %v15664_v16  ;;  %v6970_v16 = vrot.slane %v13679_v58, 5  ;;  %v14321_v62 = vcombine.low %v6957_v22, %v6960_v56  ;;  %v15676_v58 = vld [vmem:[#allocation63_spill] sm:$0xff]  ;;  %v7005_v48 = vrot.slane %v13777_v59, 5 }
 0x1f4   : > { %10657 = vmatprep.mubr.msk.bf16.mxu0 %vm947_vm3, %v9375_v24  ;;  %v9362_v24 = vrot.slane %v15668_v3, 9  ;;  %v6993_v50 = vrot.slane %v6991_v15, 4  ;;  %v15680_v59 = vld [vmem:[#allocation115_spill] sm:$0xff] }
 0x1f5   : > { %15674 = vst [vmem:[#allocation75_spill] sm:$0xff] %v14321_v62  ;;  %v6972_v31 = vrot.slane %v6970_v16, 4  ;;  %v6971_v61 = vsel %vm12434_vm7, %v9365_v7, %v6970_v16  ;;  %v9368_v16 = vrot.slane %v13732_v49, 9  ;;  %v7001_v7 = vrot.slane %v14097_v21, 5 }
 0x1f6   : > { %v6950_v20 = vsel %vm12434_vm7, %v9362_v24, %v6949_v30  ;;  %v6965_v30 = vrot.slane %v6963_v13, 4  ;;  %v6984_v24 = vrot.slane %v13711_v28, 5  ;;  %v15678_v28 = vld [vmem:[#allocation66_spill] sm:$0xff] }
 0x1f7   : > { %v14319_v12 = vcombine.low %v6950_v20, %v6953_v29  ;;  %v6974_v3 = vsel %vm12434_vm7, %v6972_v31, %v6973_v5  ;;  %v6998_v29 = vrot.slane %v13741_v33, 5  ;;  %v15679_v33 = vld [vmem:[#allocation8_spill] sm:$0xff]  ;;  %v6992_v49 = vsel %vm12434_vm7, %v9368_v16, %v6991_v15 }
 0x1f8   : > { %v6967_v25 = vsel %vm12434_vm7, %v6965_v30, %v6966_v41  ;;  %v14347_v8 = vcombine.low %v6971_v61, %v6974_v3  ;;  %v6986_v55 = vrot.slane %v6984_v24, 4  ;;  %v9369_v30 = vrot.slane %v13738_v63, 9  ;;  %v15681_v3 = vld [vmem:[#allocation138_spill] sm:$0xff] }
 0x1f9   : > { %15673 = vst [vmem:[#allocation70_spill] sm:$0xff] %v14319_v12  ;;  %v14345_v23 = vcombine.low %v6964_v4, %v6967_v25  ;;  %v7000_v41 = vrot.slane %v6998_v29, 4  ;;  %v6995_v63 = vsel %vm12434_vm7, %v6993_v50, %v6994_v19  ;;  %v7012_v5 = vrot.slane %v13785_v52, 5  ;;  %v15688_v50 = vld [vmem:[#allocation120_spill] sm:$0xff] }
 0x1fa   : > { %10198 = vmatmul.mubr.msk.bf16.gmra.mrb[16].mxu1 %vm947_vm3, %v15671_v2  ;;  %v14360_v2 = vld [vmem:[%s12067_s25 + $0xcc] sm:$0xf]  ;;  %v6988_v20 = vsel %vm12434_vm7, %v6986_v55, %v6987_v27  ;;  %v6999_v21 = vsel %vm12434_vm7, %v9369_v30, %v6998_v29  ;;  %v14411_v4 = vcombine.low %v6992_v49, %v6995_v63  ;;  %v7007_v61 = vrot.slane %v7005_v48, 4  ;;  %v15684_v27 = vld [vmem:[#allocation9_spill] sm:$0xff] }
 0x1fb   : > { %10658 = vmatmul.mubr.msk.bf16.vlgmr.msra.gmra.mrb[0].mxu0 %vm947_vm3, %v14283_v10  ;;  %10201 = vmatprep.mubr.msk.bf16.mxu1 %vm947_vm3, %v15672_v46  ;;  %v6985_v46 = vsel %vm12434_vm7, %v9367_v35, %v6984_v24  ;;  %v9020_v13 = vcombine.low %v14360_v2, %v14363_v45  ;;  %v7002_v31 = vsel %vm12434_vm7, %v7000_v41, %v7001_v7  ;;  %v7008_v24 = vrot.slane %v15681_v3, 5  ;;  %v15689_v7 = vld [vmem:[#allocation123_spill] sm:$0xff] }
 0x1fc   : > { %10690 = vmatpush3.bf16.msra.mxu0 %v7345_v39  ;;  %10661 = vmatprep.mubr.msk.bf16.mxu0 %vm947_vm3, %v14285_v43  ;;  %v6979_v39 = vrot.slane %v6977_v34, 4  ;;  %v14381_v56 = vcombine.low %v6985_v46, %v6988_v20  ;;  %v14413_v25 = vcombine.low %v6999_v21, %v7002_v31  ;;  %v9370_v34 = vrot.slane %v15680_v59, 9  ;;  %v15687_v20 = vld [vmem:[#allocation124_spill] sm:$0xff]  ;;  %v15691_v21 = vld [vmem:[#allocation17_spill] sm:$0xff]  ;;  %v15803_v36 = vld [vmem:[#allocation75_spill] sm:$0xff] }
 0x1fd   : > { %11750 = vmatprep.subr.msk.bf16.mxu0 %vm996_vm0, %v14299_v47  ;;  %v7014_v52 = vrot.slane %v7012_v5, 4  ;;  %v7026_v29 = vrot.slane %v15687_v20, 5  ;;  %v9372_v19 = vrot.slane %v15688_v50, 9  ;;  %v7022_v41 = vrot.slane %v14175_v18, 5  ;;  %v15699_v20 = vld [vmem:[#allocation30_spill] sm:$0xff] }
 0x1fe   : > { %v6981_v38 = vsel %vm12434_vm7, %v6979_v39, %v6980_v53  ;;  %v9371_v39 = vrot.slane %v15682_v42, 9  ;;  %v15683_v53 = vld [vmem:[#allocation139_spill] sm:$0xff]  ;;  %v7029_v63 = vrot.slane %v14185_v6, 5  ;;  %v7033_v6 = vrot.slane %v13888_v17, 5  ;;  %v15693_v17 = vld [vmem:[#allocation22_spill] sm:$0xff] }
 0x1ff   : > { %v14379_v22 = vcombine.low %v6978_v0, %v6981_v38  ;;  %v7015_v35 = vrot.slane %v15683_v53, 5  ;;  %v15686_v0 = vld [vmem:[#allocation121_spill] sm:$0xff]  ;;  %v7028_v49 = vrot.slane %v7026_v29, 4  ;;  %v15692_v42 = vld [vmem:[#allocation19_spill] sm:$0xff]  ;;  %v15695_v53 = vld [vmem:[#allocation26_spill] sm:$0xff] }
 0x200   : > { %v7019_v38 = vrot.slane %v15686_v0, 5  ;;  %v7013_v15 = vsel %vm12434_vm7, %v9371_v39, %v7012_v5  ;;  %v7035_v3 = vrot.slane %v7033_v6, 4  ;;  %v2734_v0 = vshrl.u32 %v14360_v2, 16 }
 0x201   : > { %v7016_v46 = vsel %vm12434_vm7, %v7014_v52, %v7015_v35  ;;  %v15696_v35 = vld [vmem:[#allocation99_spill] sm:$0xff] }
 0x202   : > { %10202 = vmatmul.mubr.msk.bf16.gmra.mrb[20].mxu1 %vm947_vm3, %v15675_v26  ;;  %v14407_v26 = vld [vmem:[%s15071_s3 + $0x10] ss:$0 sps:$4 sm:$0xcc]   ;;  %v14443_v16 = vcombine.low %v7013_v15, %v7016_v46  ;;  %v7021_v30 = vrot.slane %v7019_v38, 4  ;;  %v7020_v18 = vsel %vm12434_vm7, %v9372_v19, %v7019_v38  ;;  %v2737_v38 = vshll.u32 %v14360_v2, 16 }
 0x203   : > { %10662 = vmatmul.mubr.msk.bf16.gmra.mrb[4].mxu0 %vm947_vm3, %v14319_v12  ;;  %10205 = vmatprep.mubr.msk.bf16.mxu1 %vm947_vm3, %v15676_v58  ;;  %v2980_v58 = vsel %vm996_vm0, %v14190_v40, 0  ;;  %v3259_v55 = vrot.slane %v14407_v26, 2  ;;  %v15685_v40 = vld [vmem:[#allocation12_spill] sm:$0xff]  ;;  %v2747_v15 = vshrl.u32 %v14363_v45, 16  ;;  %v2736_v50 = vrot.slane %v2734_v0, 4  ;;  %v15713_v0 = vld [vmem:[#allocation114_spill] sm:$0xff] }
 0x204   : > { %10665 = vmatprep.mubr.msk.bf16.mxu0 %vm947_vm3, %v14321_v62  ;;  %v7023_v31 = vsel %vm12434_vm7, %v7021_v30, %v7022_v41  ;;  %v15698_v46 = vld [vmem:[#allocation100_spill] sm:$0xff]  ;;  %v2739_v19 = vrot.slane %v2737_v38, 5  ;;  %v15714_v38 = vld [vmem:[#allocation43_spill] sm:$0xff] }
 0x205   : > { %v14466_v59 = vcombine.low %v7020_v18, %v7023_v31  ;;  %v2749_v41 = vrot.slane %v2747_v15, 4  ;;  %v15704_v31 = vld [vmem:[#allocation107_spill] sm:$0xff]  ;;  %v15715_v15 = vld [vmem:[#allocation117_spill] sm:$0xff]  ;;  %v15716_v26 = vld [vmem:[#allocation56_spill] sm:$0xff] }
 0x20a   : > { %10206 = vmatmul.mubr.msk.bf16.gmra.mrb[24].mxu1 %vm947_vm3, %v15677_v44  ;;  %v7006_v44 = vsel %vm12434_vm7, %v9370_v34, %v7005_v48  ;;  %v15690_v48 = vld [vmem:[#allocation13_spill] sm:$0xff] }
 0x20b   : > { %10666 = vmatmul.mubr.msk.bf16.gmra.mrb[8].mxu0 %vm947_vm3, %v14345_v23  ;;  %10209 = vmatprep.mubr.msk.bf16.mxu1 %vm947_vm3, %v15678_v28  ;;  %v7009_v28 = vsel %vm12434_vm7, %v7007_v61, %v7008_v24  ;;  %v9374_v61 = vrot.slane %v13879_v54, 9  ;;  %v7036_v24 = vrot.slane %v14216_v14, 5  ;;  %v15694_v14 = vld [vmem:[#allocation25_spill] sm:$0xff] }
 0x20c   : > { %10669 = vmatprep.mubr.msk.bf16.mxu0 %vm947_vm3, %v14347_v8 }
 0x20d   : > { %v7034_v39 = vsel %vm12434_vm7, %v9374_v61, %v7033_v6  ;;  %v7037_v54 = vsel %vm12434_vm7, %v7035_v3, %v7036_v24  ;;  %v15705_v61 = vld [vmem:[#allocation42_spill] sm:$0xff]  ;;  %v15706_v3 = vld [vmem:[#allocation108_spill] sm:$0xff]  ;;  %v15707_v24 = vld [vmem:[#allocation109_spill] sm:$0xff] }
 0x20e   : > { %v14484_v52 = vcombine.low %v7034_v39, %v7037_v54  ;;  %v15708_v39 = vld [vmem:[#allocation110_spill] sm:$0xff] }
 0x212   : > { %10210 = vmatmul.mubr.msk.bf16.gmra.mrb[28].mxu1 %vm947_vm3, %v9020_v13  ;;  %v14441_v13 = vcombine.low %v7006_v44, %v7009_v28  ;;  %v15697_v28 = vld [vmem:[#allocation28_spill] sm:$0xff] }
 0x213   : > { %10670 = vmatmul.mubr.msk.bf16.gmra.mrb[12].mxu0 %vm947_vm3, %v14379_v22  ;;  %10215 = vmatprep.mubr.msk.bf16.mxu1 %vm947_vm3, %v15679_v33  ;;  %v9373_v33 = vrot.slane %v15689_v7, 9  ;;  %v14516_v7 = vld [vmem:[%s12067_s25 + $0xd4] sm:$0x1] }
 0x214   : > { %10673 = vmatprep.mubr.msk.bf16.mxu0 %vm947_vm3, %v14381_v56  ;;  %v2753_v18 = vshll.u32 %v14516_v7, 16 }
 0x215   : > { %v7027_v5 = vsel %vm12434_vm7, %v9373_v33, %v7026_v29  ;;  %v15700_v29 = vld [vmem:[#allocation105_spill] sm:$0xff]  ;;  %v15701_v33 = vld [vmem:[#allocation34_spill] sm:$0xff] }
 0x21a   : > { %10216 = vmatmul.mubr.msk.bf16.vlgmr.msra.gmra.mrb[0].mxu1 %vm947_vm3, %v15684_v27  ;;  %v14497_v27 = vld [vmem:[%s15071_s3 + $0x2c] ss:$0 sps:$4 sm:$0xcc]  }
 0x21b   : > { %10248 = vmatpush3.bf16.msra.mxu1 %v2980_v58  ;;  %10674 = vmatmul.mubr.msk.bf16.gmra.mrb[16].mxu0 %vm947_vm3, %v14411_v4  ;;  %v7030_v58 = vsel %vm12434_vm7, %v7028_v49, %v7029_v63  ;;  %v7782_v44 = vrot.slane %v14497_v27, 2  ;;  %v15702_v49 = vld [vmem:[#allocation106_spill] sm:$0xff]  ;;  %v15703_v63 = vld [vmem:[#allocation37_spill] sm:$0xff]  ;;  %v3309_v27 = vsel %vm996_vm0, %v3259_v55, 0 }
 0x21c   : > { %10219 = vmatprep.mubr.msk.bf16.mxu1 %vm947_vm3, %v15685_v40  ;;  %10677 = vmatprep.mubr.msk.bf16.mxu0 %vm947_vm3, %v14413_v25  ;;  %v14468_v34 = vcombine.low %v7027_v5, %v7030_v58  ;;  %v7572_v40 = vsel %vm996_vm0, %v14299_v47, 0  ;;  %v2743_v47 = vshll.u32 %v14363_v45, 16  ;;  %v2755_v58 = vrot.slane %v2753_v18, 5  ;;  %v15725_v18 = vld [vmem:[#allocation92_spill] sm:$0xff] }
 0x21d   : > { %11736 = vmatprep.subr.msk.bf16.mxu1 %vm996_vm0, %v3259_v55  ;;  %v15717_v55 = vld [vmem:[#allocation118_spill] sm:$0xff] }
 0x21e   : > { %v2745_v30 = vrot.slane %v2743_v47, 5  ;;  %v15719_v47 = vld [vmem:[#allocation122_spill] sm:$0xff] }
 0x222   : > { %10220 = vmatmul.mubr.msk.bf16.gmra.mrb[4].mxu1 %vm947_vm3, %v15690_v48  ;;  %v2740_v48 = vor.u32 %v2739_v19, %v2736_v50  ;;  %v15720_v50 = vld [vmem:[#allocation89_spill] sm:$0xff] }
 0x223   : > { %10678 = vmatmul.mubr.msk.bf16.gmra.mrb[20].mxu0 %vm947_vm3, %v14441_v13  ;;  %10223 = vmatprep.mubr.msk.bf16.mxu1 %vm947_vm3, %v15691_v21  ;;  %v2750_v21 = vor.u32 %v2749_v41, %v2745_v30  ;;  %v15721_v19 = vld [vmem:[#allocation125_spill] sm:$0xff]  ;;  %v15723_v41 = vld [vmem:[#allocation128_spill] sm:$0xff] }
 0x224   : > { %10681 = vmatprep.mubr.msk.bf16.mxu0 %vm947_vm3, %v14443_v16  ;;  %v2741_v6 = vrot.slane %v2740_v48, 4 }
 0x225   : > { %v2751_v5 = vrot.slane %v2750_v21, 4  ;;  %v15724_v21 = vld [vmem:[#allocation91_spill] sm:$0xff] }
 0x22a   : > { %10224 = vmatmul.mubr.msk.bf16.gmra.mrb[8].mxu1 %vm947_vm3, %v15692_v42  ;;  %v2746_v42 = vsel %vm12087_vm4, %v2741_v6, %v2745_v30  ;;  %v15722_v30 = vld [vmem:[#allocation90_spill] sm:$0xff]  ;;  %v15726_v6 = vld [vmem:[#allocation129_spill] sm:$0xff] }
 0x22b   : > { %10682 = vmatmul.mubr.msk.bf16.gmra.mrb[24].mxu0 %vm947_vm3, %v14466_v59  ;;  %10227 = vmatprep.mubr.msk.bf16.mxu1 %vm947_vm3, %v15693_v17  ;;  %v2756_v17 = vsel %vm12087_vm4, %v2751_v5, %v2755_v58  ;;  %v7787_v5 = vsel %vm996_vm0, %v7782_v44, 0  ;;  %v15727_v58 = vld [vmem:[#allocation79_spill] sm:$0xff] }
 0x22c   : > { %10685 = vmatprep.mubr.msk.bf16.mxu0 %vm947_vm3, %v14468_v34  ;;  %v9037_v54 = vcombine.low %v2746_v42, %v2756_v17  ;;  %v15729_v42 = vld [vmem:[#allocation93_spill] sm:$0xff]  ;;  %v15730_v17 = vld [vmem:[#allocation131_spill] sm:$0xff] }
 0x232   : > { %10228 = vmatmul.mubr.msk.bf16.gmra.mrb[12].mxu1 %vm947_vm3, %v15694_v14  ;;  %v15709_v14 = vld [vmem:[#allocation111_spill] sm:$0xff] }
 0x233   : > { %10686 = vmatmul.mubr.msk.bf16.gmra.mrb[28].mxu0 %vm947_vm3, %v14484_v52  ;;  %10231 = vmatprep.mubr.msk.bf16.mxu1 %vm947_vm3, %v15695_v53  ;;  %v15710_v53 = vld [vmem:[#allocation39_spill] sm:$0xff] }
 0x234   : > { %10691 = vmatprep.mubr.msk.bf16.mxu0 %vm947_vm3, %v15696_v35  ;;  %v15711_v35 = vld [vmem:[#allocation113_spill] sm:$0xff] }
 0x23a   : > { %10232 = vmatmul.mubr.msk.bf16.gmra.mrb[16].mxu1 %vm947_vm3, %v15697_v28  ;;  %v3888_v28 = vld [vmem:[%s15071_s3 + $0x14] sm:$0x3] }
 0x23b   : > { %10692 = vmatmul.mubr.msk.bf16.vlgmr.msra.gmra.mrb[0].mxu0 %vm947_vm3, %v15698_v46  ;;  %10235 = vmatprep.mubr.msk.bf16.mxu1 %vm947_vm3, %v15699_v20  ;;  %v15718_v20 = vld [vmem:[#allocation58_spill] sm:$0xff] }
 0x23c   : > { %10724 = vmatpush3.bf16.msra.mxu0 %v7572_v40  ;;  %10695 = vmatprep.mubr.msk.bf16.mxu0 %vm947_vm3, %v15700_v29  ;;  %v15712_v40 = vld [vmem:[#allocation4_spill] sm:$0xff] }
 0x23d   : > { %11751 = vmatprep.subr.msk.bf16.mxu0 %vm996_vm0, %v7782_v44  ;;  %v15731_v44 = vld [vmem:[#allocation94_spill] sm:$0xff] }
 0x242   : > { %10236 = vmatmul.mubr.msk.bf16.gmra.mrb[20].mxu1 %vm947_vm3, %v15701_v33  ;;  %v14578_v33 = vld [vmem:[%s13572_s26 + $0xc0] sm:$0xf] }
 0x243   : > { %10696 = vmatmul.mubr.msk.bf16.gmra.mrb[4].mxu0 %vm947_vm3, %v15702_v49  ;;  %10239 = vmatprep.mubr.msk.bf16.mxu1 %vm947_vm3, %v15703_v63  ;;  %v14581_v63 = vld [vmem:[%s13572_s26 + $0xc4] sm:$0xf] }
 0x244   : > { %10699 = vmatprep.mubr.msk.bf16.mxu0 %vm947_vm3, %v15704_v31  ;;  %v14585_v48 = vcombine.low %v14578_v33, %v14581_v63 }
 0x24a   : > { %10240 = vmatmul.mubr.msk.bf16.gmra.mrb[24].mxu1 %vm947_vm3, %v15705_v61  ;;  %v14601_v61 = vld [vmem:[%s15071_s3 + $0x30] sm:$0x3] }
 0x24b   : > { %10700 = vmatmul.mubr.msk.bf16.gmra.mrb[8].mxu0 %vm947_vm3, %v15706_v3  ;;  %10243 = vmatprep.mubr.msk.bf16.mxu1 %vm947_vm3, %v15707_v24  ;;  %v15728_v24 = vld [vmem:[#allocation130_spill] sm:$0xff] }
 0x24c   : > { %10703 = vmatprep.mubr.msk.bf16.mxu0 %vm947_vm3, %v15708_v39 }
 0x252   : > { %10244 = vmatmul.mubr.msk.bf16.gmra.mrb[28].mxu1 %vm947_vm3, %v9037_v54  ;;  %v15732_v54 = vld [vmem:[#allocation132_spill] sm:$0xff] }
 0x253   : > { %10704 = vmatmul.mubr.msk.bf16.gmra.mrb[12].mxu0 %vm947_vm3, %v15709_v14  ;;  %10249 = vmatprep.mubr.msk.bf16.mxu1 %vm947_vm3, %v15710_v53  ;;  %v15733_v53 = vld [vmem:[#allocation47_spill] sm:$0xff] }
 0x254   : > { %10707 = vmatprep.mubr.msk.bf16.mxu0 %vm947_vm3, %v15711_v35 }
 0x25a   : > { %10250 = vmatmul.mubr.msk.bf16.vlgmr.msra.gmra.mrb[0].mxu1 %vm947_vm3, %v15712_v40  ;;  %v15734_v40 = vld [vmem:[#allocation133_spill] sm:$0xff] }
 0x25b   : > { %10282 = vmatpush3.bf16.msra.mxu1 %v3309_v27  ;;  %10708 = vmatmul.mubr.msk.bf16.gmra.mrb[16].mxu0 %vm947_vm3, %v15713_v0  ;;  %v2967_v27 = vrot.slane %v14363_v45, 5 }
 0x25c   : > { %10253 = vmatprep.mubr.msk.bf16.mxu1 %vm947_vm3, %v15714_v38  ;;  %10711 = vmatprep.mubr.msk.bf16.mxu0 %vm947_vm3, %v15715_v15  ;;  %v9055_v38 = vrot.slane %v14360_v2, 9 }
 0x25d   : > { %11737 = vmatprep.subr.msk.bf16.mxu1 %vm996_vm0, %v3888_v28 }
 0x25e   : > { %v2968_v45 = vsel %vm12434_vm7, %v9055_v38, %v2967_v27 }
 0x262   : > { %10254 = vmatmul.mubr.msk.bf16.gmra.mrb[4].mxu1 %vm947_vm3, %v15716_v26  ;;  %v2969_v26 = vrot.slane %v2967_v27, 4  ;;  %v11921_v27 = vld [vmem:[%s12112_s7 + $0x10] sm:$0xf] }
 0x263   : > { %10712 = vmatmul.mubr.msk.bf16.gmra.mrb[20].mxu0 %vm947_vm3, %v15717_v55  ;;  %10257 = vmatprep.mubr.msk.bf16.mxu1 %vm947_vm3, %v15718_v20  ;;  %v2970_v20 = vrot.slane %v14516_v7, 5  ;;  %v14635_v7 = vld [vmem:[%s12112_s7] sm:$0xf] }
 0x264   : > { %10715 = vmatprep.mubr.msk.bf16.mxu0 %vm947_vm3, %v15719_v47 }
 0x265   : > { %v2971_v2 = vsel %vm12434_vm7, %v2969_v26, %v2970_v20  ;;  %v3986_v26 = vsel %vm996_vm0, %v3888_v28, 0  ;;  %v7550_v28 = vshll.u32 %v14581_v63, 16 }
 0x26a   : > { %10258 = vmatmul.mubr.msk.bf16.gmra.mrb[8].mxu1 %vm947_vm3, %v15720_v50  ;;  %v15735_v50 = vld [vmem:[#allocation54_spill] sm:$0xff] }
 0x26b   : > { %10716 = vmatmul.mubr.msk.bf16.gmra.mrb[24].mxu0 %vm947_vm3, %v15721_v19  ;;  %10261 = vmatprep.mubr.msk.bf16.mxu1 %vm947_vm3, %v15722_v30  ;;  %v15736_v30 = vld [vmem:[#allocation134_spill] sm:$0xff] }
 0x26c   : > { %10719 = vmatprep.mubr.msk.bf16.mxu0 %vm947_vm3, %v15723_v41 }
 0x272   : > { %10262 = vmatmul.mubr.msk.bf16.gmra.mrb[12].mxu1 %vm947_vm3, %v15724_v21  ;;  %v15737_v21 = vld [vmem:[#allocation135_spill] sm:$0xff] }
 0x273   : > { %10720 = vmatmul.mubr.msk.bf16.gmra.mrb[28].mxu0 %vm947_vm3, %v14585_v48  ;;  %10265 = vmatprep.mubr.msk.bf16.mxu1 %vm947_vm3, %v15725_v18  ;;  %v15738_v18 = vld [vmem:[#allocation136_spill] sm:$0xff] }
 0x274   : > { %10725 = vmatprep.mubr.msk.bf16.mxu0 %vm947_vm3, %v15726_v6  ;;  %v14638_v6 = vld [vmem:[%s12112_s7 + $0x4] sm:$0xf] }
 0x27a   : > { %10266 = vmatmul.mubr.msk.bf16.gmra.mrb[16].mxu1 %vm947_vm3, %v15727_v58  ;;  %v9073_v58 = vcombine.low %v14635_v7, %v14638_v6 }
 0x27b   : > { %10726 = vmatmul.mubr.msk.bf16.vlgmr.msra.gmra.mrb[0].mxu0 %vm947_vm3, %v15728_v24  ;;  %10269 = vmatprep.mubr.msk.bf16.mxu1 %vm947_vm3, %v15729_v42  ;;  %v15739_v42 = vld [vmem:[#allocation137_spill] sm:$0xff] }
 0x27c   : > { %10758 = vmatpush3.bf16.msra.mxu0 %v7787_v5  ;;  %10729 = vmatprep.mubr.msk.bf16.mxu0 %vm947_vm3, %v15730_v17  ;;  %v9056_v5 = vcombine.low %v2968_v45, %v2971_v2  ;;  %v7554_v45 = vshrl.u32 %v14581_v63, 16  ;;  %v15741_v2 = vld [vmem:[#allocation77_spill] sm:$0xff] }
 0x27d   : > { %11752 = vmatprep.subr.msk.bf16.mxu0 %vm996_vm0, %v14601_v61 }
 0x282   : > { %10270 = vmatmul.mubr.msk.bf16.gmra.mrb[20].mxu1 %vm947_vm3, %v15731_v44  ;;  %v14651_v44 = vld [vmem:[%s15071_s3 + $0x14] ss:$0 sps:$4 sm:$0xcc]  }
 0x283   : > { %10730 = vmatmul.mubr.msk.bf16.gmra.mrb[4].mxu0 %vm947_vm3, %v15732_v54  ;;  %10273 = vmatprep.mubr.msk.bf16.mxu1 %vm947_vm3, %v15733_v53  ;;  %v11920_v53 = vld [vmem:[%s12112_s7 + $0xc] sm:$0xf]  ;;  %v15346_v20 = vrot.slane %v14651_v44, 2 }
 0x284   : > { %10733 = vmatprep.mubr.msk.bf16.mxu0 %vm947_vm3, %v15734_v40  ;;  %v14655_v38 = vcombine.low %v11920_v53, %v11921_v27  ;;  %v7552_v53 = vrot.slane %v7550_v28, 5  ;;  %v7556_v27 = vrot.slane %v7554_v45, 4 }
 0x286   : > { %15740 = vst [vmem:[#allocation5_spill] sm:$0xff] %v14655_v38 }
 0x28a   : > { %10274 = vmatmul.mubr.msk.bf16.gmra.mrb[24].mxu1 %vm947_vm3, %v15735_v50  ;;  %v7541_v50 = vshrl.u32 %v14578_v33, 16 }
 0x28b   : > { %10734 = vmatmul.mubr.msk.bf16.gmra.mrb[8].mxu0 %vm947_vm3, %v15736_v30  ;;  %10277 = vmatprep.mubr.msk.bf16.mxu1 %vm947_vm3, %v15737_v21  ;;  %v7544_v21 = vshll.u32 %v14578_v33, 16 }
 0x28c   : > { %10737 = vmatprep.mubr.msk.bf16.mxu0 %vm947_vm3, %v15738_v18 }
 0x292   : > { %10278 = vmatmul.mubr.msk.bf16.gmra.mrb[28].mxu1 %vm947_vm3, %v9056_v5  ;;  %v7543_v5 = vrot.slane %v7541_v50, 4 }
 0x293   : > { %10738 = vmatmul.mubr.msk.bf16.gmra.mrb[12].mxu0 %vm947_vm3, %v15739_v42  ;;  %10283 = vmatprep.mubr.msk.bf16.mxu1 %vm947_vm3, %v9073_v58  ;;  %v7546_v58 = vrot.slane %v7544_v21, 5 }
 0x294   : > { %10741 = vmatprep.mubr.msk.bf16.mxu0 %vm947_vm3, %v14161_v57 }
 0x29a   : > { %10284 = vmatmul.mubr.msk.bf16.vlgmr.msra.gmra.mrb[0].mxu1 %vm947_vm3, %v14655_v38  ;;  %v15744_v38 = vld [vmem:[#allocation84_spill] sm:$0xff] }
 0x29b   : > { %10316 = vmatpush3.bf16.msra.mxu1 %v3986_v26  ;;  %10742 = vmatmul.mubr.msk.bf16.gmra.mrb[16].mxu0 %vm947_vm3, %v14172_v9  ;;  %v14675_v26 = vld [vmem:[%s13572_s26 + $0xc8] sm:$0x1]  ;;  %v15742_v9 = vld [vmem:[#allocation80_spill] sm:$0xff] }
 0x29c   : > { %10287 = vmatprep.mubr.msk.bf16.mxu1 %vm947_vm3, %v15741_v2  ;;  %10745 = vmatprep.mubr.msk.bf16.mxu0 %vm947_vm3, %v14211_v1  ;;  %v15743_v2 = vld [vmem:[#allocation83_spill] sm:$0xff]  ;;  %v7547_v1 = vor.u32 %v7546_v58, %v7543_v5  ;;  %v7560_v50 = vshll.u32 %v14675_v26, 16  ;;  %v15747_v58 = vld [vmem:[#allocation88_spill] sm:$0xff] }
 0x29d   : > { %11738 = vmatprep.subr.msk.bf16.mxu1 %vm996_vm0, %v15346_v20  ;;  %v7557_v20 = vor.u32 %v7556_v27, %v7552_v53  ;;  %v15748_v27 = vld [vmem:[#allocation18_spill] sm:$0xff] }
 0x29e   : > { %v7548_v21 = vrot.slane %v7547_v1, 4  ;;  %v7562_v28 = vrot.slane %v7560_v50, 5  ;;  %v7992_v50 = vsel %vm996_vm0, %v14601_v61, 0  ;;  %v3514_v61 = vshll.u32 %v14638_v6, 16 }
 0x29f   : > { %v7558_v45 = vrot.slane %v7557_v20, 4 }
 0x2a0   : > { %v7553_v5 = vsel %vm12087_vm4, %v7548_v21, %v7552_v53  ;;  %v14711_v53 = vld [vmem:[%s15071_s3 + $0x30] ss:$0 sps:$4 sm:$0xcc]  }
 0x2a1   : > { %v7563_v1 = vsel %vm12087_vm4, %v7558_v45, %v7562_v28  ;;  %v15352_v21 = vrot.slane %v14711_v53, 2  ;;  %v15749_v45 = vld [vmem:[#allocation65_spill] sm:$0xff]  ;;  %v15750_v28 = vld [vmem:[#allocation16_spill] sm:$0xff] }
 0x2a2   : > { %10288 = vmatmul.mubr.msk.bf16.gmra.mrb[4].mxu1 %vm947_vm3, %v15742_v9  ;;  %v14698_v20 = vcombine.low %v7553_v5, %v7563_v1  ;;  %v3508_v5 = vshll.u32 %v14635_v7, 16  ;;  %v3518_v1 = vshrl.u32 %v14638_v6, 16 }
 0x2a3   : > { %10746 = vmatmul.mubr.msk.bf16.gmra.mrb[20].mxu0 %vm947_vm3, %v14213_v51  ;;  %10291 = vmatprep.mubr.msk.bf16.mxu1 %vm947_vm3, %v15743_v2  ;;  %v15745_v51 = vld [vmem:[#allocation87_spill] sm:$0xff] }
 0x2a4   : > { %10749 = vmatprep.mubr.msk.bf16.mxu0 %vm947_vm3, %v14236_v32  ;;  %15746 = vst [vmem:[#allocation119_spill] sm:$0xff] %v14698_v20 }
 0x2aa   : > { %10292 = vmatmul.mubr.msk.bf16.gmra.mrb[8].mxu1 %vm947_vm3, %v15744_v38 }
 0x2ab   : > { %10750 = vmatmul.mubr.msk.bf16.gmra.mrb[24].mxu0 %vm947_vm3, %v14238_v37  ;;  %10295 = vmatprep.mubr.msk.bf16.mxu1 %vm947_vm3, %v15745_v51 }
 0x2ac   : > { %10753 = vmatprep.mubr.msk.bf16.mxu0 %vm947_vm3, %v14260_v60  ;;  %v15753_v60 = vld [vmem:[#allocation72_spill] sm:$0xff] }
 0x2b2   : > { %10296 = vmatmul.mubr.msk.bf16.gmra.mrb[12].mxu1 %vm947_vm3, %v15747_v58  ;;  %v15751_v58 = vld [vmem:[#allocation67_spill] sm:$0xff] }
 0x2b3   : > { %10754 = vmatmul.mubr.msk.bf16.gmra.mrb[28].mxu0 %vm947_vm3, %v14698_v20  ;;  %10299 = vmatprep.mubr.msk.bf16.mxu1 %vm947_vm3, %v15748_v27  ;;  %v3516_v27 = vrot.slane %v3514_v61, 5  ;;  %v14732_v20 = vld [vmem:[%s12112_s7 + $0x8] sm:$0x1] }
 0x2b4   : > { %10759 = vmatprep.mubr.msk.bf16.mxu0 %vm947_vm3, %v14283_v10  ;;  %v3505_v10 = vshrl.u32 %v14635_v7, 16 }
 0x2ba   : > { %10300 = vmatmul.mubr.msk.bf16.gmra.mrb[16].mxu1 %vm947_vm3, %v15749_v45  ;;  %v3510_v45 = vrot.slane %v3508_v5, 5 }
 0x2bb   : > { %10760 = vmatmul.mubr.msk.bf16.vlgmr.msra.gmra.mrb[0].mxu0 %vm947_vm3, %v14285_v43  ;;  %10303 = vmatprep.mubr.msk.bf16.mxu1 %vm947_vm3, %v15750_v28  ;;  %v3507_v43 = vrot.slane %v3505_v10, 4  ;;  %v3520_v28 = vrot.slane %v3518_v1, 4  ;;  %v3524_v10 = vshll.u32 %v14732_v20, 16 }
 0x2bc   : > { %10792 = vmatpush3.bf16.msra.mxu0 %v7992_v50  ;;  %10763 = vmatprep.mubr.msk.bf16.mxu0 %vm947_vm3, %v14319_v12  ;;  %v15752_v50 = vld [vmem:[#allocation38_spill] sm:$0xff] }
 0x2bd   : > { %11753 = vmatprep.subr.msk.bf16.mxu0 %vm996_vm0, %v15352_v21  ;;  %v3511_v12 = vor.u32 %v3510_v45, %v3507_v43  ;;  %v3521_v21 = vor.u32 %v3520_v28, %v3516_v27  ;;  %v3526_v61 = vrot.slane %v3524_v10, 5  ;;  %v15755_v45 = vld [vmem:[#allocation73_spill] sm:$0xff]  ;;  %v15756_v28 = vrot.slane %v14651_v44, 2  ;;  %v15759_v44 = vld [vmem:[#allocation10_spill] sm:$0xff] }
 0x2bf   : > { %v3512_v5 = vrot.slane %v3511_v12, 4  ;;  %v3522_v1 = vrot.slane %v3521_v21, 4  ;;  %v4411_v10 = vsel %vm996_vm0, %v15756_v28, 0  ;;  %v7773_v28 = vrot.slane %v14675_v26, 5  ;;  %v15763_v26 = vld [vmem:[#allocation20_spill] sm:$0xff] }
 0x2c1   : > { %v3517_v43 = vsel %vm12087_vm4, %v3512_v5, %v3516_v27  ;;  %v3527_v12 = vsel %vm12087_vm4, %v3522_v1, %v3526_v61  ;;  %v15757_v27 = vld [vmem:[#allocation6_spill] sm:$0xff]  ;;  %v4606_v5 = vld [vmem:[%s15071_s3 + $0x18] sm:$0x3]  ;;  %v15758_v1 = vld [vmem:[#allocation7_spill] sm:$0xff] }
 0x2c2   : > { %10304 = vmatmul.mubr.msk.bf16.gmra.mrb[20].mxu1 %vm947_vm3, %v15751_v58  ;;  %v9106_v21 = vcombine.low %v3517_v43, %v3527_v12  ;;  %v15760_v61 = vld [vmem:[#allocation11_spill] sm:$0xff]  ;;  %v7770_v43 = vrot.slane %v14581_v63, 5  ;;  %v9442_v12 = vrot.slane %v14578_v33, 9 }
 0x2c3   : > { %10764 = vmatmul.mubr.msk.bf16.gmra.mrb[4].mxu0 %vm947_vm3, %v14321_v62  ;;  %10307 = vmatprep.mubr.msk.bf16.mxu1 %vm947_vm3, %v15752_v50  ;;  %v15754_v62 = vld [vmem:[#allocation45_spill] sm:$0xff] }
 0x2c4   : > { %10767 = vmatprep.mubr.msk.bf16.mxu0 %vm947_vm3, %v14345_v23  ;;  %v7771_v63 = vsel %vm12434_vm7, %v9442_v12, %v7770_v43  ;;  %v15766_v12 = vld [vmem:[#allocation55_spill] sm:$0xff] }
 0x2ca   : > { %10308 = vmatmul.mubr.msk.bf16.gmra.mrb[24].mxu1 %vm947_vm3, %v15753_v60 }
 0x2cb   : > { %10768 = vmatmul.mubr.msk.bf16.gmra.mrb[8].mxu0 %vm947_vm3, %v14347_v8  ;;  %10311 = vmatprep.mubr.msk.bf16.mxu1 %vm947_vm3, %v15754_v62 }
 0x2cc   : > { %10771 = vmatprep.mubr.msk.bf16.mxu0 %vm947_vm3, %v14379_v22 }
 0x2d2   : > { %10312 = vmatmul.mubr.msk.bf16.gmra.mrb[28].mxu1 %vm947_vm3, %v15755_v45 }
 0x2d3   : > { %10772 = vmatmul.mubr.msk.bf16.gmra.mrb[12].mxu0 %vm947_vm3, %v14381_v56  ;;  %10317 = vmatprep.mubr.msk.bf16.mxu1 %vm947_vm3, %v9106_v21  ;;  %v7772_v21 = vrot.slane %v7770_v43, 4 }
 0x2d4   : > { %10775 = vmatprep.mubr.msk.bf16.mxu0 %vm947_vm3, %v14411_v4 }
 0x2d5   : > { %v7774_v33 = vsel %vm12434_vm7, %v7772_v21, %v7773_v28  ;;  %v8426_v21 = vld [vmem:[%s15071_s3 + $0x34] sm:$0x3]  ;;  %v15767_v28 = vld [vmem:[#allocation31_spill] sm:$0xff] }
 0x2da   : > { %10318 = vmatmul.mubr.msk.bf16.vlgmr.msra.gmra.mrb[0].mxu1 %vm947_vm3, %v15757_v27  ;;  %v15762_v27 = vld [vmem:[#allocation15_spill] sm:$0xff] }
 0x2db   : > { %10350 = vmatpush3.bf16.msra.mxu1 %v4411_v10  ;;  %10776 = vmatmul.mubr.msk.bf16.gmra.mrb[16].mxu0 %vm947_vm3, %v14413_v25  ;;  %v15761_v10 = vld [vmem:[#allocation14_spill] sm:$0xff] }
 0x2dc   : > { %10321 = vmatprep.mubr.msk.bf16.mxu1 %vm947_vm3, %v15758_v1  ;;  %10779 = vmatprep.mubr.msk.bf16.mxu0 %vm947_vm3, %v14441_v13  ;;  %v14800_v1 = vcombine.low %v7771_v63, %v7774_v33  ;;  %v15770_v63 = vld [vmem:[#allocation41_spill] sm:$0xff]  ;;  %v15774_v33 = vld [vmem:[#allocation24_spill] sm:$0xff] }
 0x2dd   : > { %11739 = vmatprep.subr.msk.bf16.mxu1 %vm996_vm0, %v4606_v5 }
 0x2e2   : > { %10322 = vmatmul.mubr.msk.bf16.gmra.mrb[4].mxu1 %vm947_vm3, %v15759_v44  ;;  %v15764_v44 = vld [vmem:[#allocation21_spill] sm:$0xff] }
 0x2e3   : > { %10780 = vmatmul.mubr.msk.bf16.gmra.mrb[20].mxu0 %vm947_vm3, %v14443_v16  ;;  %10325 = vmatprep.mubr.msk.bf16.mxu1 %vm947_vm3, %v15760_v61  ;;  %v15765_v61 = vrot.slane %v14711_v53, 2  ;;  %v15769_v53 = vld [vmem:[#allocation36_spill] sm:$0xff] }
 0x2e4   : > { %10783 = vmatprep.mubr.msk.bf16.mxu0 %vm947_vm3, %v14466_v59 }
 0x2e5   : > { %v8223_v43 = vsel %vm996_vm0, %v15765_v61, 0  ;;  %v15781_v61 = vld [vmem:[#allocation44_spill] sm:$0xff] }
 0x2ea   : > { %10326 = vmatmul.mubr.msk.bf16.gmra.mrb[8].mxu1 %vm947_vm3, %v15761_v10  ;;  %v9138_v10 = vrot.slane %v14635_v7, 9 }
 0x2eb   : > { %10784 = vmatmul.mubr.msk.bf16.gmra.mrb[24].mxu0 %vm947_vm3, %v14468_v34  ;;  %10329 = vmatprep.mubr.msk.bf16.mxu1 %vm947_vm3, %v15762_v27 }
 0x2ec   : > { %10787 = vmatprep.mubr.msk.bf16.mxu0 %vm947_vm3, %v14484_v52 }
 0x2f2   : > { %10330 = vmatmul.mubr.msk.bf16.gmra.mrb[12].mxu1 %vm947_vm3, %v15763_v26  ;;  %v14883_v26 = vld [vmem:[%s13572_s26 + $0xcc] sm:$0xf] }
 0x2f3   : > { %10788 = vmatmul.mubr.msk.bf16.gmra.mrb[28].mxu0 %vm947_vm3, %v14800_v1  ;;  %10333 = vmatprep.mubr.msk.bf16.mxu1 %vm947_vm3, %v15764_v44 }
 0x2f4   : > { %10793 = vmatprep.mubr.msk.bf16.mxu0 %vm947_vm3, %v15698_v46  ;;  %v15768_v46 = vld [vmem:[#allocation33_spill] sm:$0xff] }
 0x2fa   : > { %10334 = vmatmul.mubr.msk.bf16.gmra.mrb[16].mxu1 %vm947_vm3, %v15766_v12 }
 0x2fb   : > { %10794 = vmatmul.mubr.msk.bf16.vlgmr.msra.gmra.mrb[0].mxu0 %vm947_vm3, %v15700_v29  ;;  %10337 = vmatprep.mubr.msk.bf16.mxu1 %vm947_vm3, %v15767_v28  ;;  %v4199_v29 = vrot.slane %v14638_v6, 5 }
 0x2fc   : > { %10826 = vmatpush3.bf16.msra.mxu0 %v8223_v43  ;;  %10797 = vmatprep.mubr.msk.bf16.mxu0 %vm947_vm3, %v15702_v49  ;;  %v4202_v49 = vrot.slane %v14732_v20, 5  ;;  %v15772_v20 = vld [vmem:[#allocation50_spill] sm:$0xff]  ;;  %v15783_v43 = vld [vmem:[#allocation51_spill] sm:$0xff] }
 0x2fd   : > { %11754 = vmatprep.subr.msk.bf16.mxu0 %vm996_vm0, %v8426_v21  ;;  %v4201_v27 = vrot.slane %v4199_v29, 4 }
 0x2ff   : > { %v4203_v7 = vsel %vm12434_vm7, %v4201_v27, %v4202_v49  ;;  %v15793_v27 = vld [vmem:[#allocation112_spill] sm:$0xff]  ;;  %v8191_v49 = vshll.u32 %v14883_v26, 16 }
 0x302   : > { %10338 = vmatmul.mubr.msk.bf16.gmra.mrb[20].mxu1 %vm947_vm3, %v15768_v46 }
 0x303   : > { %10798 = vmatmul.mubr.msk.bf16.gmra.mrb[4].mxu0 %vm947_vm3, %v15704_v31  ;;  %10341 = vmatprep.mubr.msk.bf16.mxu1 %vm947_vm3, %v15769_v53  ;;  %v15771_v31 = vld [vmem:[#allocation48_spill] sm:$0xff] }
 0x304   : > { %10801 = vmatprep.mubr.msk.bf16.mxu0 %vm947_vm3, %v15706_v3  ;;  %v4200_v3 = vsel %vm12434_vm7, %v9138_v10, %v4199_v29  ;;  %v15784_v29 = vld [vmem:[#allocation53_spill] sm:$0xff]  ;;  %v15792_v10 = vld [vmem:[#allocation3_spill] sm:$0xff] }
 0x305   : > { %v9154_v6 = vcombine.low %v4200_v3, %v4203_v7  ;;  %v15794_v3 = vld [vmem:[#allocation57_spill] sm:$0xff] }
 0x30a   : > { %10342 = vmatmul.mubr.msk.bf16.gmra.mrb[24].mxu1 %vm947_vm3, %v15770_v63 }
 0x30b   : > { %10802 = vmatmul.mubr.msk.bf16.gmra.mrb[8].mxu0 %vm947_vm3, %v15708_v39  ;;  %10345 = vmatprep.mubr.msk.bf16.mxu1 %vm947_vm3, %v15771_v31  ;;  %v4616_v39 = vsel %vm996_vm0, %v4606_v5, 0  ;;  %v15777_v5 = vld [vmem:[#allocation29_spill] sm:$0xff] }
 0x30c   : > { %10805 = vmatprep.mubr.msk.bf16.mxu0 %vm947_vm3, %v15709_v14  ;;  %v15773_v14 = vld [vmem:[#allocation23_spill] sm:$0xff] }
 0x312   : > { %10346 = vmatmul.mubr.msk.bf16.gmra.mrb[28].mxu1 %vm947_vm3, %v15772_v20 }
 0x313   : > { %10806 = vmatmul.mubr.msk.bf16.gmra.mrb[12].mxu0 %vm947_vm3, %v15711_v35  ;;  %10351 = vmatprep.mubr.msk.bf16.mxu1 %vm947_vm3, %v9154_v6  ;;  %v15775_v35 = vld [vmem:[#allocation2_spill] sm:$0xff] }
 0x314   : > { %10809 = vmatprep.mubr.msk.bf16.mxu0 %vm947_vm3, %v15713_v0  ;;  %v15776_v0 = vld [vmem:[#allocation27_spill] sm:$0xff] }
 0x31a   : > { %10352 = vmatmul.mubr.msk.bf16.vlgmr.msra.gmra.mrb[0].mxu1 %vm947_vm3, %v15773_v14 }
 0x31b   : > { %10384 = vmatpush3.bf16.msra.mxu1 %v4616_v39  ;;  %10810 = vmatmul.mubr.msk.bf16.gmra.mrb[16].mxu0 %vm947_vm3, %v15715_v15  ;;  %v15778_v15 = vld [vmem:[#allocation32_spill] sm:$0xff]  ;;  %v8193_v39 = vrot.slane %v8191_v49, 5 }
 0x31c   : > { %10355 = vmatprep.mubr.msk.bf16.mxu1 %vm947_vm3, %v15774_v33  ;;  %10813 = vmatprep.mubr.msk.bf16.mxu0 %vm947_vm3, %v15717_v55  ;;  %v15779_v55 = vld [vmem:[#allocation35_spill] sm:$0xff] }
 0x31d   : > { %11741 = vmatprep.subr.msk.bf16.mxu1 %vm996_vm0, %v15775_v35  ;;  %v505_v35 = vld [vmem:[%s13572_s26 + $0xd4] sm:$0x1] }
 0x322   : > { %10356 = vmatmul.mubr.msk.bf16.gmra.mrb[4].mxu1 %vm947_vm3, %v15776_v0 }
 0x323   : > { %10814 = vmatmul.mubr.msk.bf16.gmra.mrb[20].mxu0 %vm947_vm3, %v15719_v47  ;;  %10359 = vmatprep.mubr.msk.bf16.mxu1 %vm947_vm3, %v15777_v5  ;;  %v14886_v47 = vld [vmem:[%s13572_s26 + $0xd0] sm:$0xf]  ;;  %v8207_v5 = vshll.u32 %v505_v35, 16 }
 0x324   : > { %10817 = vmatprep.mubr.msk.bf16.mxu0 %vm947_vm3, %v15721_v19  ;;  %v9461_v44 = vcombine.low %v14883_v26, %v14886_v47  ;;  %v15780_v19 = vld [vmem:[#allocation40_spill] sm:$0xff]  ;;  %v8197_v7 = vshll.u32 %v14886_v47, 16 }
 0x326   : > { %v8199_v14 = vrot.slane %v8197_v7, 5 }
 0x32a   : > { %10360 = vmatmul.mubr.msk.bf16.gmra.mrb[8].mxu1 %vm947_vm3, %v15778_v15 }
 0x32b   : > { %10818 = vmatmul.mubr.msk.bf16.gmra.mrb[24].mxu0 %vm947_vm3, %v15723_v41  ;;  %10363 = vmatprep.mubr.msk.bf16.mxu1 %vm947_vm3, %v15779_v55  ;;  %v8434_v41 = vsel %vm996_vm0, %v8426_v21, 0  ;;  %v15787_v21 = vld [vmem:[#allocation69_spill] sm:$0xff] }
 0x32c   : > { %10821 = vmatprep.mubr.msk.bf16.mxu0 %vm947_vm3, %v14585_v48  ;;  %v15782_v48 = vld [vmem:[#allocation46_spill] sm:$0xff] }
 0x332   : > { %10364 = vmatmul.mubr.msk.bf16.gmra.mrb[12].mxu1 %vm947_vm3, %v15780_v19  ;;  %v15795_v19 = vld [vmem:[#allocation60_spill] sm:$0xff] }
 0x333   : > { %10822 = vmatmul.mubr.msk.bf16.gmra.mrb[28].mxu0 %vm947_vm3, %v9461_v44  ;;  %10367 = vmatprep.mubr.msk.bf16.mxu1 %vm947_vm3, %v15781_v61  ;;  %v8209_v44 = vrot.slane %v8207_v5, 5 }
 0x334   : > { %10827 = vmatprep.mubr.msk.bf16.mxu0 %vm947_vm3, %v15728_v24  ;;  %v15785_v24 = vld [vmem:[#allocation59_spill] sm:$0xff] }
 0x33a   : > { %10368 = vmatmul.mubr.msk.bf16.gmra.mrb[16].mxu1 %vm947_vm3, %v15782_v48  ;;  %v15800_v48 = vld [vmem:[#allocation68_spill] sm:$0xff] }
 0x33b   : > { %10828 = vmatmul.mubr.msk.bf16.vlgmr.msra.gmra.mrb[0].mxu0 %vm947_vm3, %v15730_v17  ;;  %10371 = vmatprep.mubr.msk.bf16.mxu1 %vm947_vm3, %v15783_v43  ;;  %v15786_v17 = vld [vmem:[#allocation61_spill] sm:$0xff]  ;;  %v15801_v43 = vld [vmem:[#allocation16_spill] sm:$0xff] }
 0x33c   : > { %10860 = vmatpush3.bf16.msra.mxu0 %v8434_v41  ;;  %10831 = vmatprep.mubr.msk.bf16.mxu0 %vm947_vm3, %v15732_v54  ;;  %v15788_v54 = vld [vmem:[#allocation71_spill] sm:$0xff]  ;;  %v15798_v41 = vld [vmem:[#allocation18_spill] sm:$0xff] }
 0x342   : > { %10372 = vmatmul.mubr.msk.bf16.gmra.mrb[20].mxu1 %vm947_vm3, %v15784_v29  ;;  %v15802_v29 = vld [vmem:[#allocation70_spill] sm:$0xff] }
 0x343   : > { %10832 = vmatmul.mubr.msk.bf16.gmra.mrb[4].mxu0 %vm947_vm3, %v15734_v40  ;;  %10375 = vmatprep.mubr.msk.bf16.mxu1 %vm947_vm3, %v15785_v24  ;;  %v15789_v40 = vld [vmem:[#allocation5_spill] sm:$0xff] }
 0x344   : > { %10835 = vmatprep.mubr.msk.bf16.mxu0 %vm947_vm3, %v15736_v30  ;;  %v15790_v30 = vld [vmem:[#allocation52_spill] sm:$0xff] }
 0x34a   : > { %10376 = vmatmul.mubr.msk.bf16.gmra.mrb[24].mxu1 %vm947_vm3, %v15786_v17 }
 0x34b   : > { %10836 = vmatmul.mubr.msk.bf16.gmra.mrb[8].mxu0 %vm947_vm3, %v15738_v18  ;;  %10379 = vmatprep.mubr.msk.bf16.mxu1 %vm947_vm3, %v15787_v21  ;;  %v15791_v18 = vld [vmem:[#allocation77_spill] sm:$0xff] }
 0x34c   : > { %10839 = vmatprep.mubr.msk.bf16.mxu0 %vm947_vm3, %v15739_v42  ;;  %v8188_v42 = vshrl.u32 %v14883_v26, 16 }
 0x34e   : > { %v8190_v6 = vrot.slane %v8188_v42, 4 }
 0x352   : > { %10380 = vmatmul.mubr.msk.bf16.gmra.mrb[28].mxu1 %vm947_vm3, %v15788_v54 }
 0x353   : > { %10840 = vmatmul.mubr.msk.bf16.gmra.mrb[12].mxu0 %vm947_vm3, %v14161_v57  ;;  %10385 = vmatprep.mubr.msk.bf16.mxu1 %vm947_vm3, %v15789_v40  ;;  %v8201_v57 = vshrl.u32 %v14886_v47, 16 }
 0x354   : > { %10843 = vmatprep.mubr.msk.bf16.mxu0 %vm947_vm3, %v15790_v30 }
 0x355   : > { %v8203_v33 = vrot.slane %v8201_v57, 4 }
 0x357   : > { %v8204_v0 = vor.u32 %v8203_v33, %v8199_v14 }
 0x359   : > { %v8205_v55 = vrot.slane %v8204_v0, 4 }
 0x35a   : > { %10386 = vmatmul.mubr.msk.bf16.vlgmr.msra.gmra.mrb[0].mxu1 %vm947_vm3, %v15791_v18 }
 0x35b   : > { %10894 = vmatpush3.bf16.msra.mxu1 %v15792_v10  ;;  %10844 = vmatmul.mubr.msk.bf16.gmra.mrb[16].mxu0 %vm947_vm3, %v15793_v27 }
 0x35c   : > { %10389 = vmatprep.mubr.msk.bf16.mxu1 %vm947_vm3, %v15742_v9  ;;  %10847 = vmatprep.mubr.msk.bf16.mxu0 %vm947_vm3, %v15794_v3  ;;  %v8194_v9 = vor.u32 %v8193_v39, %v8190_v6 }
 0x35e   : > { %v8195_v15 = vrot.slane %v8194_v9, 4 }
 0x362   : > { %10390 = vmatmul.mubr.msk.bf16.gmra.mrb[4].mxu1 %vm947_vm3, %v15743_v2  ;;  %v15796_v2 = vld [vmem:[#allocation88_spill] sm:$0xff] }
 0x363   : > { %10848 = vmatmul.mubr.msk.bf16.gmra.mrb[20].mxu0 %vm947_vm3, %v14236_v32  ;;  %10393 = vmatprep.mubr.msk.bf16.mxu1 %vm947_vm3, %v15744_v38  ;;  %v15797_v32 = vld [vmem:[#allocation119_spill] sm:$0xff]  ;;  %v8210_v38 = vsel %vm12087_vm4, %v8205_v55, %v8209_v44 }
 0x364   : > { %10851 = vmatprep.mubr.msk.bf16.mxu0 %vm947_vm3, %v14238_v37  ;;  %v8200_v37 = vsel %vm12087_vm4, %v8195_v15, %v8199_v14 }
 0x365   : > { %v9478_v61 = vcombine.low %v8200_v37, %v8210_v38 }
 0x36a   : > { %10394 = vmatmul.mubr.msk.bf16.gmra.mrb[8].mxu1 %vm947_vm3, %v15745_v51  ;;  %v15799_v51 = vld [vmem:[#allocation65_spill] sm:$0xff] }
 0x36b   : > { %10852 = vmatmul.mubr.msk.bf16.gmra.mrb[24].mxu0 %vm947_vm3, %v15795_v19  ;;  %10397 = vmatprep.mubr.msk.bf16.mxu1 %vm947_vm3, %v15796_v2 }
 0x36c   : > { %10855 = vmatprep.mubr.msk.bf16.mxu0 %vm947_vm3, %v15797_v32 }
 0x372   : > { %10398 = vmatmul.mubr.msk.bf16.gmra.mrb[12].mxu1 %vm947_vm3, %v15798_v41 }
 0x373   : > { %10856 = vmatmul.mubr.msk.bf16.gmra.mrb[28].mxu0 %vm947_vm3, %v9478_v61  ;;  %10401 = vmatprep.mubr.msk.bf16.mxu1 %vm947_vm3, %v15799_v51 }
 0x374   : > { %10861 = vmatprep.mubr.msk.bf16.mxu0 %vm947_vm3, %v15800_v48 }
 0x37a   : > { %10402 = vmatmul.mubr.msk.bf16.gmra.mrb[16].mxu1 %vm947_vm3, %v15801_v43 }
 0x37b   : > { %10862 = vmatmul.mubr.msk.bf16.vlgmr.msra.gmra.mrb[0].mxu0 %vm947_vm3, %v15802_v29  ;;  %10405 = vmatprep.mubr.msk.bf16.mxu1 %vm947_vm3, %v15751_v58  ;;  %v15804_v58 = vld [vmem:[#allocation62_spill] sm:$0xff] }
 0x37c   : > { %10865 = vmatprep.mubr.msk.bf16.mxu0 %vm947_vm3, %v15803_v36 }
 0x382   : > { %10406 = vmatmul.mubr.msk.bf16.gmra.mrb[20].mxu1 %vm947_vm3, %v15752_v50 }
 0x383   : > { %10866 = vmatmul.mubr.msk.bf16.gmra.mrb[4].mxu0 %vm947_vm3, %v14345_v23  ;;  %10409 = vmatprep.mubr.msk.bf16.mxu1 %vm947_vm3, %v15753_v60  ;;  %v8421_v60 = vrot.slane %v14886_v47, 5 }
 0x384   : > { %10869 = vmatprep.mubr.msk.bf16.mxu0 %vm947_vm3, %v14347_v8  ;;  %v8424_v8 = vrot.slane %v505_v35, 5 }
 0x385   : > { %v8423_v23 = vrot.slane %v8421_v60, 4 }
 0x38a   : > { %10410 = vmatmul.mubr.msk.bf16.gmra.mrb[24].mxu1 %vm947_vm3, %v15754_v62  ;;  %v9496_v62 = vrot.slane %v14883_v26, 9 }
 0x38b   : > { %10870 = vmatmul.mubr.msk.bf16.gmra.mrb[8].mxu0 %vm947_vm3, %v14379_v22  ;;  %10413 = vmatprep.mubr.msk.bf16.mxu1 %vm947_vm3, %v15755_v45 }
 0x38c   : > { %10873 = vmatprep.mubr.msk.bf16.mxu0 %vm947_vm3, %v14381_v56  ;;  %v8422_v22 = vsel %vm12434_vm7, %v9496_v62, %v8421_v60  ;;  %v8425_v56 = vsel %vm12434_vm7, %v8423_v23, %v8424_v8 }
 0x392   : > { %10414 = vmatmul.mubr.msk.bf16.gmra.mrb[28].mxu1 %vm947_vm3, %v15804_v58 }
 0x393   : > { %10874 = vmatmul.mubr.msk.bf16.gmra.mrb[12].mxu0 %vm947_vm3, %v14411_v4  ;;  %10435 = vmatprep.mubr.msk.bf16.mxu1 %vm947_vm3, %v15766_v12  ;;  %v9497_v4 = vcombine.low %v8422_v22, %v8425_v56 }
 0x394   : > { %10877 = vmatprep.mubr.msk.bf16.mxu0 %vm947_vm3, %v14413_v25  ;;  %v15805_v25 = vld [vmem:[#allocation49_spill] sm:$0xff] }
 0x39a   : > { %10436 = vmatmul.mubr.msk.bf16.vlgmr.msra.gmra.mrb[16].mxu1 %vm947_vm3, %v15767_v28 }
 0x39b   : > { %10878 = vmatmul.mubr.msk.bf16.gmra.mrb[16].mxu0 %vm947_vm3, %v14441_v13  ;;  %10439 = vmatprep.mubr.msk.bf16.mxu1 %vm947_vm3, %v15768_v46  ;;  %v11962_v13 = vmov 0  }
 0x39c   : > { %10881 = vmatprep.mubr.msk.bf16.mxu0 %vm947_vm3, %v14443_v16  ;;  %11800 = vset.pattern.permute.xlu1 %v11962_v13  ;;  %v8693_v16 = vld [vmem:[%s15072_s4] sm:$0xff] }
 0x39d   : > { %8696 = vperm.xlu1 %11800, %v8693_v16  }
 0x3a2   : > { %10440 = vmatmul.mubr.msk.bf16.gmra.mrb[20].mxu1 %vm947_vm3, %v15769_v53 }
 0x3a3   : > { %10882 = vmatmul.mubr.msk.bf16.gmra.mrb[20].mxu0 %vm947_vm3, %v14466_v59  ;;  %10443 = vmatprep.mubr.msk.bf16.mxu1 %vm947_vm3, %v15770_v63 }
 0x3a4   : > { %10885 = vmatprep.mubr.msk.bf16.mxu0 %vm947_vm3, %v14468_v34 }
 0x3aa   : > { %10444 = vmatmul.mubr.msk.bf16.gmra.mrb[24].mxu1 %vm947_vm3, %v15771_v31 }
 0x3ab   : > { %10886 = vmatmul.mubr.msk.bf16.gmra.mrb[24].mxu0 %vm947_vm3, %v14484_v52  ;;  %10447 = vmatprep.mubr.msk.bf16.mxu1 %vm947_vm3, %v15772_v20 }
 0x3ac   : > { %10889 = vmatprep.mubr.msk.bf16.mxu0 %vm947_vm3, %v14800_v1 }
 0x3b2   : > { %10448 = vmatmul.mubr.msk.bf16.gmra.mrb[28].mxu1 %vm947_vm3, %v15805_v25 }
 0x3b3   : > { %10890 = vmatmul.mubr.msk.bf16.gmra.mrb[28].mxu0 %vm947_vm3, %v9497_v4 }
 0x42d   : > { %v10387_v59 = vpop.f32.mrb[0].mxu1 }
 0x42e   : > { %v4652_v34 = vpop.f32.mrb[1].mxu1 }
 0x42f   : > { %v10388_v52 = vpop.f32.mrb[2].mxu1 }
 0x430   : > { %v4655_v50 = vpop.f32.mrb[3].mxu1 }
 0x435   : > { %v10391_v11 = vpop.f32.mrb[4].mxu1 }
 0x436   : > { %v4668_v45 = vpop.f32.mrb[5].mxu1 }
 0x437   : > { %v10392_v1 = vpop.f32.mrb[6].mxu1 }
 0x438   : > { %v4671_v12 = vpop.f32.mrb[7].mxu1 }
 0x43d   : > { %v10395_v28 = vpop.f32.mrb[8].mxu1 }
 0x43e   : > { %v4684_v46 = vpop.f32.mrb[9].mxu1 }
 0x43f   : > { %v10396_v53 = vpop.f32.mrb[10].mxu1 }
 0x440   : > { %v4687_v63 = vpop.f32.mrb[11].mxu1 }
 0x445   : > { %v10399_v31 = vpop.f32.mrb[12].mxu1 }
 0x446   : > { %v4700_v20 = vpop.f32.mrb[13].mxu1 }
 0x447   : > { %v10400_v26 = vpop.f32.mrb[14].mxu1 }
 0x448   : > { %v4703_v47 = vpop.f32.mrb[15].mxu1 }
 0x44e   : > { %v10863_v24 = vpop.f32.mrb[0].mxu0 }
 0x44f   : > { %v10895_v17 = vadd.f32 %v10863_v24, %v10387_v59  ;;  %v8470_v21 = vpop.f32.mrb[1].mxu0 }
 0x450   : > { %v10864_v54 = vpop.f32.mrb[2].mxu0  ;;  %v10896_v40 = vadd.f32 %v8470_v21, %v4652_v34 }
 0x451   : > { %v10897_v30 = vadd.f32 %v10864_v54, %v10388_v52  ;;  %v8473_v18 = vpop.f32.mrb[3].mxu0 }
 0x452   : > { %v10898_v10 = vadd.f32 %v8473_v18, %v4655_v50  ;;  %8629 = vxpose.xlu0.b32.start [1/16] (narrow) %v10896_v40, 8 }
 0x456   : > { %v10867_v27 = vpop.f32.mrb[4].mxu0  ;;  %8630 = vxpose.xlu0.b32.cont [2/16] (narrow) %v10898_v10, 8 }
 0x457   : > { %v10899_v42 = vadd.f32 %v10867_v27, %v10391_v11  ;;  %v8486_v49 = vpop.f32.mrb[5].mxu0 }
 0x458   : > { %v10900_v57 = vadd.f32 %v8486_v49, %v4668_v45  ;;  %v10868_v3 = vpop.f32.mrb[6].mxu0 }
 0x459   : > { %v10901_v7 = vadd.f32 %v10868_v3, %v10392_v1  ;;  %v8489_v6 = vpop.f32.mrb[7].mxu0 }
 0x45a   : > { %v10902_v39 = vadd.f32 %v8489_v6, %v4671_v12  ;;  %8631 = vxpose.xlu0.b32.cont [3/16] (narrow) %v10895_v17, 8 }
 0x45e   : > { %v10871_v14 = vpop.f32.mrb[8].mxu0  ;;  %8632 = vxpose.xlu0.b32.cont [4/16] (narrow) %v10897_v30, 8 }
 0x45f   : > { %v10903_v33 = vadd.f32 %v10871_v14, %v10395_v28  ;;  %v8502_v35 = vpop.f32.mrb[9].mxu0 }
 0x460   : > { %v10904_v9 = vadd.f32 %v8502_v35, %v4684_v46  ;;  %v10872_v0 = vpop.f32.mrb[10].mxu0 }
 0x461   : > { %v10905_v5 = vadd.f32 %v10872_v0, %v10396_v53  ;;  %v8505_v15 = vpop.f32.mrb[11].mxu0 }
 0x462   : > { %v10906_v55 = vadd.f32 %v8505_v15, %v4687_v63  ;;  %8633 = vxpose.xlu0.b32.cont [5/16] (narrow) %v10900_v57, 8 }
 0x466   : > { %v10875_v44 = vpop.f32.mrb[12].mxu0  ;;  %8634 = vxpose.xlu0.b32.cont [6/16] (narrow) %v10902_v39, 8 }
 0x467   : > { %v15040_v19 = vadd.f32 %v10875_v44, %v10399_v31  ;;  %v8518_v2 = vpop.f32.mrb[13].mxu0 }
 0x468   : > { %v10908_v32 = vadd.f32 %v8518_v2, %v4700_v20  ;;  %v10876_v37 = vpop.f32.mrb[14].mxu0 }
 0x469   : > { %v15042_v38 = vadd.f32 %v10876_v37, %v10400_v26  ;;  %v8521_v61 = vpop.f32.mrb[15].mxu0 }
 0x46a   : > { %v10910_v41 = vadd.f32 %v8521_v61, %v4703_v47  ;;  %8635 = vxpose.xlu0.b32.cont [7/16] (narrow) %v10899_v42, 8 }
 0x46d   : > { %v10437_v51 = vpop.f32.mrb[16].mxu1 }
 0x46e   : > { %v10879_v48 = vpop.f32.mrb[16].mxu0  ;;  %8636 = vxpose.xlu0.b32.cont [8/16] (narrow) %v10901_v7, 8  ;;  %v4947_v43 = vpop.f32.mrb[17].mxu1 }
 0x46f   : > { %v10911_v29 = vadd.f32 %v10879_v48, %v10437_v51  ;;  %v10438_v36 = vpop.f32.mrb[18].mxu1  ;;  %v8534_v58 = vpop.f32.mrb[17].mxu0 }
 0x470   : > { %v10912_v60 = vadd.f32 %v8534_v58, %v4947_v43  ;;  %v4950_v62 = vpop.f32.mrb[19].mxu1  ;;  %v10880_v23 = vpop.f32.mrb[18].mxu0 }
 0x471   : > { %v10913_v8 = vadd.f32 %v10880_v23, %v10438_v36  ;;  %v8537_v22 = vpop.f32.mrb[19].mxu0 }
 0x472   : > { %v10914_v56 = vadd.f32 %v8537_v22, %v4950_v62  ;;  %8637 = vxpose.xlu0.b32.cont [9/16] (narrow) %v10904_v9, 8  ;;  %8661 = vxpose.xlu1.b32.start [1/16] (narrow) %v10912_v60, 8 }
 0x475   : > { %v10441_v4 = vpop.f32.mrb[20].mxu1 }
 0x476   : > { %v10883_v25 = vpop.f32.mrb[20].mxu0  ;;  %8638 = vxpose.xlu0.b32.cont [10/16] (narrow) %v10906_v55, 8  ;;  %8662 = vxpose.xlu1.b32.cont [2/16] (narrow) %v10914_v56, 8  ;;  %v4963_v16 = vpop.f32.mrb[21].mxu1 }
 0x477   : > { %v10915_v59 = vadd.f32 %v10883_v25, %v10441_v4  ;;  %v10442_v34 = vpop.f32.mrb[22].mxu1  ;;  %v8550_v52 = vpop.f32.mrb[21].mxu0 }
 0x478   : > { %v10916_v50 = vadd.f32 %v8550_v52, %v4963_v16  ;;  %v4966_v11 = vpop.f32.mrb[23].mxu1  ;;  %v10884_v45 = vpop.f32.mrb[22].mxu0 }
 0x479   : > { %v10917_v1 = vadd.f32 %v10884_v45, %v10442_v34  ;;  %v8553_v12 = vpop.f32.mrb[23].mxu0 }
 0x47a   : > { %v10918_v28 = vadd.f32 %v8553_v12, %v4966_v11  ;;  %8639 = vxpose.xlu0.b32.cont [11/16] (narrow) %v10903_v33, 8  ;;  %8663 = vxpose.xlu1.b32.cont [3/16] (narrow) %v10911_v29, 8  ;;  %v8697_v33 = vpop.permute.xlu1 %8696 }
 0x47d   : > { %v10445_v46 = vpop.f32.mrb[24].mxu1 }
 0x47e   : > { %v10887_v53 = vpop.f32.mrb[24].mxu0  ;;  %8640 = vxpose.xlu0.b32.cont [12/16] (narrow) %v10905_v5, 8  ;;  %8664 = vxpose.xlu1.b32.cont [4/16] (narrow) %v10913_v8, 8  ;;  %v4979_v63 = vpop.f32.mrb[25].mxu1 }
 0x47f   : > { %v10919_v31 = vadd.f32 %v10887_v53, %v10445_v46  ;;  %v10446_v20 = vpop.f32.mrb[26].mxu1  ;;  %v8566_v26 = vpop.f32.mrb[25].mxu0 }
 0x480   : > { %v10920_v47 = vadd.f32 %v8566_v26, %v4979_v63  ;;  %v4982_v24 = vpop.f32.mrb[27].mxu1  ;;  %v10888_v17 = vpop.f32.mrb[26].mxu0 }
 0x481   : > { %v10921_v21 = vadd.f32 %v10888_v17, %v10446_v20  ;;  %v8569_v54 = vpop.f32.mrb[27].mxu0 }
 0x482   : > { %v10922_v40 = vadd.f32 %v8569_v54, %v4982_v24  ;;  %8641 = vxpose.xlu0.b32.cont [13/16] (narrow) %v10908_v32, 8  ;;  %8665 = vxpose.xlu1.b32.cont [5/16] (narrow) %v10916_v50, 8 }
 0x485   : > { %v10449_v30 = vpop.f32.mrb[28].mxu1 }
 0x486   : > { %v10891_v18 = vpop.f32.mrb[28].mxu0  ;;  %8642 = vxpose.xlu0.b32.cont [14/16] (narrow) %v10910_v41, 8  ;;  %8666 = vxpose.xlu1.b32.cont [6/16] (narrow) %v10918_v28, 8  ;;  %v4995_v10 = vpop.f32.mrb[29].mxu1 }
 0x487   : > { %v10923_v27 = vadd.f32 %v10891_v18, %v10449_v30  ;;  %v10450_v42 = vpop.f32.mrb[30].mxu1  ;;  %v8582_v49 = vpop.f32.mrb[29].mxu0 }
 0x488   : > { %v10924_v57 = vadd.f32 %v8582_v49, %v4995_v10  ;;  %v4998_v3 = vpop.f32.mrb[31].mxu1  ;;  %v10892_v7 = vpop.f32.mrb[30].mxu0 }
 0x489   : > { %v10925_v6 = vadd.f32 %v10892_v7, %v10450_v42  ;;  %v8585_v39 = vpop.f32.mrb[31].mxu0 }
 0x48a   : > { %v10926_v14 = vadd.f32 %v8585_v39, %v4998_v3  ;;  %8643 = vxpose.xlu0.b32.cont [15/16] (narrow) %v15040_v19, 8  ;;  %8667 = vxpose.xlu1.b32.cont [7/16] (narrow) %v10915_v59, 8 }
 0x48e   : > { %8644 = vxpose.xlu0.b32.end [16/16] (narrow) %v15042_v38, 8  ;;  %8668 = vxpose.xlu1.b32.cont [8/16] (narrow) %v10917_v1, 8 }
 0x492   : > { %8669 = vxpose.xlu1.b32.cont [9/16] (narrow) %v10920_v47, 8 }
 0x496   : > { %8670 = vxpose.xlu1.b32.cont [10/16] (narrow) %v10922_v40, 8 }
 0x49a   : > { %8671 = vxpose.xlu1.b32.cont [11/16] (narrow) %v10919_v31, 8 }
 0x49e   : > { %8672 = vxpose.xlu1.b32.cont [12/16] (narrow) %v10921_v21, 8 }
 0x4a2   : > { %8673 = vxpose.xlu1.b32.cont [13/16] (narrow) %v10924_v57, 8 }
 0x4a6   : > { %8674 = vxpose.xlu1.b32.cont [14/16] (narrow) %v10926_v14, 8 }
 0x4aa   : > { %8675 = vxpose.xlu1.b32.cont [15/16] (narrow) %v10923_v27, 8 }
 0x4ae   : > { %8676 = vxpose.xlu1.b32.end [16/16] (narrow) %v10925_v6, 8 }
 0x4b7   : > { %11801 = vset.pattern.permute.xlu0 %v11962_v13 }
 0x4d2   : > { %v8645_v35 = vpop.trf.xlu0 }
 0x4d3   : > { %v8699_v9 = vadd.f32 %v8697_v33, %v8645_v35 }
 0x4d5   : > { %v8701_v0 = vmax.f32 %v8699_v9, 0.0 }
 0x4d7   : > { %8703 = vst [vmem:[%s342_s9] sm:$0xff] %v8701_v0 }
 0x4f2   : > { %v8677_v5 = vpop.trf.xlu1 }
 0x4f3   : > { %v8700_v15 = vadd.f32 %v8697_v33, %v8677_v5 }
 0x4f5   : > { %v8702_v55 = vmax.f32 %v8700_v15, 0.0 }
 0x4f7   : > { %8704 = vst [vmem:[%s342_s9 + $0x8] sm:$0xff] %v8702_v55 }
 0x4f8 PF: > { %s15_s22 = sadd.s32 1, %s11960_s22   ;;  %s15806_s18 = smov %s11952_s20 }
 0x4f9   : > { %p12_p10 = scmp.ge.s32.totalorder %s15_s22, 34   ;;  %s15807_s19 = smov %s11956_s21 }
 0x4fa   : > { %s15808_s20 = smov %s15811_s23  ;;  %s15809_s21 = smov %s15815_s24 }
 0x4fb   :  { %14 = sbr.rel (!%p12_p10) target bundleno = 3 (0x3), region = 76 }

</bundles_post_ra>
